<compile_context>
chip_gen: v6e
topology: v6e:2x2x1
jax: 0.10.0
libtpu: 0.0.40
codegen_flags: <defaults>
</compile_context>

<pallas_src>
import functools

import jax
import jax.numpy as jnp
from jax import lax
from jax.experimental import pallas as pl
from jax.experimental.pallas import tpu as pltpu


# ----------------------------------------------------------------------------
# helpers
# ----------------------------------------------------------------------------

_VMEM_LIMIT_BYTES = 48 * 1024 * 1024  # above 16/32 MiB scoped defaults, < v7x 64 MiB


def _cparams(*sem):
    return pltpu.CompilerParams(dimension_semantics=tuple(sem),
                                vmem_limit_bytes=_VMEM_LIMIT_BYTES)


def _round_up(x, m):
    return ((x + m - 1) // m) * m


def _tile(dim, pref, align):
    """Pick a tile size (multiple of `align`, at most `pref`) and padded extent."""
    t = min(pref, _round_up(dim, align))
    return t, _round_up(dim, t)


# ----------------------------------------------------------------------------
# Weight preparation (done ONCE at init -- never in the forward path)
# ----------------------------------------------------------------------------

def prep_linear(w, b=None, tn_pref=512, tk_pref=512):
    """w: (K, N) f32, b: (N,) f32 -> padded bf16 weight + f32 bias, tile sizes."""
    K, N = w.shape
    if b is None:
        b = jnp.zeros((N,), jnp.float32)
    tn, Np = _tile(N, tn_pref, 128)
    tk, Kp = _tile(K, tk_pref, 128)
    wp = jnp.pad(w.astype(jnp.float32), ((0, Kp - K), (0, Np - N))).astype(jnp.bfloat16)
    bp = jnp.pad(b.astype(jnp.float32), (0, Np - N)).reshape(1, Np)
    return dict(w=wp, b=bp, k=K, n=N, tk=tk, tn=tn)


def prep_conv(w, b, tco_pref=256):
    """w: (Cout, Cin, kh, kw) torch layout -> (kh*kw, Cin, Cop) bf16 + f32 bias."""
    Cout, Cin, kh, kw = w.shape
    tco, Cop = _tile(Cout, tco_pref, 128)
    wk = jnp.transpose(w.astype(jnp.float32), (2, 3, 1, 0)).reshape(kh * kw, Cin, Cout)
    wk = jnp.pad(wk, ((0, 0), (0, 0), (0, Cop - Cout))).astype(jnp.bfloat16)
    bp = jnp.pad(b.astype(jnp.float32), (0, Cop - Cout)).reshape(1, Cop)
    return dict(w=wk, b=bp, cout=Cout, cin=Cin, kh=kh, kw=kw, tco=tco)


# ----------------------------------------------------------------------------
# Tiled MXU matmul with fused bias / activation / residual epilogue
# ----------------------------------------------------------------------------

def _mm_kernel(x_ref, w_ref, b_ref, *rest, act, has_res):
    if has_res:
        r_ref, o_ref, acc_ref = rest
    else:
        r_ref = None
        o_ref, acc_ref = rest

    @pl.when(pl.program_id(2) == 0)
    def _init():
        acc_ref[...] = jnp.zeros_like(acc_ref)

    acc_ref[...] += jnp.dot(x_ref[...], w_ref[...],
                            preferred_element_type=jnp.float32)

    @pl.when(pl.program_id(2) == pl.num_programs(2) - 1)
    def _finalize():
        y = acc_ref[...] + b_ref[...]
        if act == "silu":
            y = y * jax.nn.sigmoid(y)
        elif act == "quick_gelu":
            y = y * jax.nn.sigmoid(1.702 * y)
        if has_res:
            y = y + r_ref[...]
        o_ref[...] = y.astype(o_ref.dtype)


def pallas_linear(x, lin, act="none", residual=None, out_dtype=jnp.float32):
    """x: (M, K) any float dtype, lin: prepared weight dict -> (M, N) out_dtype."""
    M, K = x.shape
    assert K == lin["k"], (K, lin["k"])
    wp, bp = lin["w"], lin["b"]
    Kp, Np = wp.shape
    N = lin["n"]
    tk, tn = lin["tk"], lin["tn"]
    tm, Mp = _tile(M, 512, 16)

    xb = x.astype(jnp.bfloat16)
    if (Mp, Kp) != (M, K):
        xb = jnp.pad(xb, ((0, Mp - M), (0, Kp - K)))

    in_specs = [
        pl.BlockSpec((tm, tk), lambda i, j, k: (i, k)),
        pl.BlockSpec((tk, tn), lambda i, j, k: (k, j)),
        pl.BlockSpec((1, tn), lambda i, j, k: (0, j)),
    ]
    args = [xb, wp, bp]
    has_res = residual is not None
    if has_res:
        rp = residual
        if (Mp, Np) != (M, N):
            rp = jnp.pad(rp, ((0, Mp - M), (0, Np - N)))
        in_specs.append(pl.BlockSpec((tm, tn), lambda i, j, k: (i, j)))
        args.append(rp)

    out = pl.pallas_call(
        functools.partial(_mm_kernel, act=act, has_res=has_res),
        out_shape=jax.ShapeDtypeStruct((Mp, Np), out_dtype),
        grid=(Mp // tm, Np // tn, Kp // tk),
        in_specs=in_specs,
        out_specs=pl.BlockSpec((tm, tn), lambda i, j, k: (i, j)),
        scratch_shapes=[pltpu.VMEM((tm, tn), jnp.float32)],
        compiler_params=_cparams("parallel", "parallel", "arbitrary"),
    )(*args)
    if (Mp, Np) != (M, N):
        out = out[:M, :N]
    return out


# ----------------------------------------------------------------------------
# Conv2d: padded NHWC slab in VMEM, 3x3 taps accumulated in-kernel.
# Strides are handled by polyphase decomposition in the wrapper so every
# in-kernel slice is a contiguous unit-stride window (interpreter-safe).
# ----------------------------------------------------------------------------

def _conv_kernel(x_ref, w_ref, b_ref, o_ref, *, kh, kw, stride, hs, ho, wo, act):
    cin = x_ref.shape[-1]
    cout = o_ref.shape[-1]
    acc = jnp.zeros((ho * wo, cout), jnp.float32)
    for ki in range(kh):
        for kj in range(kw):
            p = (ki % stride) * stride + (kj % stride)
            slab = x_ref[0, pl.ds(p * hs + ki // stride, ho),
                         pl.ds(kj // stride, wo), :]            # (ho, wo, cin) bf16
            acc = acc + jnp.dot(slab.reshape(ho * wo, cin),
                                w_ref[ki * kw + kj],
                                preferred_element_type=jnp.float32)
    y = acc + b_ref[...]
    if act == "silu":
        y = y * jax.nn.sigmoid(y)
    o_ref[...] = y[None].astype(o_ref.dtype)


def conv2d(x, conv, stride=1, padding=1, act="none", out_dtype=jnp.float32):
    """x: (B, H, W, Cin) NHWC, conv: prepared conv dict -> (B, Ho, Wo, Cout)."""
    B, H, W, Cin = x.shape
    kh, kw = conv["kh"], conv["kw"]
    Cout, tco = conv["cout"], conv["tco"]
    Cop = conv["w"].shape[-1]
    Ho = (H + 2 * padding - kh) // stride + 1
    Wo = (W + 2 * padding - kw) // stride + 1
    Hp, Wp = H + 2 * padding, W + 2 * padding

    xb = x.astype(jnp.bfloat16)
    xp = jnp.pad(xb, ((0, 0), (padding, padding), (padding, padding), (0, 0)))

    if stride == 1:
        P, Hs, Ws = 1, Hp, Wp
        xs = xp
    else:
        # polyphase decomposition: phase (a, b) holds xp[a::s, b::s, :]
        Hs = -(-Hp // stride)
        Ws = -(-Wp // stride)
        phases = []
        for a in range(stride):
            for bb in range(stride):
                ph = xp[:, a::stride, bb::stride, :]
                ph = jnp.pad(ph, ((0, 0), (0, Hs - ph.shape[1]),
                                  (0, Ws - ph.shape[2]), (0, 0)))
                phases.append(ph)
        P = stride * stride
        xs = jnp.concatenate(phases, axis=1)                    # (B, P*Hs, Ws, Cin)

    # TODO(synk): at real SD resolutions tile spatially (row blocks + halo) instead
    # of loading the whole per-batch slab; at these sizes the slab fits VMEM easily.
    out = pl.pallas_call(
        functools.partial(_conv_kernel, kh=kh, kw=kw, stride=stride,
                          hs=Hs, ho=Ho, wo=Wo, act=act),
        out_shape=jax.ShapeDtypeStruct((B, Ho * Wo, Cop), out_dtype),
        grid=(B, Cop // tco),
        in_specs=[
            pl.BlockSpec((1, P * Hs, Ws, Cin), lambda bi, co: (bi, 0, 0, 0)),
            pl.BlockSpec((kh * kw, Cin, tco), lambda bi, co: (0, 0, co)),
            pl.BlockSpec((1, tco), lambda bi, co: (0, co)),
        ],
        out_specs=pl.BlockSpec((1, Ho * Wo, tco), lambda bi, co: (bi, 0, co)),
        compiler_params=_cparams("parallel", "parallel"),
    )(xs, conv["w"], conv["b"])
    out = out.reshape(B, Ho, Wo, Cop)
    if Cop != Cout:
        out = out[..., :Cout]
    return out


# ----------------------------------------------------------------------------
# GroupNorm: one lane-dense (HW, C) slab per batch element, fused SiLU.
# ----------------------------------------------------------------------------

_MEMBER_CACHE = {}


def _group_member(C, G):
    key = (C, G)
    if key not in _MEMBER_CACHE:
        Cg = C // G
        _MEMBER_CACHE[key] = (jnp.arange(C)[:, None] // Cg ==
                              jnp.arange(G)[None, :]).astype(jnp.float32)
    return _MEMBER_CACHE[key]


def _groupnorm_kernel(x_ref, m_ref, g_ref, b_ref, o_ref, *, inv_count, eps, act):
    x = x_ref[0].astype(jnp.float32)                  # (HW, C)
    m = m_ref[...]                                    # (C, G) one-hot membership
    gsum = jnp.dot(jnp.sum(x, axis=0, keepdims=True), m,
                   preferred_element_type=jnp.float32)            # (1, G)
    mean_c = jnp.dot(gsum * inv_count, m.T,
                     preferred_element_type=jnp.float32)          # (1, C)
    d = x - mean_c
    vsum = jnp.dot(jnp.sum(d * d, axis=0, keepdims=True), m,
                   preferred_element_type=jnp.float32)            # (1, G)
    rstd_c = jnp.dot(lax.rsqrt(vsum * inv_count + eps), m.T,
                     preferred_element_type=jnp.float32)          # (1, C)
    y = d * rstd_c * g_ref[...] + b_ref[...]
    if act == "silu":
        y = y * jax.nn.sigmoid(y)
    o_ref[...] = y[None].astype(o_ref.dtype)


def pallas_group_norm(x, gamma, beta, num_groups, eps=1e-5, act="none",
                      out_dtype=jnp.float32):
    """x: (B, H, W, C) NHWC; gamma/beta: (1, C)."""
    B, H, W, C = x.shape
    G = num_groups
    Cg = C // G
    HW = H * W
    xr = x.reshape(B, HW, C)
    member = _group_member(C, G)
    # TODO(synk): for real decoder resolutions convert to a two-pass HW-tiled
    # reduction (partial sum / sum-of-squares scratch) instead of one slab per b.
    out = pl.pallas_call(
        functools.partial(_groupnorm_kernel, inv_count=1.0 / (HW * Cg),
                          eps=eps, act=act),
        out_shape=jax.ShapeDtypeStruct((B, HW, C), out_dtype),
        grid=(B,),
        in_specs=[
            pl.BlockSpec((1, HW, C), lambda bb: (bb, 0, 0)),
            pl.BlockSpec((C, G), lambda bb: (0, 0)),
            pl.BlockSpec((1, C), lambda bb: (0, 0)),
            pl.BlockSpec((1, C), lambda bb: (0, 0)),
        ],
        out_specs=pl.BlockSpec((1, HW, C), lambda bb: (bb, 0, 0)),
        compiler_params=_cparams("parallel"),
    )(xr, member, gamma, beta)
    return out.reshape(B, H, W, C)


# ----------------------------------------------------------------------------
# LayerNorm (row-tiled, lane-dense)
# ----------------------------------------------------------------------------

def _layernorm_kernel(x_ref, g_ref, b_ref, o_ref, *, eps):
    x = x_ref[...].astype(jnp.float32)
    mean = jnp.mean(x, axis=-1, keepdims=True)
    var = jnp.mean((x - mean) ** 2, axis=-1, keepdims=True)
    y = (x - mean) * lax.rsqrt(var + eps) * g_ref[...] + b_ref[...]
    o_ref[...] = y.astype(o_ref.dtype)


def pallas_layer_norm(x2d, gamma, beta, eps=1e-5, out_dtype=jnp.float32):
    M, D = x2d.shape
    tm, Mp = _tile(M, 512, 16)
    xp = x2d if Mp == M else jnp.pad(x2d, ((0, Mp - M), (0, 0)))
    out = pl.pallas_call(
        functools.partial(_layernorm_kernel, eps=eps),
        out_shape=jax.ShapeDtypeStruct((Mp, D), out_dtype),
        grid=(Mp // tm,),
        in_specs=[
            pl.BlockSpec((tm, D), lambda i: (i, 0)),
            pl.BlockSpec((1, D), lambda i: (0, 0)),
            pl.BlockSpec((1, D), lambda i: (0, 0)),
        ],
        out_specs=pl.BlockSpec((tm, D), lambda i: (i, 0)),
        compiler_params=_cparams("parallel"),
    )(xp, gamma, beta)
    return out if Mp == M else out[:M]


# ----------------------------------------------------------------------------
# Flash-style attention (online softmax over Sk tiles, lane-dense (1,S,D) blocks)
# ----------------------------------------------------------------------------

def _flash_attn_kernel(q_ref, k_ref, v_ref, o_ref, qh_ref, m_ref, l_ref, acc_ref,
                       *, scale, causal, heads, dh, sk):
    tq = q_ref.shape[1]
    tk = k_ref.shape[1]
    qi = pl.program_id(1)
    ki = pl.program_id(2)

    @pl.when(ki == 0)
    def _init():
        # scale folded into q once per query tile; head-split cached in VMEM
        qh_ref[...] = jnp.transpose((q_ref[0] * scale).reshape(tq, heads, dh),
                                    (1, 0, 2))
        m_ref[...] = jnp.full_like(m_ref, -1e30)
        l_ref[...] = jnp.zeros_like(l_ref)
        acc_ref[...] = jnp.zeros_like(acc_ref)

    k = k_ref[0]                                           # (tk, D) bf16
    v = v_ref[0]                                           # (tk, D) bf16
    kh_ = jnp.transpose(k.reshape(tk, heads, dh), (1, 0, 2))   # (H, tk, dh)
    vh = jnp.transpose(v.reshape(tk, heads, dh), (1, 0, 2))    # (H, tk, dh)

    s = jnp.einsum('hqd,hkd->hqk', qh_ref[...], kh_,
                   preferred_element_type=jnp.float32)     # (H, tq, tk)

    col = ki * tk + lax.broadcasted_iota(jnp.int32, (1, tq, tk), 2)
    valid = col < sk                                       # mask padded keys
    if causal:
        row = qi * tq + lax.broadcasted_iota(jnp.int32, (1, tq, tk), 1)
        valid = jnp.logical_and(valid, col <= row)
    s = jnp.where(valid, s, -1e30)

    m_prev = m_ref[...]                                    # (H, tq)
    m_new = jnp.maximum(m_prev, jnp.max(s, axis=-1))
    alpha = jnp.exp(m_prev - m_new)
    p = jnp.exp(s - m_new[..., None])                      # (H, tq, tk)
    l_ref[...] = alpha * l_ref[...] + jnp.sum(p, axis=-1)
    acc_ref[...] = alpha[..., None] * acc_ref[...] + jnp.einsum(
        'hqk,hkd->hqd', p.astype(v.dtype), vh,
        preferred_element_type=jnp.float32)
    m_ref[...] = m_new

    @pl.when(ki == pl.num_programs(2) - 1)
    def _finalize():
        out = acc_ref[...] / l_ref[...][..., None]         # (H, tq, dh)
        o_ref[...] = jnp.transpose(out, (1, 0, 2)).reshape(
            1, tq, heads * dh).astype(o_ref.dtype)


def pallas_attention(q, k, v, num_heads, causal=False, out_dtype=jnp.bfloat16):
    """q: (B, Sq, D), k/v: (B, Sk, D) -> (B, Sq, D). Heads split in-kernel."""
    B, Sq, D = q.shape
    _, Sk, _ = k.shape
    dh = D // num_heads
    scale = 1.0 / (dh ** 0.5)
    tq, Sqp = _tile(Sq, 256, 16)
    tk, Skp = _tile(Sk, 512, 16)

    def padseq(a, sp):
        a = a.astype(jnp.bfloat16)
        if sp != a.shape[1]:
            a = jnp.pad(a, ((0, 0), (0, sp - a.shape[1]), (0, 0)))
        return a

    qp, kp, vp = padseq(q, Sqp), padseq(k, Skp), padseq(v, Skp)
    out = pl.pallas_call(
        functools.partial(_flash_attn_kernel, scale=scale, causal=causal,
                          heads=num_heads, dh=dh, sk=Sk),
        out_shape=jax.ShapeDtypeStruct((B, Sqp, D), out_dtype),
        grid=(B, Sqp // tq, Skp // tk),
        in_specs=[
            pl.BlockSpec((1, tq, D), lambda b, i, j: (b, i, 0)),
            pl.BlockSpec((1, tk, D), lambda b, i, j: (b, j, 0)),
            pl.BlockSpec((1, tk, D), lambda b, i, j: (b, j, 0)),
        ],
        out_specs=pl.BlockSpec((1, tq, D), lambda b, i, j: (b, i, 0)),
        scratch_shapes=[
            pltpu.VMEM((num_heads, tq, dh), jnp.bfloat16),
            pltpu.VMEM((num_heads, tq), jnp.float32),
            pltpu.VMEM((num_heads, tq), jnp.float32),
            pltpu.VMEM((num_heads, tq, dh), jnp.float32),
        ],
        compiler_params=_cparams("parallel", "parallel", "arbitrary"),
    )(qp, kp, vp)
    if Sqp != Sq:
        out = out[:, :Sq, :]
    return out


# ----------------------------------------------------------------------------
# Small glue in plain JAX (launch/HBM overhead would dominate in a kernel)
# ----------------------------------------------------------------------------

def get_time_embedding(timestep):
    freqs = jnp.power(10000.0, -jnp.arange(0, 160, dtype=jnp.float32) / 160.0)
    x = timestep[:, None].astype(jnp.float32) * freqs[None, :]
    return jnp.concatenate([jnp.cos(x), jnp.sin(x)], axis=-1)   # (Bt, 320)


# ----------------------------------------------------------------------------
# Model pieces (NHWC internally)
# ----------------------------------------------------------------------------

def mha(p, x, num_heads, context=None, causal=False, residual=None):
    """x: (B, S, D); context: (B, Sk, Dc) or None. Fused QKV / KV projections."""
    B, S, D = x.shape
    if context is None:
        qkv = pallas_linear(x.reshape(B * S, D), p["wqkv"], out_dtype=jnp.bfloat16)
        q2, k2, v2 = jnp.split(qkv, 3, axis=-1)
        q, k, v = q2.reshape(B, S, D), k2.reshape(B, S, D), v2.reshape(B, S, D)
    else:
        Bc, Sk, Dc = context.shape
        q = pallas_linear(x.reshape(B * S, D), p["wq"],
                          out_dtype=jnp.bfloat16).reshape(B, S, D)
        kv = pallas_linear(context.reshape(Bc * Sk, Dc), p["wkv"],
                           out_dtype=jnp.bfloat16)
        k2, v2 = jnp.split(kv, 2, axis=-1)
        k, v = k2.reshape(Bc, Sk, D), v2.reshape(Bc, Sk, D)
    o = pallas_attention(q, k, v, num_heads, causal=causal)
    res2d = None if residual is None else residual.reshape(B * S, D)
    o = pallas_linear(o.reshape(B * S, D), p["wo"], residual=res2d)
    return o.reshape(B, S, D)


def vae_encoder(params, x, noise, cfg):
    p = params["vae_enc"]
    G = cfg["vae_num_groups"]
    h = conv2d(x, p["conv1"], out_dtype=jnp.bfloat16)
    h = pallas_group_norm(h, p["gn1_g"], p["gn1_b"], G, act="silu",
                          out_dtype=jnp.bfloat16)
    h = conv2d(h, p["conv2"], stride=2, out_dtype=jnp.bfloat16)
    h = pallas_group_norm(h, p["gn2_g"], p["gn2_b"], G, act="silu",
                          out_dtype=jnp.bfloat16)
    h = conv2d(h, p["conv3"])                            # (B, h, w, 2*latent) f32
    mean, logvar = jnp.split(h, 2, axis=-1)
    logvar = jnp.clip(logvar, -30.0, 20.0)
    std = jnp.exp(0.5 * logvar)
    z = mean + std * noise
    return z * 0.18215


def clip_encoder(params, tokens, cfg):
    p = params["clip"]
    D = cfg["clip_emb_dim"]
    heads = cfg["clip_attn_num_heads"]
    B, S = tokens.shape
    # TODO(synk): token-embedding gather stays in plain JAX (no Pallas gather used).
    x = p["tok_emb"][tokens] + p["pos_emb"][None, :S, :]
    for layer in p["layers"]:
        r = x
        h = pallas_layer_norm(x.reshape(B * S, D), layer["ln1_g"], layer["ln1_b"],
                              out_dtype=jnp.bfloat16).reshape(B, S, D)
        x = mha(layer["attn"], h, heads, causal=True, residual=r)
        r = x
        h = pallas_layer_norm(x.reshape(B * S, D), layer["ln2_g"], layer["ln2_b"],
                              out_dtype=jnp.bfloat16)
        h = pallas_linear(h, layer["fc1"], act="quick_gelu", out_dtype=jnp.bfloat16)
        h = pallas_linear(h, layer["fc2"], residual=r.reshape(B * S, D))
        x = h.reshape(B, S, D)
    x = pallas_layer_norm(x.reshape(B * S, D), p["lnf_g"], p["lnf_b"],
                          out_dtype=jnp.bfloat16).reshape(B, S, D)
    return x


def unet(params, x, t_emb, context, cfg):
    """x: (B, h, w, Cl) NHWC."""
    p = params["unet"]
    B, H, W, Cl = x.shape
    G = cfg["unet_num_groups"]
    F = cfg["unet_features"]
    heads = cfg["unet_attn_num_heads"]
    # time MLP: (1, 320) -> (1, Td)
    t = pallas_linear(t_emb, p["time_w1"], act="silu")
    t = pallas_linear(t, p["time_w2"])
    h = conv2d(x, p["conv_in"])                          # (B, H, W, F) f32 stream
    # ResBlock with time conditioning
    res = h
    h = pallas_group_norm(h, p["rb_gn1_g"], p["rb_gn1_b"], G, act="silu",
                          out_dtype=jnp.bfloat16)
    h = conv2d(h, p["rb_conv1"])
    t_act = t * jax.nn.sigmoid(t)                        # tiny glue SiLU on (1, Td)
    t_proj = pallas_linear(t_act, p["rb_time"])          # (1, F)
    h = h + t_proj.reshape(1, 1, 1, F)
    h = pallas_group_norm(h, p["rb_gn2_g"], p["rb_gn2_b"], G, act="silu",
                          out_dtype=jnp.bfloat16)
    h = conv2d(h, p["rb_conv2"])
    h = h + res
    # Attention block: self-attn + cross-attn over flattened spatial positions
    res = h
    hn = pallas_group_norm(h, p["ab_gn_g"], p["ab_gn_b"], G, out_dtype=jnp.bfloat16)
    seq = hn.reshape(B, H * W, F)                        # NHWC -> (B, HW, F)
    seq = mha(p["self_attn"], seq, heads, residual=seq)
    seq = mha(p["cross_attn"], seq, heads, context=context, residual=seq)
    h = seq.reshape(B, H, W, F) + res
    # output head
    h = pallas_group_norm(h, p["out_gn_g"], p["out_gn_b"], G, act="silu",
                          out_dtype=jnp.bfloat16)
    h = conv2d(h, p["conv_out"])                         # (B, H, W, Cl)
    return h


def vae_decoder(params, z, cfg):
    p = params["vae_dec"]
    G = cfg["vae_num_groups"]
    x = z / 0.18215
    x = conv2d(x, p["conv_in"], out_dtype=jnp.bfloat16)
    x = pallas_group_norm(x, p["gn1_g"], p["gn1_b"], G, act="silu",
                          out_dtype=jnp.bfloat16)
    # TODO(synk): fuse this nearest-neighbour 2x upsample into conv_mid's in-kernel
    # reads (source row = out_row // 2) to avoid materializing the 4x tensor.
    x = jnp.repeat(jnp.repeat(x, 2, axis=1), 2, axis=2)
    x = conv2d(x, p["conv_mid"], out_dtype=jnp.bfloat16)
    x = pallas_group_norm(x, p["gn2_g"], p["gn2_b"], G, act="silu",
                          out_dtype=jnp.bfloat16)
    x = conv2d(x, p["conv_out"])
    return x


def stable_diffusion_forward(params, cfg, img, tokens, time, noise, do_cfg=True):
    img_nhwc = jnp.transpose(img, (0, 2, 3, 1))
    noise_nhwc = jnp.transpose(noise, (0, 2, 3, 1))
    latents = vae_encoder(params, img_nhwc, noise_nhwc, cfg)      # (B, h, w, L)
    context = clip_encoder(params, tokens, cfg)                   # (B, S, D)
    t_emb = get_time_embedding(time)                              # (1, 320)
    unet_out = unet(params, latents, t_emb, context, cfg)         # (B, h, w, L)
    if do_cfg:
        half = unet_out.shape[0] // 2
        cond, uncond = unet_out[:half], unet_out[half:]
        # classifier-free guidance combine: tiny elementwise op, plain JAX by design
        unet_out = cfg["cfg_scale"] * (cond - uncond) + uncond
    dec = vae_decoder(params, unet_out, cfg)                      # (B', H, W, 3)
    return jnp.transpose(dec, (0, 3, 1, 2))                       # NCHW out


# ----------------------------------------------------------------------------
# Deterministic parameter init (weights stored in kernel-ready layouts ONCE)
# ----------------------------------------------------------------------------

CFG = dict(
    batch_size=2,
    img_channels=3,
    img_size=16,
    vae_features=32,
    vae_num_groups=8,
    vae_latent_dim=4,
    img_latent_size=8,
    vocab_size=1000,
    clip_emb_dim=32,
    clip_seq_len=8,
    clip_attn_num_heads=4,
    clip_emb_dim_scale_factor=4,
    clip_num_layers=2,
    unet_features=32,
    unet_num_groups=8,
    unet_attn_num_heads=4,
    unet_time_emb_dim=64,
    cfg_scale=7.5,
)


def init_params(key, cfg):
    keys = [key]

    def nk():
        keys[0], sub = jax.random.split(keys[0])
        return sub

    def w(*shape, scale=0.05):
        return (scale * jax.random.normal(nk(), shape)).astype(jnp.float32)

    def zeros(*shape):
        return jnp.zeros(shape, jnp.float32)

    def ones(*shape):
        return jnp.ones(shape, jnp.float32)

    def lin(k_in, n_out):
        return prep_linear(w(k_in, n_out), zeros(n_out))

    def conv(c_out, c_in):
        return prep_conv(w(c_out, c_in, 3, 3), zeros(c_out))

    def self_attn_p(d):
        return dict(
            wqkv=prep_linear(jnp.concatenate([w(d, d), w(d, d), w(d, d)], axis=1),
                             zeros(3 * d)),
            wo=lin(d, d))

    def cross_attn_p(d, dc):
        return dict(
            wq=lin(d, d),
            wkv=prep_linear(jnp.concatenate([w(dc, d), w(dc, d)], axis=1),
                            zeros(2 * d)),
            wo=lin(d, d))

    C = cfg["vae_features"]
    L = cfg["vae_latent_dim"]
    IC = cfg["img_channels"]
    vae_enc = dict(
        conv1=conv(C, IC), gn1_g=ones(1, C), gn1_b=zeros(1, C),
        conv2=conv(C, C), gn2_g=ones(1, C), gn2_b=zeros(1, C),
        conv3=conv(2 * L, C))

    D = cfg["clip_emb_dim"]
    S = cfg["clip_seq_len"]
    V = cfg["vocab_size"]
    Dff = D * cfg["clip_emb_dim_scale_factor"]
    layers = []
    for _ in range(cfg["clip_num_layers"]):
        layers.append(dict(
            ln1_g=ones(1, D), ln1_b=zeros(1, D),
            attn=self_attn_p(D),
            ln2_g=ones(1, D), ln2_b=zeros(1, D),
            fc1=lin(D, Dff), fc2=lin(Dff, D)))
    clip = dict(tok_emb=w(V, D, scale=0.02), pos_emb=w(S, D, scale=0.02),
                layers=layers, lnf_g=ones(1, D), lnf_b=zeros(1, D))

    F = cfg["unet_features"]
    Td = cfg["unet_time_emb_dim"]
    unet_p = dict(
        time_w1=lin(320, Td), time_w2=lin(Td, Td),
        conv_in=conv(F, L),
        rb_gn1_g=ones(1, F), rb_gn1_b=zeros(1, F),
        rb_conv1=conv(F, F),
        rb_time=lin(Td, F),
        rb_gn2_g=ones(1, F), rb_gn2_b=zeros(1, F),
        rb_conv2=conv(F, F),
        ab_gn_g=ones(1, F), ab_gn_b=zeros(1, F),
        self_attn=self_attn_p(F),
        cross_attn=cross_attn_p(F, D),
        out_gn_g=ones(1, F), out_gn_b=zeros(1, F),
        conv_out=conv(L, F))

    vae_dec = dict(
        conv_in=conv(C, L), gn1_g=ones(1, C), gn1_b=zeros(1, C),
        conv_mid=conv(C, C), gn2_g=ones(1, C), gn2_b=zeros(1, C),
        conv_out=conv(IC, C))

    return dict(vae_enc=vae_enc, clip=clip, unet=unet_p, vae_dec=vae_dec)


# ----------------------------------------------------------------------------
# Main
# ----------------------------------------------------------------------------

if __name__ == "__main__":
    key = jax.random.PRNGKey(0)
    k_params, k_img, k_tok, k_noise = jax.random.split(key, 4)
    params = init_params(k_params, CFG)

    B = CFG["batch_size"]
    img = jax.random.normal(
        k_img, (B, CFG["img_channels"], CFG["img_size"], CFG["img_size"]), jnp.float32)
    tokens = jax.random.randint(k_tok, (B, CFG["clip_seq_len"]), 0, CFG["vocab_size"])
    time = jnp.array([3.0], jnp.float32)
    # TODO(synk): torch.randn noise is replaced by deterministic jax.random noise.
    noise = jax.random.normal(
        k_noise,
        (B, CFG["vae_latent_dim"], CFG["img_latent_size"], CFG["img_latent_size"]),
        jnp.float32)

    out = stable_diffusion_forward(params, CFG, img, tokens, time, noise, do_cfg=True)
    out = jax.block_until_ready(out)

    assert out.shape == (B // 2, CFG["img_channels"], CFG["img_size"], CFG["img_size"]), out.shape
    assert bool(jnp.all(jnp.isfinite(out)))
    print("KERNEL_OK")
</pallas_src>

<mosaic_0001>
module attributes {stable_mosaic.version = 11 : i64} {
  func.func @_conv_kernel(%arg0: i32, %arg1: i32, %arg2: memref<1x18x18x3xbf16, #tpu.memory_space<vmem>>, %arg3: memref<9x3x128xbf16, #tpu.memory_space<vmem>>, %arg4: memref<1x128xf32, #tpu.memory_space<vmem>>, %arg5: memref<1x256x128xbf16, #tpu.memory_space<vmem>>) attributes {dimension_semantics = [#tpu.dimension_semantics<parallel>, #tpu.dimension_semantics<parallel>], iteration_bounds = array<i64: 2, 1>, scalar_prefetch = 0 : i64, scratch_operands = 0 : i64, tpu.core_type = #tpu.core_type<tc>, window_params = [{transform_indices = @transform_0, window_bounds = array<i64: 1, 18, 18, 3>}, {transform_indices = @transform_1, window_bounds = array<i64: 9, 3, 128>}, {transform_indices = @transform_2, window_bounds = array<i64: 1, 128>}, {transform_indices = @transform_3, window_bounds = array<i64: 1, 256, 128>}]} {
    %cst = arith.constant 0.000000e+00 : f32
    %0 = vector.broadcast %cst : f32 to vector<256x128xf32>
    %c0 = arith.constant 0 : index
    %c0_0 = arith.constant 0 : index
    %c0_1 = arith.constant 0 : index
    %c0_2 = arith.constant 0 : index
    %1 = vector.load %arg2[%c0, %c0_0, %c0_1, %c0_2] : memref<1x18x18x3xbf16, #tpu.memory_space<vmem>>, vector<1x16x16x3xbf16>
    %2 = vector.shape_cast %1 : vector<1x16x16x3xbf16> to vector<16x16x3xbf16>
    %3 = vector.shape_cast %2 : vector<16x16x3xbf16> to vector<256x3xbf16>
    %c0_3 = arith.constant 0 : index
    %c0_4 = arith.constant 0 : index
    %c0_5 = arith.constant 0 : index
    %4 = vector.load %arg3[%c0_3, %c0_4, %c0_5] : memref<9x3x128xbf16, #tpu.memory_space<vmem>>, vector<1x3x128xbf16>
    %5 = vector.shape_cast %4 : vector<1x3x128xbf16> to vector<3x128xbf16>
    %cst_6 = arith.constant dense<0.000000e+00> : vector<256x128xf32>
    %6 = tpu.matmul %3, %5, %cst_6 {dimension_numbers = #tpu.dot_dimension_numbers<[1], [0], [0], [1], [0, 0, 1, 1], [], []>} : vector<256x3xbf16>, vector<3x128xbf16>, vector<256x128xf32> -> vector<256x128xf32>
    %7 = arith.addf %0, %6 : vector<256x128xf32>
    %c0_7 = arith.constant 0 : index
    %c0_8 = arith.constant 0 : index
    %c1 = arith.constant 1 : index
    %c0_9 = arith.constant 0 : index
    %8 = vector.load %arg2[%c0_7, %c0_8, %c1, %c0_9] : memref<1x18x18x3xbf16, #tpu.memory_space<vmem>>, vector<1x16x16x3xbf16>
    %9 = vector.shape_cast %8 : vector<1x16x16x3xbf16> to vector<16x16x3xbf16>
    %10 = vector.shape_cast %9 : vector<16x16x3xbf16> to vector<256x3xbf16>
    %c1_10 = arith.constant 1 : index
    %c0_11 = arith.constant 0 : index
    %c0_12 = arith.constant 0 : index
    %11 = vector.load %arg3[%c1_10, %c0_11, %c0_12] : memref<9x3x128xbf16, #tpu.memory_space<vmem>>, vector<1x3x128xbf16>
    %12 = vector.shape_cast %11 : vector<1x3x128xbf16> to vector<3x128xbf16>
    %cst_13 = arith.constant dense<0.000000e+00> : vector<256x128xf32>
    %13 = tpu.matmul %10, %12, %cst_13 {dimension_numbers = #tpu.dot_dimension_numbers<[1], [0], [0], [1], [0, 0, 1, 1], [], []>} : vector<256x3xbf16>, vector<3x128xbf16>, vector<256x128xf32> -> vector<256x128xf32>
    %14 = arith.addf %7, %13 : vector<256x128xf32>
    %c0_14 = arith.constant 0 : index
    %c0_15 = arith.constant 0 : index
    %c2 = arith.constant 2 : index
    %c0_16 = arith.constant 0 : index
    %15 = vector.load %arg2[%c0_14, %c0_15, %c2, %c0_16] : memref<1x18x18x3xbf16, #tpu.memory_space<vmem>>, vector<1x16x16x3xbf16>
    %16 = vector.shape_cast %15 : vector<1x16x16x3xbf16> to vector<16x16x3xbf16>
    %17 = vector.shape_cast %16 : vector<16x16x3xbf16> to vector<256x3xbf16>
    %c2_17 = arith.constant 2 : index
    %c0_18 = arith.constant 0 : index
    %c0_19 = arith.constant 0 : index
    %18 = vector.load %arg3[%c2_17, %c0_18, %c0_19] : memref<9x3x128xbf16, #tpu.memory_space<vmem>>, vector<1x3x128xbf16>
    %19 = vector.shape_cast %18 : vector<1x3x128xbf16> to vector<3x128xbf16>
    %cst_20 = arith.constant dense<0.000000e+00> : vector<256x128xf32>
    %20 = tpu.matmul %17, %19, %cst_20 {dimension_numbers = #tpu.dot_dimension_numbers<[1], [0], [0], [1], [0, 0, 1, 1], [], []>} : vector<256x3xbf16>, vector<3x128xbf16>, vector<256x128xf32> -> vector<256x128xf32>
    %21 = arith.addf %14, %20 : vector<256x128xf32>
    %c0_21 = arith.constant 0 : index
    %c1_22 = arith.constant 1 : index
    %c0_23 = arith.constant 0 : index
    %c0_24 = arith.constant 0 : index
    %22 = vector.load %arg2[%c0_21, %c1_22, %c0_23, %c0_24] : memref<1x18x18x3xbf16, #tpu.memory_space<vmem>>, vector<1x16x16x3xbf16>
    %23 = vector.shape_cast %22 : vector<1x16x16x3xbf16> to vector<16x16x3xbf16>
    %24 = vector.shape_cast %23 : vector<16x16x3xbf16> to vector<256x3xbf16>
    %c3 = arith.constant 3 : index
    %c0_25 = arith.constant 0 : index
    %c0_26 = arith.constant 0 : index
    %25 = vector.load %arg3[%c3, %c0_25, %c0_26] : memref<9x3x128xbf16, #tpu.memory_space<vmem>>, vector<1x3x128xbf16>
    %26 = vector.shape_cast %25 : vector<1x3x128xbf16> to vector<3x128xbf16>
    %cst_27 = arith.constant dense<0.000000e+00> : vector<256x128xf32>
    %27 = tpu.matmul %24, %26, %cst_27 {dimension_numbers = #tpu.dot_dimension_numbers<[1], [0], [0], [1], [0, 0, 1, 1], [], []>} : vector<256x3xbf16>, vector<3x128xbf16>, vector<256x128xf32> -> vector<256x128xf32>
    %28 = arith.addf %21, %27 : vector<256x128xf32>
    %c0_28 = arith.constant 0 : index
    %c1_29 = arith.constant 1 : index
    %c1_30 = arith.constant 1 : index
    %c0_31 = arith.constant 0 : index
    %29 = vector.load %arg2[%c0_28, %c1_29, %c1_30, %c0_31] : memref<1x18x18x3xbf16, #tpu.memory_space<vmem>>, vector<1x16x16x3xbf16>
    %30 = vector.shape_cast %29 : vector<1x16x16x3xbf16> to vector<16x16x3xbf16>
    %31 = vector.shape_cast %30 : vector<16x16x3xbf16> to vector<256x3xbf16>
    %c4 = arith.constant 4 : index
    %c0_32 = arith.constant 0 : index
    %c0_33 = arith.constant 0 : index
    %32 = vector.load %arg3[%c4, %c0_32, %c0_33] : memref<9x3x128xbf16, #tpu.memory_space<vmem>>, vector<1x3x128xbf16>
    %33 = vector.shape_cast %32 : vector<1x3x128xbf16> to vector<3x128xbf16>
    %cst_34 = arith.constant dense<0.000000e+00> : vector<256x128xf32>
    %34 = tpu.matmul %31, %33, %cst_34 {dimension_numbers = #tpu.dot_dimension_numbers<[1], [0], [0], [1], [0, 0, 1, 1], [], []>} : vector<256x3xbf16>, vector<3x128xbf16>, vector<256x128xf32> -> vector<256x128xf32>
    %35 = arith.addf %28, %34 : vector<256x128xf32>
    %c0_35 = arith.constant 0 : index
    %c1_36 = arith.constant 1 : index
    %c2_37 = arith.constant 2 : index
    %c0_38 = arith.constant 0 : index
    %36 = vector.load %arg2[%c0_35, %c1_36, %c2_37, %c0_38] : memref<1x18x18x3xbf16, #tpu.memory_space<vmem>>, vector<1x16x16x3xbf16>
    %37 = vector.shape_cast %36 : vector<1x16x16x3xbf16> to vector<16x16x3xbf16>
    %38 = vector.shape_cast %37 : vector<16x16x3xbf16> to vector<256x3xbf16>
    %c5 = arith.constant 5 : index
    %c0_39 = arith.constant 0 : index
    %c0_40 = arith.constant 0 : index
    %39 = vector.load %arg3[%c5, %c0_39, %c0_40] : memref<9x3x128xbf16, #tpu.memory_space<vmem>>, vector<1x3x128xbf16>
    %40 = vector.shape_cast %39 : vector<1x3x128xbf16> to vector<3x128xbf16>
    %cst_41 = arith.constant dense<0.000000e+00> : vector<256x128xf32>
    %41 = tpu.matmul %38, %40, %cst_41 {dimension_numbers = #tpu.dot_dimension_numbers<[1], [0], [0], [1], [0, 0, 1, 1], [], []>} : vector<256x3xbf16>, vector<3x128xbf16>, vector<256x128xf32> -> vector<256x128xf32>
    %42 = arith.addf %35, %41 : vector<256x128xf32>
    %c0_42 = arith.constant 0 : index
    %c2_43 = arith.constant 2 : index
    %c0_44 = arith.constant 0 : index
    %c0_45 = arith.constant 0 : index
    %43 = vector.load %arg2[%c0_42, %c2_43, %c0_44, %c0_45] : memref<1x18x18x3xbf16, #tpu.memory_space<vmem>>, vector<1x16x16x3xbf16>
    %44 = vector.shape_cast %43 : vector<1x16x16x3xbf16> to vector<16x16x3xbf16>
    %45 = vector.shape_cast %44 : vector<16x16x3xbf16> to vector<256x3xbf16>
    %c6 = arith.constant 6 : index
    %c0_46 = arith.constant 0 : index
    %c0_47 = arith.constant 0 : index
    %46 = vector.load %arg3[%c6, %c0_46, %c0_47] : memref<9x3x128xbf16, #tpu.memory_space<vmem>>, vector<1x3x128xbf16>
    %47 = vector.shape_cast %46 : vector<1x3x128xbf16> to vector<3x128xbf16>
    %cst_48 = arith.constant dense<0.000000e+00> : vector<256x128xf32>
    %48 = tpu.matmul %45, %47, %cst_48 {dimension_numbers = #tpu.dot_dimension_numbers<[1], [0], [0], [1], [0, 0, 1, 1], [], []>} : vector<256x3xbf16>, vector<3x128xbf16>, vector<256x128xf32> -> vector<256x128xf32>
    %49 = arith.addf %42, %48 : vector<256x128xf32>
    %c0_49 = arith.constant 0 : index
    %c2_50 = arith.constant 2 : index
    %c1_51 = arith.constant 1 : index
    %c0_52 = arith.constant 0 : index
    %50 = vector.load %arg2[%c0_49, %c2_50, %c1_51, %c0_52] : memref<1x18x18x3xbf16, #tpu.memory_space<vmem>>, vector<1x16x16x3xbf16>
    %51 = vector.shape_cast %50 : vector<1x16x16x3xbf16> to vector<16x16x3xbf16>
    %52 = vector.shape_cast %51 : vector<16x16x3xbf16> to vector<256x3xbf16>
    %c7 = arith.constant 7 : index
    %c0_53 = arith.constant 0 : index
    %c0_54 = arith.constant 0 : index
    %53 = vector.load %arg3[%c7, %c0_53, %c0_54] : memref<9x3x128xbf16, #tpu.memory_space<vmem>>, vector<1x3x128xbf16>
    %54 = vector.shape_cast %53 : vector<1x3x128xbf16> to vector<3x128xbf16>
    %cst_55 = arith.constant dense<0.000000e+00> : vector<256x128xf32>
    %55 = tpu.matmul %52, %54, %cst_55 {dimension_numbers = #tpu.dot_dimension_numbers<[1], [0], [0], [1], [0, 0, 1, 1], [], []>} : vector<256x3xbf16>, vector<3x128xbf16>, vector<256x128xf32> -> vector<256x128xf32>
    %56 = arith.addf %49, %55 : vector<256x128xf32>
    %c0_56 = arith.constant 0 : index
    %c2_57 = arith.constant 2 : index
    %c2_58 = arith.constant 2 : index
    %c0_59 = arith.constant 0 : index
    %57 = vector.load %arg2[%c0_56, %c2_57, %c2_58, %c0_59] : memref<1x18x18x3xbf16, #tpu.memory_space<vmem>>, vector<1x16x16x3xbf16>
    %58 = vector.shape_cast %57 : vector<1x16x16x3xbf16> to vector<16x16x3xbf16>
    %59 = vector.shape_cast %58 : vector<16x16x3xbf16> to vector<256x3xbf16>
    %c8 = arith.constant 8 : index
    %c0_60 = arith.constant 0 : index
    %c0_61 = arith.constant 0 : index
    %60 = vector.load %arg3[%c8, %c0_60, %c0_61] : memref<9x3x128xbf16, #tpu.memory_space<vmem>>, vector<1x3x128xbf16>
    %61 = vector.shape_cast %60 : vector<1x3x128xbf16> to vector<3x128xbf16>
    %cst_62 = arith.constant dense<0.000000e+00> : vector<256x128xf32>
    %62 = tpu.matmul %59, %61, %cst_62 {dimension_numbers = #tpu.dot_dimension_numbers<[1], [0], [0], [1], [0, 0, 1, 1], [], []>} : vector<256x3xbf16>, vector<3x128xbf16>, vector<256x128xf32> -> vector<256x128xf32>
    %63 = arith.addf %56, %62 : vector<256x128xf32>
    %c0_63 = arith.constant 0 : index
    %c0_64 = arith.constant 0 : index
    %64 = vector.load %arg4[%c0_63, %c0_64] : memref<1x128xf32, #tpu.memory_space<vmem>>, vector<1x128xf32>
    %65 = vector.broadcast %64 : vector<1x128xf32> to vector<256x128xf32>
    %66 = arith.addf %63, %65 : vector<256x128xf32>
    %67 = vector.shape_cast %66 : vector<256x128xf32> to vector<1x256x128xf32>
    %68 = arith.truncf %67 : vector<1x256x128xf32> to vector<1x256x128xbf16>
    %c0_65 = arith.constant 0 : index
    %c0_66 = arith.constant 0 : index
    %c0_67 = arith.constant 0 : index
    %69 = vector.load %arg5[%c0_65, %c0_66, %c0_67] : memref<1x256x128xbf16, #tpu.memory_space<vmem>>, vector<1x256x128xbf16>
    tpu.vector_store %arg5[%c0_65, %c0_66, %c0_67], %68 {strides = array<i32>} : memref<1x256x128xbf16, #tpu.memory_space<vmem>>, vector<1x256x128xbf16>,
    return
  }
  func.func @transform_0(%arg0: i32, %arg1: i32) -> (i32, i32, i32, i32) {
    %c0_i32 = arith.constant 0 : i32
    %c0_i32_0 = arith.constant 0 : i32
    %c0_i32_1 = arith.constant 0 : i32
    %c0_i32_2 = arith.constant 0 : i32
    return %arg0, %c0_i32, %c0_i32_0, %c0_i32_1 : i32, i32, i32, i32
  }
  func.func @transform_1(%arg0: i32, %arg1: i32) -> (i32, i32, i32) {
    %c0_i32 = arith.constant 0 : i32
    %c0_i32_0 = arith.constant 0 : i32
    %c0_i32_1 = arith.constant 0 : i32
    return %c0_i32, %c0_i32_0, %arg1 : i32, i32, i32
  }
  func.func @transform_2(%arg0: i32, %arg1: i32) -> (i32, i32) {
    %c0_i32 = arith.constant 0 : i32
    %c0_i32_0 = arith.constant 0 : i32
    return %c0_i32, %arg1 : i32, i32
  }
  func.func @transform_3(%arg0: i32, %arg1: i32) -> (i32, i32, i32) {
    %c0_i32 = arith.constant 0 : i32
    %c0_i32_0 = arith.constant 0 : i32
    return %arg0, %c0_i32, %arg1 : i32, i32, i32
  }
}

</mosaic_0001>

<bundles_post_ra>
// kernel: tpu_custom_call.1
= control target key start
LH: loop header
LB: loop body
LE: loop exit
PB: predicated region body
PF: predicated region fallthrough
CT: control target
= control target key end

     0   :  { %8 = vsyncpa [#allocation3], 0  ;;  %s9155_s0 = inlined_call_operand.vmem [shape: bf16[2,18,18,3], index: 0, kind: input, shape index: {}]   ;;  %s9156_s1 = inlined_call_operand.vmem [shape: bf16[9,3,128], index: 1, kind: input, shape index: {}]   ;;  %s9157_s2 = inlined_call_operand.vmem [shape: f32[1,128], index: 2, kind: input, shape index: {}]   ;;  %s9158_s3 = inlined_call_operand.hbm [shape: bf16[2,256,128], index: 3, kind: output, shape index: {}]  }
   0x1   :  { %10 = vsyncpa [#allocation3 + $0x1], 0  ;;  %s6476_s12 = smov 0   ;;  %s6478_s13 = smov 0  }
   0x2   :  { %s6480_s14 = smov 0   ;;  %s6482_s15 = smov 0  }
   0x3   :  { %s6484_s16 = smov 0   ;;  %s6486_s17 = smov 0  }
   0x4 LB: > { %s5090_s18 = sadd.s32 4294967295, %s6450_s17   ;;  %s5091_s19 = sadd.s32 4294967294, %s6450_s17   ;;  %s6450_s17 = sphi %s6486_s17, %s16_s17   ;;  %s6446_s16 = sphi %s6484_s16, %s9367_s16   ;;  %s6442_s15 = sphi %s6482_s15, %s9366_s15   ;;  %s6438_s14 = sphi %s6480_s14, %s9365_s14   ;;  %s6434_s13 = sphi %s6478_s13, %s9364_s13   ;;  %s6430_s12 = sphi %s6476_s12, %s9363_s12  }
   0x5   : > { %s28_s20 = sadd.s32 1, %s6446_s16  ;;  %s115_s21 = sadd.s32 1, %s6438_s14 }
   0x6   : > { %p30_p0 = scmp.ge.s32.totalorder %s28_s20, 2  ;;  %p125_p1 = scmp.ne.s32.totalorder %s6438_s14, %s6434_s13 }
   0x7   : > { %p126_p2 = scmp.eq.s32.totalorder %s5090_s18, 1  ;;  %p131_p3 = scmp.ne.s32.totalorder %s6434_s13, %s6430_s12 }
   0x8   : > { %s9369_s20 = smov (%p30_p0, %s28_s20), 0  ;;  %p132_p5 = scmp.eq.s32.totalorder %s5091_s19, 1 }
   0x9   : > { %p6516_p4 = por %p126_p2, %p125_p1  ;;  %s110_s23 = ssub.s32 %s6446_s16, %s9369_s20 }
   0xa   : > { %p5096_p6 = scmp.ge.s32.totalorder %s6450_s17, 1  ;;  %p113_p7 = scmp.eq.s32.totalorder %s110_s23, 0 }
   0xb   : > { %p6523_p8 = por %p132_p5, %p131_p3  ;;  %p171_p9 = scmp.lt.s32.totalorder %s6450_s17, 3 }
   0xc   : > { %s6529_s25 = scalar_select %p113_p7, %s6438_s14, %s115_s21  }
   0xd   : > { %p172_p10 = pnand %p5096_p6, %p171_p9 }
   0xf   : > { %175 = sbr.rel (%p172_p10) target bundleno = 579 (0x243), region = 32 }
  0x14   : > { %v5099_v0 = vld [vmem:[%s9156_s1 + $0x2] sm:$0x3]  ;;  %vm750_vm0 = vcmask 1040384   ;;  %vm751_vm1 = vcmask 1041408   ;;  %p202_p11 = scmp.lt.s32.totalorder %s6442_s15, 1  ;;  %v6452_v1 = vmov 65535  }
  0x15   : > { %v752_v2 = vsel %vm750_vm0, 4294967295, %v6452_v1  ;;  %v247_v4 = vld [vmem:[%s9156_s1] sm:$0x3]  ;;  %v5180_v5 = vld [vmem:[%s9156_s1 + $0x4] sm:$0x3]  ;;  %vm701_vm4 = vcmask 23552  }
  0x16   : > { %v6535_v3 = vsel %vm751_vm1, %v752_v2, 0  ;;  %s203_s28 = scalar_select %p202_p11, %s6442_s15, 1  ;;  %vm264_vm2 = vsmask.f32 3328  ;;  %vm265_vm3 = vsmask.f32 7440 }
  0x17   : > { %9190 = vst [vmem:[#allocation5_spill] sm:$0xff] %v6535_v3  ;;  %v755_v6 = vand.u32 %v5099_v0, %v6535_v3  ;;  %v6546_v7 = vand.u32 %v6535_v3, %v247_v4  ;;  %v6549_v8 = vand.u32 %v5180_v5, %v6535_v3  ;;  %v5245_v9 = vld [vmem:[%s9156_s1 + $0x6] sm:$0x3]  ;;  %v5326_v10 = vld [vmem:[%s9156_s1 + $0x8] sm:$0x3]  ;;  %vm6606_vm5 = vmor %vm264_vm2, %vm265_vm3  ;;  %vm1258_vm6 = vcmask 1042432  }
  0x18   : > { %s6262_s6 = smul.u32 216, %s203_s28  ;;  %v6588_v22 = vand.u32 %v5245_v9, %v6535_v3  ;;  %v6591_v23 = vand.u32 %v5326_v10, %v6535_v3  ;;  %vm1259_vm7 = vcmask 1046532   ;;  %s199_s5 = sand.u32 1, %s6434_s13  }
  0x19   : > { %6260 = vmatprep.subr.bf16.mxu1 %v755_v6  ;;  %5954 = vmatprep.subr.bf16.mxu0 %v755_v6  ;;  %vm6872_vm8 = vmor %vm1258_vm6, %vm1259_vm7  ;;  %s5097_s8 = sshll.u32 %s199_s5, 7  ;;  %s5705_s10 = sshll.u32 %s6442_s15, 11 }
  0x1a   : > { %6261 = vmatpush3.bf16.msra.mxu1 %v755_v6  ;;  %5955 = vmatpush3.bf16.msra.mxu0 %v755_v6  ;;  %s6554_s9 = scalar_lea.vmem %s9155_s0, %s6262_s6  ;;  %s9102_s21 = scalar_lea.hbm %s9158_s3, %s5705_s10 }
  0x1b   : > { %v6563_v11 = vld [vmem:[%s6554_s9] sm:$0xf]  ;;  %v6566_v12 = vld [vmem:[%s6554_s9 + $0x4] sm:$0xf]  ;;  %v6569_v13 = vld [vmem:[%s6554_s9 + $0x8] sm:$0x1]  ;;  %5988 = vmatprep.subr.bf16.mxu1 %v6546_v7  ;;  %6022 = vmatprep.subr.bf16.mxu0 %v6549_v8 }
  0x1c   : > { %v268_v14 = vshrl.u32 %v6563_v11, 16  ;;  %v271_v15 = vshll.u32 %v6563_v11, 16  ;;  %v277_v16 = vshll.u32 %v6566_v12, 16  ;;  %v281_v17 = vshrl.u32 %v6566_v12, 16  ;;  %v6578_v18 = vld [vmem:[%s6554_s9 + $0x60] sm:$0xf] }
  0x1d   : > { %v287_v19 = vshll.u32 %v6569_v13, 16  ;;  %v6582_v20 = vld [vmem:[%s6554_s9 + $0x64] sm:$0xf]  ;;  %v6585_v21 = vld [vmem:[%s6554_s9 + $0x68] sm:$0x1]  ;;  %v460_v29 = vshrl.u32 %v6578_v18, 16 }
  0x1e   : > { %v270_v24 = vrot.slane %v268_v14, 4  ;;  %v273_v25 = vrot.slane %v271_v15, 5  ;;  %v279_v26 = vrot.slane %v277_v16, 5  ;;  %v283_v27 = vrot.slane %v281_v17, 4  ;;  %v6599_v36 = vld [vmem:[%s6554_s9 + $0xc] sm:$0xf] }
  0x1f   : > { %v289_v28 = vrot.slane %v287_v19, 5  ;;  %v463_v30 = vshll.u32 %v6578_v18, 16  ;;  %v469_v31 = vshll.u32 %v6582_v20, 16  ;;  %v473_v34 = vshrl.u32 %v6582_v20, 16  ;;  %v6602_v37 = vld [vmem:[%s6554_s9 + $0x10] sm:$0xf] }
  0x20   : > { %v274_v32 = vor.u32 %v273_v25, %v270_v24  ;;  %v284_v33 = vor.u32 %v283_v27, %v279_v26  ;;  %v479_v35 = vshll.u32 %v6585_v21, 16  ;;  %v462_v40 = vrot.slane %v460_v29, 4  ;;  %v6612_v48 = vld [vmem:[%s6554_s9 + $0x14] sm:$0x1]  ;;  %v233_v60 = vld [vmem:[%s6554_s9 + $0x6c] sm:$0xf] }
  0x21   : > { %v465_v41 = vrot.slane %v463_v30, 5  ;;  %v471_v42 = vrot.slane %v469_v31, 5  ;;  %v475_v45 = vrot.slane %v473_v34, 4  ;;  %v292_v49 = vshrl.u32 %v6599_v36, 16  ;;  %v6625_v1 = vld [vmem:[%s6554_s9 + $0x70] sm:$0xf] }
  0x22   : > { %v275_v43 = vrot.slane %v274_v32, 4  ;;  %v285_v44 = vrot.slane %v284_v33, 4  ;;  %v481_v46 = vrot.slane %v479_v35, 5  ;;  %v295_v50 = vshll.u32 %v6599_v36, 16  ;;  %v6633_v9 = vld [vmem:[%s6554_s9 + $0x74] sm:$0x1] }
  0x23   : > { %v466_v47 = vor.u32 %v465_v41, %v462_v40  ;;  %v301_v51 = vshll.u32 %v6602_v37, 16  ;;  %v476_v54 = vor.u32 %v475_v45, %v471_v42  ;;  %v305_v55 = vshrl.u32 %v6602_v37, 16  ;;  %v6638_v17 = vld [vmem:[%s6554_s9 + $0x18] sm:$0xf]  ;;  %v6644_v31 = vld [vmem:[%s6554_s9 + $0x1c] sm:$0xf] }
  0x24   : > { %v280_v52 = vsel %vm6606_vm5, %v275_v43, %v279_v26  ;;  %v290_v53 = vsel %vm6606_vm5, %v285_v44, %v289_v28  ;;  %v294_v58 = vrot.slane %v292_v49, 4  ;;  %v297_v59 = vrot.slane %v295_v50, 5  ;;  %v6650_v35 = vld [vmem:[%s6554_s9 + $0x20] sm:$0x1]  ;;  %v235_v45 = vld [vmem:[%s6554_s9 + $0x78] sm:$0xf] }
  0x25   : > { %v5100_v56 = vcombine.low %v280_v52, %v290_v53  ;;  %v467_v57 = vrot.slane %v466_v47, 4  ;;  %v477_v61 = vrot.slane %v476_v54, 4  ;;  %v303_v62 = vrot.slane %v301_v51, 5  ;;  %s9110_s15 = scalar_lea.sflag [#allocation3], %s199_s5  ;;  %s6453_s26 = smov [#allocation2]  }
  0x26   : > { %v307_v63 = vrot.slane %v305_v55, 4  ;;  %v311_v0 = vshll.u32 %v6612_v48, 16  ;;  %v298_v4 = vor.u32 %v297_v59, %v294_v58  ;;  %v484_v16 = vshrl.u32 %v233_v60, 16  ;;  %v6661_v55 = vld [vmem:[%s6554_s9 + $0x7c] sm:$0xf]  ;;  %s6378_s27 = sshll.u32 %s6453_s26, 4  ;;  %s6379_s27 = int_to_ptr.vmem [resolvable:$false] %s6378_s27 }
  0x27   : > { %5956 = vmatprep.mubr.msk.bf16.mxu0 %vm701_vm4, %v5100_v56  ;;  %v472_v2 = vsel %vm6606_vm5, %v467_v57, %v471_v42  ;;  %v482_v10 = vsel %vm6606_vm5, %v477_v61, %v481_v46  ;;  %v487_v25 = vshll.u32 %v233_v60, 16  ;;  %v493_v26 = vshll.u32 %v6625_v1, 16  ;;  %9193 = vst [vmem:[#allocation6_spill] sm:$0xff] %v6661_v55  ;;  %s6380_s28 = scalar_lea.vmem %s6379_s27, 4096 }
  0x28   : > { %v308_v14 = vor.u32 %v307_v63, %v303_v62  ;;  %v313_v15 = vrot.slane %v311_v0, 5  ;;  %v5108_v19 = vcombine.low %v472_v2, %v482_v10  ;;  %v299_v24 = vrot.slane %v298_v4, 4  ;;  %v6666_v0 = vld [vmem:[%s6554_s9 + $0x80] sm:$0x1] }
  0x29   : > { %v486_v28 = vrot.slane %v484_v16, 4  ;;  %v497_v29 = vshrl.u32 %v6625_v1, 16  ;;  %v503_v30 = vshll.u32 %v6633_v9, 16  ;;  %v489_v33 = vrot.slane %v487_v25, 5  ;;  %9194 = vst [vmem:[#allocation7_spill] sm:$0xff] %v6666_v0 }
  0x2a   : > { %v309_v27 = vrot.slane %v308_v14, 4  ;;  %5972 = vmatprep.mubr.msk.bf16.mxu1 %vm701_vm4, %v5108_v19  ;;  %v304_v32 = vsel %vm6606_vm5, %v299_v24, %v303_v62  ;;  %v495_v34 = vrot.slane %v493_v26, 5  ;;  %v316_v40 = vshrl.u32 %v6638_v17, 16  ;;  %v6679_v25 = vld [vmem:[%s6554_s9 + $0x28] sm:$0xf] }
  0x2b   : > { %v499_v42 = vrot.slane %v497_v29, 4  ;;  %v505_v43 = vrot.slane %v503_v30, 5  ;;  %v319_v44 = vshll.u32 %v6638_v17, 16  ;;  %v490_v47 = vor.u32 %v489_v33, %v486_v28 }
  0x2c   : > { %v314_v41 = vsel %vm6606_vm5, %v309_v27, %v313_v15  ;;  %v318_v49 = vrot.slane %v316_v40, 4  ;;  %v325_v50 = vshll.u32 %v6644_v31, 16  ;;  %v329_v53 = vshrl.u32 %v6644_v31, 16  ;;  %v6672_v15 = vld [vmem:[%s6554_s9 + $0x24] sm:$0xf] }
  0x2d   : > { %v5101_v46 = vcombine.low %v304_v32, %v314_v41  ;;  %v500_v51 = vor.u32 %v499_v42, %v495_v34  ;;  %v321_v52 = vrot.slane %v319_v44, 5  ;;  %v335_v54 = vshll.u32 %v6650_v35, 16 }
  0x2e   : > { %v491_v56 = vrot.slane %v490_v47, 4  ;;  %v327_v57 = vrot.slane %v325_v50, 5  ;;  %v508_v58 = vshrl.u32 %v235_v45, 16  ;;  %v511_v59 = vshll.u32 %v235_v45, 16  ;;  %v6692_v45 = vld [vmem:[%s6554_s9 + $0x84] sm:$0xf] }
  0x2f   : > { %5957 = vmatmul.mubr.msk.bf16.vlgmr.msra.gmra.mxu0 %vm701_vm4, %v5101_v46  ;;  %v501_v60 = vrot.slane %v500_v51, 4  ;;  %v322_v61 = vor.u32 %v321_v52, %v318_v49  ;;  %v331_v62 = vrot.slane %v329_v53, 4  ;;  %v337_v63 = vrot.slane %v335_v54, 5  ;;  %v6699_v51 = vld [vmem:[%s6554_s9 + $0x88] sm:$0xf] }
  0x30   : > { %6023 = vmatpush3.bf16.msra.mxu0 %v6549_v8  ;;  %v496_v2 = vsel %vm6606_vm5, %v491_v56, %v495_v34  ;;  %v510_v4 = vrot.slane %v508_v58, 4  ;;  %v513_v10 = vrot.slane %v511_v59, 5  ;;  %v517_v14 = vshll.u32 %v6661_v55, 16  ;;  %v6685_v34 = vld [vmem:[%s6554_s9 + $0x2c] sm:$0x1] }
  0x31   : > { %6090 = vmatprep.subr.bf16.mxu0 %v6591_v23  ;;  %v506_v8 = vsel %vm6606_vm5, %v501_v60, %v505_v43  ;;  %v323_v16 = vrot.slane %v322_v61, 4  ;;  %v332_v19 = vor.u32 %v331_v62, %v327_v57  ;;  %v521_v24 = vshrl.u32 %v6661_v55, 16  ;;  %v6706_v59 = vld [vmem:[%s6554_s9 + $0x8c] sm:$0x1] }
  0x32   : > { %v5109_v26 = vcombine.low %v496_v2, %v506_v8  ;;  %v514_v27 = vor.u32 %v513_v10, %v510_v4  ;;  %v519_v28 = vrot.slane %v517_v14, 5  ;;  %v527_v29 = vshll.u32 %v6666_v0, 16  ;;  %v6714_v4 = vld [vmem:[%s6554_s9 + $0x30] sm:$0xf] }
  0x33   : > { %v328_v30 = vsel %vm6606_vm5, %v323_v16, %v327_v57  ;;  %v333_v32 = vrot.slane %v332_v19, 4  ;;  %v523_v33 = vrot.slane %v521_v24, 4  ;;  %v340_v40 = vshrl.u32 %v6672_v15, 16  ;;  %v6719_v19 = vld [vmem:[%s6554_s9 + $0x34] sm:$0xf] }
  0x34   : > { %5973 = vmatmul.mubr.msk.bf16.vlgmr.msra.gmra.mxu1 %vm701_vm4, %v5109_v26  ;;  %v515_v41 = vrot.slane %v514_v27, 4  ;;  %v529_v42 = vrot.slane %v527_v29, 5  ;;  %v343_v43 = vshll.u32 %v6672_v15, 16  ;;  %v349_v44 = vshll.u32 %v6679_v25, 16 }
  0x35   : > { %5989 = vmatpush3.bf16.msra.mxu1 %v6546_v7  ;;  %v338_v46 = vsel %vm6606_vm5, %v333_v32, %v337_v63  ;;  %v524_v47 = vor.u32 %v523_v33, %v519_v28  ;;  %v342_v49 = vrot.slane %v340_v40, 4  ;;  %v353_v50 = vshrl.u32 %v6679_v25, 16 }
  0x36   : > { %v5102_v52 = vcombine.low %v328_v30, %v338_v46  ;;  %v520_v53 = vsel %vm6606_vm5, %v515_v41, %v519_v28  ;;  %v345_v54 = vrot.slane %v343_v43, 5  ;;  %v351_v56 = vrot.slane %v349_v44, 5  ;;  %6056 = vmatprep.subr.bf16.mxu1 %v6588_v22  ;;  %v6732_v46 = vld [vmem:[%s6554_s9 + $0x90] sm:$0xf] }
  0x37   : > { %v525_v7 = vrot.slane %v524_v47, 4  ;;  %v355_v57 = vrot.slane %v353_v50, 4  ;;  %v359_v58 = vshll.u32 %v6685_v34, 16  ;;  %v532_v60 = vshrl.u32 %v6692_v45, 16 }
  0x38   : > { %5960 = vmatprep.mubr.msk.bf16.mxu0 %vm701_vm4, %v5102_v52  ;;  %v346_v61 = vor.u32 %v345_v54, %v342_v49  ;;  %v535_v62 = vshll.u32 %v6692_v45, 16  ;;  %v541_v63 = vshll.u32 %v6699_v51, 16  ;;  %v545_v2 = vshrl.u32 %v6699_v51, 16 }
  0x39   : > { %v530_v10 = vsel %vm6606_vm5, %v525_v7, %v529_v42  ;;  %v356_v14 = vor.u32 %v355_v57, %v351_v56  ;;  %v361_v8 = vrot.slane %v359_v58, 5  ;;  %v534_v16 = vrot.slane %v532_v60, 4  ;;  %v6727_v42 = vld [vmem:[%s6554_s9 + $0x38] sm:$0x1] }
  0x3a   : > { %v5110_v24 = vcombine.low %v520_v53, %v530_v10  ;;  %v347_v26 = vrot.slane %v346_v61, 4  ;;  %v537_v27 = vrot.slane %v535_v62, 5  ;;  %v543_v28 = vrot.slane %v541_v63, 5  ;;  %v6737_v53 = vld [vmem:[%s6554_s9 + $0x94] sm:$0xf] }
  0x3b   : > { %v357_v29 = vrot.slane %v356_v14, 4  ;;  %v547_v30 = vrot.slane %v545_v2, 4  ;;  %v551_v32 = vshll.u32 %v6706_v59, 16  ;;  %v364_v33 = vshrl.u32 %v6714_v4, 16  ;;  %v6746_v10 = vld [vmem:[%s6554_s9 + $0x98] sm:$0x1] }
  0x3c   : > { %5976 = vmatprep.mubr.msk.bf16.mxu1 %vm701_vm4, %v5110_v24  ;;  %v352_v40 = vsel %vm6606_vm5, %v347_v26, %v351_v56  ;;  %v538_v41 = vor.u32 %v537_v27, %v534_v16  ;;  %v367_v43 = vshll.u32 %v6714_v4, 16  ;;  %v373_v44 = vshll.u32 %v6719_v19, 16  ;;  %9195 = vst [vmem:[#allocation8_spill] sm:$0xff] %v6746_v10  ;;  %v6751_v16 = vld [vmem:[%s6554_s9 + $0x3c] sm:$0xf] }
  0x3d   : > { %v362_v47 = vsel %vm6606_vm5, %v357_v29, %v361_v8  ;;  %v548_v49 = vor.u32 %v547_v30, %v543_v28  ;;  %v553_v50 = vrot.slane %v551_v32, 5  ;;  %v366_v52 = vrot.slane %v364_v33, 4  ;;  %v6756_v30 = vld [vmem:[%s6554_s9 + $0x40] sm:$0xf] }
  0x3e   : > { %v5103_v54 = vcombine.low %v352_v40, %v362_v47  ;;  %v539_v56 = vrot.slane %v538_v41, 4  ;;  %v369_v7 = vrot.slane %v367_v43, 5  ;;  %v375_v57 = vrot.slane %v373_v44, 5 }
  0x3f   : > { %v549_v58 = vrot.slane %v548_v49, 4  ;;  %v377_v60 = vshrl.u32 %v6719_v19, 16  ;;  %v383_v61 = vshll.u32 %v6727_v42, 16  ;;  %v556_v62 = vshrl.u32 %v6732_v46, 16 }
  0x40   : > { %5961 = vmatmul.mubr.msk.bf16.gmra.mxu0 %vm701_vm4, %v5103_v54  ;;  %v544_v63 = vsel %vm6606_vm5, %v539_v56, %v543_v28  ;;  %v370_v2 = vor.u32 %v369_v7, %v366_v52  ;;  %v559_v14 = vshll.u32 %v6732_v46, 16  ;;  %v565_v8 = vshll.u32 %v6737_v53, 16  ;;  %v6765_v52 = vld [vmem:[%s6554_s9 + $0x44] sm:$0x1]  ;;  %v6770_v7 = vld [vmem:[%s6554_s9 + $0x9c] sm:$0xf] }
  0x41   : > { %v554_v24 = vsel %vm6606_vm5, %v549_v58, %v553_v50  ;;  %v379_v26 = vrot.slane %v377_v60, 4  ;;  %v385_v27 = vrot.slane %v383_v61, 5  ;;  %v558_v29 = vrot.slane %v556_v62, 4  ;;  %9196 = vst [vmem:[#allocation9_spill] sm:$0xff] %v6770_v7 }
  0x42   : > { %v5111_v28 = vcombine.low %v544_v63, %v554_v24  ;;  %v371_v32 = vrot.slane %v370_v2, 4  ;;  %v561_v33 = vrot.slane %v559_v14, 5  ;;  %v567_v40 = vrot.slane %v565_v8, 5  ;;  %v6774_v8 = vld [vmem:[%s6554_s9 + $0xa0] sm:$0xf] }
  0x43   : > { %v380_v41 = vor.u32 %v379_v26, %v375_v57  ;;  %v569_v43 = vshrl.u32 %v6737_v53, 16  ;;  %v575_v44 = vshll.u32 %v6746_v10, 16  ;;  %v388_v47 = vshrl.u32 %v6751_v16, 16  ;;  %9197 = vst [vmem:[#allocation10_spill] sm:$0xff] %v6774_v8  ;;  %v1211_v10 = vld [vmem:[%s6554_s9 + $0xc] sm:$0xe] }
  0x44   : > { %5977 = vmatmul.mubr.msk.bf16.gmra.mxu1 %vm701_vm4, %v5111_v28  ;;  %v376_v49 = vsel %vm6606_vm5, %v371_v32, %v375_v57  ;;  %v562_v50 = vor.u32 %v561_v33, %v558_v29  ;;  %v391_v54 = vshll.u32 %v6751_v16, 16  ;;  %v397_v56 = vshll.u32 %v6756_v30, 16  ;;  %v6780_v28 = vld [vmem:[%s6554_s9 + $0xa4] sm:$0x1]  ;;  %v6784_v33 = vld [vmem:[%s6554_s9 + $0x48] sm:$0xf] }
  0x45   : > { %v381_v58 = vrot.slane %v380_v41, 4  ;;  %v571_v60 = vrot.slane %v569_v43, 4  ;;  %v577_v61 = vrot.slane %v575_v44, 5  ;;  %v390_v62 = vrot.slane %v388_v47, 4  ;;  %9198 = vst [vmem:[#allocation11_spill] sm:$0xff] %v6780_v28 }
  0x46   : > { %v563_v63 = vrot.slane %v562_v50, 4  ;;  %v393_v2 = vrot.slane %v391_v54, 5  ;;  %v399_v14 = vrot.slane %v397_v56, 5  ;;  %v401_v57 = vshrl.u32 %v6756_v30, 16 }
  0x47   : > { %v386_v24 = vsel %vm6606_vm5, %v381_v58, %v385_v27  ;;  %v572_v26 = vor.u32 %v571_v60, %v567_v40  ;;  %v407_v29 = vshll.u32 %v6765_v52, 16  ;;  %v580_v32 = vshrl.u32 %v6770_v7, 16 }
  0x48   : > { %v5104_v41 = vcombine.low %v376_v49, %v386_v24  ;;  %v568_v43 = vsel %vm6606_vm5, %v563_v63, %v567_v40  ;;  %v394_v44 = vor.u32 %v393_v2, %v390_v62  ;;  %v403_v47 = vrot.slane %v401_v57, 4  ;;  %v6793_v24 = vld [vmem:[%s6554_s9 + $0x4c] sm:$0xf]  ;;  %v6799_v2 = vld [vmem:[%s6554_s9 + $0x50] sm:$0x1] }
  0x49   : > { %v573_v50 = vrot.slane %v572_v26, 4  ;;  %v409_v54 = vrot.slane %v407_v29, 5  ;;  %v582_v27 = vrot.slane %v580_v32, 4  ;;  %v583_v56 = vshll.u32 %v6770_v7, 16 }
  0x4a   : > { %5964 = vmatprep.mubr.msk.bf16.mxu0 %vm701_vm4, %v5104_v41  ;;  %v395_v58 = vrot.slane %v394_v44, 4  ;;  %v404_v60 = vor.u32 %v403_v47, %v399_v14  ;;  %v589_v6 = vshll.u32 %v6774_v8, 16  ;;  %v593_v49 = vshrl.u32 %v6774_v8, 16  ;;  %v6805_v44 = vld [vmem:[%s6554_s9 + $0xa8] sm:$0xf] }
  0x4b   : > { %v578_v40 = vsel %vm6606_vm5, %v573_v50, %v577_v61  ;;  %v585_v62 = vrot.slane %v583_v56, 5  ;;  %v599_v63 = vshll.u32 %v6780_v28, 16  ;;  %v412_v57 = vshrl.u32 %v6784_v33, 16  ;;  %9199 = vst [vmem:[#allocation12_spill] sm:$0xff] %v6805_v44 }
  0x4c   : > { %v5112_v26 = vcombine.low %v568_v43, %v578_v40  ;;  %v400_v29 = vsel %vm6606_vm5, %v395_v58, %v399_v14  ;;  %v405_v32 = vrot.slane %v404_v60, 4  ;;  %v591_v41 = vrot.slane %v589_v6, 5 }
  0x4d   : > { %v586_v47 = vor.u32 %v585_v62, %v582_v27  ;;  %v595_v39 = vrot.slane %v593_v49, 4  ;;  %v601_v61 = vrot.slane %v599_v63, 5  ;;  %v414_v50 = vrot.slane %v412_v57, 4  ;;  %v6815_v49 = vld [vmem:[%s6554_s9 + $0xac] sm:$0xf] }
  0x4e   : > { %5980 = vmatprep.mubr.msk.bf16.mxu1 %vm701_vm4, %v5112_v26  ;;  %v410_v56 = vsel %vm6606_vm5, %v405_v32, %v409_v54  ;;  %v415_v43 = vshll.u32 %v6784_v33, 16  ;;  %v421_v40 = vshll.u32 %v6793_v24, 16  ;;  %v425_v14 = vshrl.u32 %v6793_v24, 16  ;;  %9200 = vst [vmem:[#allocation13_spill] sm:$0xff] %v6815_v49  ;;  %v6818_v26 = vld [vmem:[%s6554_s9 + $0xb0] sm:$0x1] }
  0x4f   : > { %v5105_v58 = vcombine.low %v400_v29, %v410_v56  ;;  %v587_v6 = vrot.slane %v586_v47, 4  ;;  %v596_v60 = vor.u32 %v595_v39, %v591_v41  ;;  %v431_v27 = vshll.u32 %v6799_v2, 16  ;;  %9201 = vst [vmem:[#allocation14_spill] sm:$0xff] %v6818_v26 }
  0x50   : > { %v417_v62 = vrot.slane %v415_v43, 5  ;;  %v423_v63 = vrot.slane %v421_v40, 5  ;;  %v427_v57 = vrot.slane %v425_v14, 4  ;;  %v604_v54 = vshrl.u32 %v6805_v44, 16  ;;  %v6827_v14 = vld [vmem:[%s6554_s9 + $0x54] sm:$0xf] }
  0x51   : > { %5965 = vmatmul.mubr.msk.bf16.gmra.mxu0 %vm701_vm4, %v5105_v58  ;;  %v592_v29 = vsel %vm6606_vm5, %v587_v6, %v591_v41  ;;  %v597_v32 = vrot.slane %v596_v60, 4  ;;  %v433_v39 = vrot.slane %v431_v27, 5  ;;  %v607_v47 = vshll.u32 %v6805_v44, 16  ;;  %v6834_v60 = vld [vmem:[%s6554_s9 + $0x58] sm:$0xf] }
  0x52   : > { %v418_v56 = vor.u32 %v417_v62, %v414_v50  ;;  %v428_v5 = vor.u32 %v427_v57, %v423_v63  ;;  %v606_v43 = vrot.slane %v604_v54, 4  ;;  %v613_v40 = vshll.u32 %v6815_v49, 16  ;;  %v6837_v54 = vld [vmem:[%s6554_s9 + $0x5c] sm:$0x1] }
  0x53   : > { %v602_v58 = vsel %vm6606_vm5, %v597_v32, %v601_v61  ;;  %v609_v3 = vrot.slane %v607_v47, 5  ;;  %v617_v41 = vshrl.u32 %v6815_v49, 16  ;;  %v623_v6 = vshll.u32 %v6818_v26, 16  ;;  %v1210_v26 = vld [vmem:[%s6554_s9] sm:$0xe] }
  0x54   : > { %v5113_v50 = vcombine.low %v592_v29, %v602_v58  ;;  %v419_v27 = vrot.slane %v418_v56, 4  ;;  %v429_v62 = vrot.slane %v428_v5, 4  ;;  %v615_v57 = vrot.slane %v613_v40, 5  ;;  %v6848_v56 = vld [vmem:[%s6554_s9 + $0xb4] sm:$0xf] }
  0x55   : > { %v610_v0 = vor.u32 %v609_v3, %v606_v43  ;;  %v619_v44 = vrot.slane %v617_v41, 4  ;;  %v625_v28 = vrot.slane %v623_v6, 5  ;;  %v436_v61 = vshrl.u32 %v6827_v14, 16  ;;  %9202 = vst [vmem:[#allocation15_spill] sm:$0xff] %v6848_v56  ;;  %v6851_v41 = vld [vmem:[%s6554_s9 + $0xb8] sm:$0xf] }
  0x56   : > { %5981 = vmatmul.mubr.msk.bf16.gmra.mxu1 %vm701_vm4, %v5113_v50  ;;  %v424_v32 = vsel %vm6606_vm5, %v419_v27, %v423_v63  ;;  %v434_v29 = vsel %vm6606_vm5, %v429_v62, %v433_v39  ;;  %v439_v5 = vshll.u32 %v6827_v14, 16  ;;  %v445_v47 = vshll.u32 %v6834_v60, 16  ;;  %v6856_v39 = vld [vmem:[%s6554_s9 + $0xbc] sm:$0x1] }
  0x57   : > { %v5106_v3 = vcombine.low %v424_v32, %v434_v29  ;;  %v611_v43 = vrot.slane %v610_v0, 4  ;;  %v620_v40 = vor.u32 %v619_v44, %v615_v57  ;;  %v438_v58 = vrot.slane %v436_v61, 4 }
  0x58   : > { %v441_v6 = vrot.slane %v439_v5, 5  ;;  %v447_v50 = vrot.slane %v445_v47, 5  ;;  %v449_v63 = vshrl.u32 %v6834_v60, 16  ;;  %v455_v27 = vshll.u32 %v6837_v54, 16 }
  0x59   : > { %5968 = vmatprep.mubr.msk.bf16.mxu0 %vm701_vm4, %v5106_v3  ;;  %v616_v62 = vsel %vm6606_vm5, %v611_v43, %v615_v57  ;;  %v621_v32 = vrot.slane %v620_v40, 4  ;;  %v628_v0 = vshrl.u32 %v6848_v56, 16  ;;  %v631_v44 = vshll.u32 %v6848_v56, 16 }
  0x5a   : > { %v442_v61 = vor.u32 %v441_v6, %v438_v58  ;;  %v451_v29 = vrot.slane %v449_v63, 4  ;;  %v457_v5 = vrot.slane %v455_v27, 5  ;;  %v637_v47 = vshll.u32 %v6851_v41, 16 }
  0x5b   : > { %v626_v49 = vsel %vm6606_vm5, %v621_v32, %v625_v28  ;;  %v630_v55 = vrot.slane %v628_v0, 4  ;;  %v633_v3 = vrot.slane %v631_v44, 5  ;;  %v641_v7 = vshrl.u32 %v6851_v41, 16 }
  0x5c   : > { %v5114_v57 = vcombine.low %v616_v62, %v626_v49  ;;  %v443_v43 = vrot.slane %v442_v61, 4  ;;  %v452_v40 = vor.u32 %v451_v29, %v447_v50  ;;  %v639_v8 = vrot.slane %v637_v47, 5  ;;  %v1212_v61 = vld [vmem:[%s6554_s9 + $0x18] sm:$0xe] }
  0x5d   : > { %v634_v56 = vor.u32 %v633_v3, %v630_v55  ;;  %v643_v58 = vrot.slane %v641_v7, 4  ;;  %v647_v6 = vshll.u32 %v6856_v39, 16  ;;  %v5164_v28 = vrot.slane %v1210_v26, 9 }
  0x5e   : > { %5984 = vmatprep.mubr.msk.bf16.mxu1 %vm701_vm4, %v5114_v57  ;;  %v448_v49 = vsel %vm6606_vm5, %v443_v43, %v447_v50  ;;  %v453_v27 = vrot.slane %v452_v40, 4  ;;  %v1263_v62 = vrot.slane %v6566_v12, 5  ;;  %v5133_v55 = vcombine.low %v6599_v36, %v6602_v37 }
  0x5f   : > { %v635_v7 = vrot.slane %v634_v56, 4  ;;  %v644_v32 = vor.u32 %v643_v58, %v639_v8  ;;  %v649_v0 = vrot.slane %v647_v6, 5  ;;  %v5165_v44 = vrot.slane %v1211_v10, 9  ;;  %v1213_v6 = vld [vmem:[%s6554_s9 + $0x24] sm:$0xe] }
  0x60   : > { %v458_v26 = vsel %vm6606_vm5, %v453_v27, %v457_v5  ;;  %v1264_v29 = vsel %vm6872_vm8, %v5164_v28, %v1263_v62  ;;  %v1265_v47 = vrot.slane %v1263_v62, 4  ;;  %v9205_v50 = vrot.slane %v6602_v37, 5 }
  0x61   : > { %v5107_v57 = vcombine.low %v448_v49, %v458_v26  ;;  %v640_v43 = vsel %vm6606_vm5, %v635_v7, %v639_v8  ;;  %v645_v56 = vrot.slane %v644_v32, 4  ;;  %v9206_v40 = vrot.slane %v6569_v13, 5 }
  0x62   : > { %v1272_v3 = vrot.slane %v9205_v50, 4  ;;  %v5134_v5 = vcombine.low %v6638_v17, %v6644_v31  ;;  %v5166_v58 = vrot.slane %v1212_v61, 9  ;;  %v5132_v49 = vcombine.low %v6563_v11, %v6566_v12  ;;  %v1214_v61 = vld [vmem:[%s6554_s9 + $0x30] sm:$0xe] }
  0x63   : > { %v1267_v10 = vsel %vm6872_vm8, %v1265_v47, %v9206_v40  ;;  %5969 = vmatmul.mubr.msk.bf16.gmra.mxu0 %vm701_vm4, %v5107_v57  ;;  %v650_v28 = vsel %vm6606_vm5, %v645_v56, %v649_v0  ;;  %v1277_v13 = vrot.slane %v6644_v31, 5  ;;  %v9207_v62 = vmov %v9205_v50 }
  0x64   : > { %v5181_v8 = vcombine.low %v1264_v29, %v1267_v10  ;;  %v5115_v27 = vcombine.low %v640_v43, %v650_v28  ;;  %v1271_v17 = vsel %vm6872_vm8, %v5165_v44, %v9207_v62  ;;  %v9208_v7 = vrot.slane %v6612_v48, 5  ;;  %v1215_v29 = vld [vmem:[%s6554_s9 + $0x3c] sm:$0xe] }
  0x65   : > { %v1280_v0 = vrot.slane %v6650_v35, 5  ;;  %v1278_v11 = vsel %vm6872_vm8, %v5166_v58, %v1277_v13  ;;  %v1279_v12 = vrot.slane %v1277_v13, 4  ;;  %v5167_v31 = vrot.slane %v1213_v6, 9  ;;  %v1217_v13 = vld [vmem:[%s6554_s9 + $0x54] sm:$0xe] }
  0x66   : > { %v1274_v32 = vsel %vm6872_vm8, %v1272_v3, %v9208_v7  ;;  %6024 = vmatprep.mubr.msk.bf16.mxu0 %vm701_vm4, %v5181_v8  ;;  %v1284_v26 = vrot.slane %v6679_v25, 5  ;;  %5985 = vmatmul.mubr.msk.bf16.gmra.mxu1 %vm701_vm4, %v5115_v27  ;;  %v1287_v48 = vrot.slane %v6685_v34, 5  ;;  %v1291_v44 = vrot.slane %v6719_v19, 5  ;;  %v1216_v3 = vld [vmem:[%s6554_s9 + $0x48] sm:$0xe] }
  0x67   : > { %5990 = vmatprep.mubr.msk.bf16.mxu1 %vm701_vm4, %v5132_v49  ;;  %v5182_v35 = vcombine.low %v1271_v17, %v1274_v32  ;;  %v1281_v47 = vsel %vm6872_vm8, %v1279_v12, %v1280_v0  ;;  %v5168_v43 = vrot.slane %v1214_v61, 9  ;;  %v1294_v56 = vrot.slane %v6727_v42, 5 }
  0x68   : > { %v1286_v50 = vrot.slane %v1284_v26, 4  ;;  %v5183_v57 = vcombine.low %v1278_v11, %v1281_v47  ;;  %v1285_v40 = vsel %vm6872_vm8, %v5167_v31, %v1284_v26  ;;  %v1293_v34 = vrot.slane %v1291_v44, 4 }
  0x69   : > { %v5169_v10 = vrot.slane %v1215_v29, 9  ;;  %v1298_v58 = vrot.slane %v6756_v30, 5  ;;  %v1301_v28 = vrot.slane %v6765_v52, 5  ;;  %v5170_v49 = vrot.slane %v1216_v3, 9  ;;  %v1218_v52 = vld [vmem:[%s6554_s9 + $0x60] sm:$0xe] }
  0x6a   : > { %v1288_v6 = vsel %vm6872_vm8, %v1286_v50, %v1287_v48  ;;  %v1305_v8 = vrot.slane %v6793_v24, 5  ;;  %v1308_v27 = vrot.slane %v6799_v2, 5  ;;  %v1322_v62 = vrot.slane %v6585_v21, 5  ;;  %v6975_v48 = vld [vmem:[%s6554_s9 + $0x6c] sm:$0xe] }
  0x6b   : > { %6025 = vmatmul.mubr.msk.bf16.vlgmr.msra.gmra.mxu0 %vm701_vm4, %v5182_v35  ;;  %v1300_v42 = vrot.slane %v1298_v58, 4  ;;  %v1292_v17 = vsel %vm6872_vm8, %v5168_v43, %v1291_v44  ;;  %v5184_v32 = vcombine.low %v1285_v40, %v1288_v6  ;;  %v1295_v0 = vsel %vm6872_vm8, %v1293_v34, %v1294_v56  ;;  %v6996_v3 = vld [vmem:[%s6554_s9 + $0x78] sm:$0xe] }
  0x6c   : > { %6091 = vmatpush3.bf16.msra.mxu0 %v6591_v23  ;;  %6028 = vmatprep.mubr.msk.bf16.mxu0 %vm701_vm4, %v5183_v57  ;;  %v1307_v7 = vrot.slane %v1305_v8, 4  ;;  %v6947_v61 = vsel %vm6872_vm8, %v5169_v10, %v1298_v58  ;;  %v1312_v2 = vrot.slane %v6834_v60, 5  ;;  %v6956_v21 = vsel %vm6872_vm8, %v5170_v49, %v1305_v8  ;;  %v1222_v57 = vld [vmem:[%s6554_s9 + $0x90] sm:$0xe]  ;;  %v1223_v49 = vld [vmem:[%s6554_s9 + $0x9c] sm:$0xe] }
  0x6d   : > { %v5171_v23 = vrot.slane %v1217_v13, 9  ;;  %v1315_v11 = vrot.slane %v6837_v54, 5  ;;  %v1319_v12 = vrot.slane %v6582_v20, 5  ;;  %v1302_v36 = vsel %vm6872_vm8, %v1300_v42, %v1301_v28 }
  0x6e   : > { %5991 = vmatmul.mubr.msk.bf16.vlgmr.msra.gmra.mxu1 %vm701_vm4, %v5133_v55  ;;  %v6966_v37 = vsel %vm6872_vm8, %v1307_v7, %v1308_v27  ;;  %v1314_v55 = vrot.slane %v1312_v2, 4  ;;  %v5172_v31 = vrot.slane %v1218_v52, 9  ;;  %v5135_v54 = vcombine.low %v6672_v15, %v6679_v25  ;;  %v1221_v15 = vld [vmem:[%s6554_s9 + $0x84] sm:$0xe]  ;;  %v1224_v27 = vld [vmem:[%s6554_s9 + $0xa8] sm:$0xe] }
  0x6f   : > { %6057 = vmatpush3.bf16.msra.mxu1 %v6588_v22  ;;  %5994 = vmatprep.mubr.msk.bf16.mxu1 %vm701_vm4, %v5134_v5  ;;  %v5136_v26 = vcombine.low %v6714_v4, %v6719_v19  ;;  %v5185_v22 = vcombine.low %v1292_v17, %v1295_v0  ;;  %v5137_v5 = vcombine.low %v6751_v16, %v6756_v30  ;;  %v1321_v47 = vrot.slane %v1319_v12, 4  ;;  %v9209_v52 = vld [vmem:[#allocation8_spill] sm:$0xff]  ;;  %v9210_v0 = vld [vmem:[#allocation10_spill] sm:$0xff] }
  0x70   : > { %v5138_v44 = vcombine.low %v6784_v33, %v6793_v24  ;;  %v5139_v29 = vcombine.low %v6827_v14, %v6834_v60  ;;  %v5140_v35 = vcombine.low %v6578_v18, %v6582_v20  ;;  %v5186_v25 = vcombine.low %v6947_v61, %v1302_v36  ;;  %v9211_v61 = vld [vmem:[#allocation9_spill] sm:$0xff] }
  0x71   : > { %v5187_v4 = vcombine.low %v6956_v21, %v6966_v37  ;;  %v6989_v19 = vsel %vm6872_vm8, %v5171_v23, %v1312_v2  ;;  %v6993_v50 = vsel %vm6872_vm8, %v1314_v55, %v1315_v11  ;;  %v7002_v43 = vsel %vm6872_vm8, %v5172_v31, %v1319_v12  ;;  %v9212_v23 = vld [vmem:[#allocation6_spill] sm:$0xff]  ;;  %v5284_v2 = vld [vmem:[%s6554_s9 + $0x24] sm:$0xf] }
  0x72   : > { %v5173_v56 = vrot.slane %v6975_v48, 9  ;;  %v1326_v40 = vrot.slane %v6625_v1, 5  ;;  %v5143_v34 = vcombine.low %v6692_v45, %v6699_v51  ;;  %v1329_v10 = vrot.slane %v6633_v9, 5  ;;  %v9215_v48 = vld [vmem:[#allocation12_spill] sm:$0xff] }
  0x73   : > { %6029 = vmatmul.mubr.msk.bf16.gmra.mxu0 %vm701_vm4, %v5184_v32  ;;  %v5175_v58 = vrot.slane %v1221_v15, 9  ;;  %v1340_v6 = vrot.slane %v6699_v51, 5  ;;  %v1343_v28 = vrot.slane %v6706_v59, 5  ;;  %v5188_v8 = vcombine.low %v6989_v19, %v6993_v50 }
  0x74   : > { %6032 = vmatprep.mubr.msk.bf16.mxu0 %vm701_vm4, %v5185_v22  ;;  %v7017_v13 = vsel %vm6872_vm8, %v1321_v47, %v1322_v62  ;;  %v5174_v1 = vrot.slane %v6996_v3, 9  ;;  %v5176_v17 = vrot.slane %v1222_v57, 9  ;;  %v1347_v7 = vrot.slane %v6737_v53, 5  ;;  %v9214_v22 = vld [vmem:[#allocation13_spill] sm:$0xff]  ;;  %v7072_v47 = vld [vmem:[%s6554_s9 + $0x10] sm:$0xf] }
  0x75   : > { %v7026_v9 = vsel %vm6872_vm8, %v5175_v58, %v1340_v6  ;;  %v1342_v59 = vrot.slane %v1340_v6, 4  ;;  %v1328_v62 = vrot.slane %v1326_v40, 4  ;;  %v1350_v32 = vrot.slane %v9209_v52, 5  ;;  %v9216_v58 = vld [vmem:[#allocation14_spill] sm:$0xff] }
  0x76   : > { %5995 = vmatmul.mubr.msk.bf16.gmra.mxu1 %vm701_vm4, %v5135_v54  ;;  %v5177_v21 = vrot.slane %v1223_v49, 9  ;;  %v1333_v11 = vrot.slane %v9212_v23, 5  ;;  %v7040_v36 = vsel %vm6872_vm8, %v5176_v17, %v1347_v7  ;;  %v1349_v37 = vrot.slane %v1347_v7, 4  ;;  %v9213_v54 = vld [vmem:[#allocation11_spill] sm:$0xff] }
  0x77   : > { %5998 = vmatprep.mubr.msk.bf16.mxu1 %vm701_vm4, %v5136_v26  ;;  %v7036_v12 = vsel %vm6872_vm8, %v1342_v59, %v1343_v28  ;;  %v1354_v31 = vrot.slane %v9210_v0, 5  ;;  %v1357_v26 = vrot.slane %v9213_v54, 5  ;;  %v5178_v3 = vrot.slane %v1224_v27, 9  ;;  %v5278_v28 = vld [vmem:[%s6554_s9 + $0xc] sm:$0xf]  ;;  %v9217_v7 = vld [vmem:[#allocation15_spill] sm:$0xff] }
  0x78   : > { %v5192_v55 = vcombine.low %v7026_v9, %v7036_v12  ;;  %v7050_v15 = vsel %vm6872_vm8, %v1349_v37, %v1350_v32  ;;  %v1361_v57 = vrot.slane %v9214_v22, 5  ;;  %v1364_v6 = vrot.slane %v9216_v58, 5  ;;  %v1225_v32 = vld [vmem:[%s6554_s9 + $0xb4] sm:$0xe] }
  0x79   : > { %v5193_v49 = vcombine.low %v7040_v36, %v7050_v15  ;;  %v7060_v59 = vsel %vm6872_vm8, %v5177_v21, %v1354_v31  ;;  %v1356_v17 = vrot.slane %v1354_v31, 4  ;;  %v1335_v27 = vrot.slane %v1333_v11, 4  ;;  %v9218_v37 = vld [vmem:[#allocation7_spill] sm:$0xff] }
  0x7a   : > { %v1336_v54 = vrot.slane %v9218_v37, 5  ;;  %v1363_v58 = vrot.slane %v1361_v57, 4  ;;  %v7076_v21 = vsel %vm6872_vm8, %v5173_v56, %v1326_v40  ;;  %v2078_v52 = vshll.u32 %v5278_v28, 16  ;;  %v5391_v37 = vld [vmem:[%s9156_s1 + $0xa] sm:$0x3] }
  0x7b   : > { %6033 = vmatmul.mubr.msk.bf16.gmra.mxu0 %vm701_vm4, %v5186_v25  ;;  %v7069_v25 = vsel %vm6872_vm8, %v5178_v3, %v1361_v57  ;;  %v7080_v31 = vsel %vm6872_vm8, %v1356_v17, %v1357_v26  ;;  %v5189_v56 = vcombine.low %v7002_v43, %v7017_v13  ;;  %v7093_v40 = vsel %vm6872_vm8, %v1328_v62, %v1329_v10  ;;  %v7102_v57 = vld [vmem:[%s6554_s9 + $0x14] sm:$0x1]  ;;  %v5282_v10 = vld [vmem:[%s6554_s9 + $0x1c] sm:$0xf]  ;;  %v5456_v13 = vld [vmem:[%s9156_s1 + $0xc] sm:$0x3] }
  0x7c   : > { %6036 = vmatprep.mubr.msk.bf16.mxu0 %vm701_vm4, %v5187_v4  ;;  %v2075_v4 = vshrl.u32 %v5278_v28, 16  ;;  %v7099_v3 = vsel %vm6872_vm8, %v1363_v58, %v1364_v6  ;;  %v5281_v28 = vld [vmem:[%s6554_s9 + $0x18] sm:$0xf]  ;;  %v7111_v16 = vsel %vm6872_vm8, %v5174_v1, %v1333_v11  ;;  %v2084_v43 = vshll.u32 %v7072_v47, 16  ;;  %v9219_v1 = vld [vmem:[#allocation5_spill] sm:$0xff] }
  0x7d   : > { %v7123_v33 = vsel %vm6872_vm8, %v1335_v27, %v1336_v54  ;;  %v5179_v24 = vrot.slane %v1225_v32, 9  ;;  %v7127_v62 = vand.u32 %v5391_v37, %v9219_v1  ;;  %v2080_v6 = vrot.slane %v2078_v52, 5 }
  0x7e   : > { %5999 = vmatmul.mubr.msk.bf16.gmra.mxu1 %vm701_vm4, %v5137_v5  ;;  %v1368_v5 = vrot.slane %v6851_v41, 5  ;;  %v2077_v11 = vrot.slane %v2075_v4, 4  ;;  %v7129_v17 = vrot.slane %v2084_v43, 5  ;;  %v2099_v58 = vshrl.u32 %v5281_v28, 16  ;;  %v5283_v43 = vld [vmem:[%s6554_s9 + $0x20] sm:$0x1] }
  0x7f   : > { %6002 = vmatprep.mubr.msk.bf16.mxu1 %vm701_vm4, %v5138_v44  ;;  %v2088_v44 = vshrl.u32 %v7072_v47, 16  ;;  %v1371_v30 = vrot.slane %v6856_v39, 5  ;;  %6124 = vmatprep.subr.bf16.mxu1 %v7127_v62  ;;  %v2102_v27 = vshll.u32 %v5281_v28, 16  ;;  %v2108_v32 = vshll.u32 %v5282_v10, 16 }
  0x80   : > { %v1370_v54 = vrot.slane %v1368_v5, 4  ;;  %v2094_v52 = vshll.u32 %v7102_v57, 16  ;;  %v2101_v4 = vrot.slane %v2099_v58, 4  ;;  %v2112_v37 = vshrl.u32 %v5282_v10, 16  ;;  %v7150_v10 = vld [vmem:[%s6554_s9 + $0x28] sm:$0xf] }
  0x81   : > { %v2090_v26 = vrot.slane %v2088_v44, 4  ;;  %v5190_v39 = vcombine.low %v7076_v21, %v7093_v40  ;;  %v2104_v28 = vrot.slane %v2102_v27, 5  ;;  %v7143_v44 = vrot.slane %v2108_v32, 5  ;;  %v6369_v32 = vld [vmem:[%s6554_s9 + $0x6c] sm:$0xf] }
  0x82   : > { %v7146_v19 = vand.u32 %v5456_v13, %v9219_v1  ;;  %v2081_v50 = vor.u32 %v2080_v6, %v2077_v11  ;;  %v2114_v42 = vrot.slane %v2112_v37, 4  ;;  %v5191_v21 = vcombine.low %v7111_v16, %v7123_v33  ;;  %v5287_v6 = vld [vmem:[%s6554_s9 + $0x30] sm:$0xf] }
  0x83   : > { %6037 = vmatmul.mubr.msk.bf16.gmra.mxu0 %vm701_vm4, %v5188_v8  ;;  %v2091_v8 = vor.u32 %v2090_v26, %v7129_v17  ;;  %v7160_v40 = vsel %vm6872_vm8, %v5179_v24, %v1368_v5  ;;  %v2105_v13 = vor.u32 %v2104_v28, %v2101_v4  ;;  %v7164_v26 = vld [vmem:[%s6554_s9 + $0x2c] sm:$0x1]  ;;  %v2126_v11 = vshll.u32 %v5284_v2, 16  ;;  %v7177_v5 = vld [vmem:[%s6554_s9 + $0x34] sm:$0xf] }
  0x84   : > { %6040 = vmatprep.mubr.msk.bf16.mxu0 %vm701_vm4, %v5189_v56  ;;  %v2123_v56 = vshrl.u32 %v5284_v2, 16  ;;  %6158 = vmatprep.subr.bf16.mxu0 %v7146_v19  ;;  %v7173_v14 = vsel %vm6872_vm8, %v1370_v54, %v1371_v30  ;;  %v2096_v60 = vrot.slane %v2094_v52, 5  ;;  %v2118_v16 = vshll.u32 %v5283_v43, 16  ;;  %v5290_v30 = vld [vmem:[%s6554_s9 + $0x3c] sm:$0xf] }
  0x85   : > { %v2128_v33 = vrot.slane %v2126_v11, 5  ;;  %v2132_v24 = vshll.u32 %v7150_v10, 16  ;;  %v2136_v18 = vshrl.u32 %v7150_v10, 16  ;;  %v2082_v20 = vrot.slane %v2081_v50, 4  ;;  %v6370_v54 = vld [vmem:[%s6554_s9 + $0x70] sm:$0xf] }
  0x86   : > { %6003 = vmatmul.mubr.msk.bf16.gmra.mxu1 %vm701_vm4, %v5139_v29  ;;  %v2115_v29 = vor.u32 %v2114_v42, %v7143_v44  ;;  %v2125_v2 = vrot.slane %v2123_v56, 4  ;;  %v2106_v58 = vrot.slane %v2105_v13, 4  ;;  %v2142_v27 = vshll.u32 %v7164_v26, 16  ;;  %v6371_v42 = vld [vmem:[%s6554_s9 + $0x78] sm:$0xf] }
  0x87   : > { %6006 = vmatprep.mubr.msk.bf16.mxu1 %vm701_vm4, %v5140_v35  ;;  %v2092_v35 = vrot.slane %v2091_v8, 4  ;;  %v5141_v52 = vcombine.low %v6369_v32, %v6370_v54  ;;  %v5142_v4 = vcombine.low %v6371_v42, %v9212_v23  ;;  %v2147_v37 = vshrl.u32 %v5287_v6, 16  ;;  %v5293_v42 = vld [vmem:[%s6554_s9 + $0x48] sm:$0xf]  ;;  %v7214_v13 = vld [vmem:[%s6554_s9 + $0x4c] sm:$0xf] }
  0x88   : > { %v2150_v43 = vshll.u32 %v5287_v6, 16  ;;  %v2116_v28 = vrot.slane %v2115_v29, 4  ;;  %v2120_v50 = vrot.slane %v2118_v16, 5  ;;  %v2156_v8 = vshll.u32 %v7177_v5, 16  ;;  %v7196_v6 = vld [vmem:[%s6554_s9 + $0x38] sm:$0x1] }
  0x89   : > { %v2160_v56 = vshrl.u32 %v7177_v5, 16  ;;  %v2129_v11 = vor.u32 %v2128_v33, %v2125_v2  ;;  %v7193_v32 = vrot.slane %v2132_v24, 5  ;;  %v2138_v23 = vrot.slane %v2136_v18, 4 }
  0x8a   : > { %v2087_v29 = vsel %vm6606_vm5, %v2082_v20, %v7129_v17  ;;  %v7204_v16 = vrot.slane %v2142_v27, 5  ;;  %v2149_v54 = vrot.slane %v2147_v37, 4  ;;  %v2097_v2 = vsel %vm6606_vm5, %v2092_v35, %v2096_v60  ;;  %v7227_v37 = vld [vmem:[%s6554_s9 + $0x44] sm:$0x1] }
  0x8b   : > { %6041 = vmatmul.mubr.msk.bf16.gmra.mxu0 %vm701_vm4, %v5190_v39  ;;  %v7199_v39 = vld [vmem:[%s6554_s9 + $0x40] sm:$0xf]  ;;  %v2111_v33 = vsel %vm6606_vm5, %v2106_v58, %v7143_v44  ;;  %v2171_v24 = vshrl.u32 %v5290_v30, 16  ;;  %v2174_v18 = vshll.u32 %v5290_v30, 16  ;;  %v2121_v17 = vsel %vm6606_vm5, %v2116_v28, %v2120_v50 }
  0x8c   : > { %6044 = vmatprep.mubr.msk.bf16.mxu0 %vm701_vm4, %v5191_v21  ;;  %v2152_v21 = vrot.slane %v2150_v43, 5  ;;  %v7219_v20 = vrot.slane %v2156_v8, 5  ;;  %v2162_v27 = vrot.slane %v2160_v56, 4  ;;  %v7222_v60 = vrot.slane %v2129_v11, 4 }
  0x8d   : > { %v2139_v35 = vor.u32 %v2138_v23, %v7193_v32  ;;  %v2173_v44 = vrot.slane %v2171_v24, 4  ;;  %v2176_v58 = vrot.slane %v2174_v18, 5  ;;  %v2184_v28 = vshrl.u32 %v7199_v39, 16  ;;  %v7242_v24 = vld [vmem:[%s6554_s9 + $0x50] sm:$0x1] }
  0x8e   : > { %6007 = vmatmul.mubr.msk.bf16.gmra.mxu1 %vm701_vm4, %v5141_v52  ;;  %v2180_v52 = vshll.u32 %v7199_v39, 16  ;;  %v2153_v30 = vor.u32 %v2152_v21, %v2149_v54  ;;  %v7232_v50 = vcombine.low %v2087_v29, %v2097_v2  ;;  %v7234_v8 = vcombine.low %v2111_v33, %v2121_v17  ;;  %v7247_v29 = vld [vmem:[%s6554_s9 + $0x58] sm:$0xf] }
  0x8f   : > { %6010 = vmatprep.mubr.msk.bf16.mxu1 %vm701_vm4, %v5142_v4  ;;  %v2166_v4 = vshll.u32 %v7196_v6, 16  ;;  %v2195_v56 = vshrl.u32 %v5293_v42, 16  ;;  %v2198_v11 = vshll.u32 %v5293_v42, 16  ;;  %v2163_v23 = vor.u32 %v2162_v27, %v7219_v20 }
  0x90   : > { %v7229_v43 = vrot.slane %v2180_v52, 5  ;;  %v2177_v54 = vor.u32 %v2176_v58, %v2173_v44  ;;  %v2186_v21 = vrot.slane %v2184_v28, 4  ;;  %v2204_v18 = vshll.u32 %v7214_v13, 16  ;;  %v5296_v52 = vld [vmem:[%s6554_s9 + $0x54] sm:$0xf] }
  0x91   : > { %v2140_v9 = vrot.slane %v2139_v35, 4  ;;  %v2190_v12 = vshll.u32 %v7227_v37, 16  ;;  %v2200_v42 = vrot.slane %v2198_v11, 5  ;;  %v2135_v2 = vsel %vm6606_vm5, %v7222_v60, %v7193_v32  ;;  %v5299_v44 = vld [vmem:[%s6554_s9 + $0x60] sm:$0xf] }
  0x92   : > { %v2154_v33 = vrot.slane %v2153_v30, 4  ;;  %v2168_v17 = vrot.slane %v2166_v4, 5  ;;  %v2208_v27 = vshrl.u32 %v7214_v13, 16  ;;  %v2187_v36 = vor.u32 %v2186_v21, %v7229_v43  ;;  %v7274_v28 = vld [vmem:[%s6554_s9 + $0x5c] sm:$0x1] }
  0x93   : > { %6045 = vmatmul.mubr.msk.bf16.gmra.mxu0 %vm701_vm4, %v5192_v55  ;;  %v2197_v55 = vrot.slane %v2195_v56, 4  ;;  %v7264_v15 = vrot.slane %v2204_v18, 5  ;;  %v2222_v35 = vshll.u32 %v5296_v52, 16  ;;  %v9220_v32 = vcombine.low %v6732_v46, %v6737_v53  ;;  %v7278_v11 = vld [vmem:[%s6554_s9 + $0x64] sm:$0xf] }
  0x94   : > { %6048 = vmatprep.mubr.msk.bf16.mxu0 %vm701_vm4, %v5193_v49  ;;  %v2219_v49 = vshrl.u32 %v5296_v52, 16  ;;  %v2164_v60 = vrot.slane %v2163_v23, 4  ;;  %v2178_v58 = vrot.slane %v2177_v54, 4  ;;  %v2210_v30 = vrot.slane %v2208_v27, 4  ;;  %v7300_v27 = vld [vmem:[%s6554_s9 + $0x70] sm:$0xf] }
  0x95   : > { %v2228_v45 = vshll.u32 %v7247_v29, 16  ;;  %v2192_v51 = vrot.slane %v2190_v12, 5  ;;  %v2214_v4 = vshll.u32 %v7242_v24, 16  ;;  %v2232_v56 = vshrl.u32 %v7247_v29, 16 }
  0x96   : > { %6011 = vmatmul.mubr.msk.bf16.gmra.mxu1 %vm701_vm4, %v5143_v34  ;;  %v2201_v34 = vor.u32 %v2200_v42, %v2197_v55  ;;  %v2145_v46 = vsel %vm6606_vm5, %v2140_v9, %v7204_v16  ;;  %v2159_v53 = vsel %vm6606_vm5, %v2154_v33, %v7219_v20  ;;  %v2221_v23 = vrot.slane %v2219_v49, 4  ;;  %v5302_v55 = vld [vmem:[%s6554_s9 + $0x6c] sm:$0xf] }
  0x97   : > { %6014 = vmatprep.mubr.msk.bf16.mxu1 %vm701_vm4, %v9220_v32  ;;  %v2224_v54 = vrot.slane %v2222_v35, 5  ;;  %v2188_v21 = vrot.slane %v2187_v36, 4  ;;  %v2211_v18 = vor.u32 %v2210_v30, %v7264_v15  ;;  %v7287_v52 = vrot.slane %v2228_v45, 5 }
  0x98   : > { %v2234_v12 = vrot.slane %v2232_v56, 4  ;;  %v9221_v42 = vcombine.low %v7060_v59, %v7080_v31  ;;  %v2169_v16 = vsel %vm6606_vm5, %v2164_v60, %v2168_v17  ;;  %v2183_v20 = vsel %vm6606_vm5, %v2178_v58, %v7229_v43 }
  0x99   : > { %v2243_v9 = vshrl.u32 %v5299_v44, 16  ;;  %v2246_v33 = vshll.u32 %v5299_v44, 16  ;;  %v9222_v36 = vcombine.low %v7069_v25, %v7099_v3  ;;  %v2202_v49 = vrot.slane %v2201_v34, 4 }
  0x9a   : > { %v2216_v59 = vrot.slane %v2214_v4, 5  ;;  %v2252_v31 = vshll.u32 %v7278_v11, 16  ;;  %v2256_v17 = vshrl.u32 %v7278_v11, 16  ;;  %v2225_v35 = vor.u32 %v2224_v54, %v2221_v23 }
  0x9b   : > { %6049 = vmatmul.mubr.msk.bf16.gmra.mxu0 %vm701_vm4, %v9221_v42  ;;  %v2238_v32 = vshll.u32 %v7274_v28, 16  ;;  %v2245_v43 = vrot.slane %v2243_v9, 4  ;;  %v2248_v60 = vrot.slane %v2246_v33, 5  ;;  %v9223_v44 = vcombine.low %v9211_v61, %v9210_v0  ;;  %v7327_v61 = vld [vmem:[%s6554_s9 + $0x68] sm:$0x1]  ;;  %v6337_v9 = vld [vmem:[%s6554_s9 + $0xc] sm:$0xff]  }
  0x9c   : > { %6052 = vmatprep.mubr.msk.bf16.mxu0 %vm701_vm4, %v9222_v36  ;;  %v2193_v25 = vsel %vm6606_vm5, %v2188_v21, %v2192_v51  ;;  %v2212_v3 = vrot.slane %v2211_v18, 4  ;;  %v2235_v58 = vor.u32 %v2234_v12, %v7287_v52  ;;  %v7316_v30 = vrot.slane %v2252_v31, 5  ;;  %v7342_v18 = vld [vmem:[%s6554_s9 + $0x7c] sm:$0xf] }
  0x9d   : > { %v9224_v45 = vcombine.low %v9215_v48, %v9214_v22  ;;  %v7322_v34 = vcombine.low %v2135_v2, %v2145_v46  ;;  %v7324_v0 = vcombine.low %v2159_v53, %v2169_v16  ;;  %v2258_v4 = vrot.slane %v2256_v17, 4  ;;  %v5305_v22 = vld [vmem:[%s6554_s9 + $0x78] sm:$0xf]  ;;  %9225 = vst [vmem:[#allocation8_spill] sm:$0xff] %v7342_v18 }
  0x9e   : > { %6015 = vmatmul.mubr.msk.bf16.gmra.mxu1 %vm701_vm4, %v9223_v44  ;;  %v2267_v51 = vshrl.u32 %v5302_v55, 16  ;;  %v2249_v56 = vor.u32 %v2248_v60, %v2245_v43  ;;  %v2270_v23 = vshll.u32 %v5302_v55, 16  ;;  %v2276_v54 = vshll.u32 %v7300_v27, 16 }
  0x9f   : > { %6018 = vmatprep.mubr.msk.bf16.mxu1 %vm701_vm4, %v9224_v45  ;;  %v2280_v21 = vshrl.u32 %v7300_v27, 16  ;;  %v7332_v48 = vcombine.low %v2183_v20, %v2193_v25  ;;  %v2207_v2 = vsel %vm6606_vm5, %v2202_v49, %v7264_v15  ;;  %v7337_v46 = vrot.slane %v2225_v35, 4  ;;  %v7351_v20 = vld [vmem:[%s6554_s9 + $0x74] sm:$0x1]  ;;  %v7369_v25 = vld [vmem:[%s6554_s9 + $0x88] sm:$0xf] }
  0xa0   : > { %v7339_v53 = vrot.slane %v2238_v32, 5  ;;  %v2217_v12 = vsel %vm6606_vm5, %v2212_v3, %v2216_v59  ;;  %v7346_v55 = vrot.slane %v2235_v58, 4  ;;  %v2259_v42 = vor.u32 %v2258_v4, %v7316_v30  ;;  %9227 = vst [vmem:[#allocation10_spill] sm:$0xff] %v7369_v25 }
  0xa1   : > { %v2262_v16 = vshll.u32 %v7327_v61, 16  ;;  %v9226_v15 = vcombine.low %v7160_v40, %v7173_v14  ;;  %v2269_v33 = vrot.slane %v2267_v51, 4  ;;  %v2272_v36 = vrot.slane %v2270_v23, 5  ;;  %v5308_v40 = vld [vmem:[%s6554_s9 + $0x84] sm:$0xf] }
  0xa2   : > { %v2291_v49 = vshrl.u32 %v5305_v22, 16  ;;  %v2294_v59 = vshll.u32 %v5305_v22, 16  ;;  %v7360_v31 = vrot.slane %v2249_v56, 4  ;;  %v7362_v17 = vrot.slane %v2276_v54, 5  ;;  %v7382_v51 = vld [vmem:[%s6554_s9 + $0x80] sm:$0x1] }
  0xa3   : > { %6053 = vmatmul.mubr.msk.bf16.gmra.mxu0 %vm701_vm4, %v9226_v15  ;;  %v2282_v35 = vrot.slane %v2280_v21, 4  ;;  %v2300_v32 = vshll.u32 %v7342_v18, 16  ;;  %v2286_v14 = vshll.u32 %v7351_v20, 16  ;;  %v2304_v44 = vshrl.u32 %v7342_v18, 16  ;;  %9229 = vst [vmem:[#allocation9_spill] sm:$0xff] %v7382_v51 }
  0xa4   : > { %6092 = vmatprep.mubr.msk.bf16.mxu0 %vm701_vm4, %v7232_v50  ;;  %v2293_v43 = vrot.slane %v2291_v49, 4  ;;  %v2296_v60 = vrot.slane %v2294_v59, 5  ;;  %v9228_v50 = vcombine.low %v9217_v7, %v6851_v41  ;;  %v7375_v3 = vcombine.low %v2207_v2, %v2217_v12  ;;  %v5311_v2 = vld [vmem:[%s6554_s9 + $0x90] sm:$0xf]  ;;  %v6339_v49 = vld [vmem:[%s6554_s9 + $0x24] sm:$0xff]  }
  0xa5   : > { %v2231_v58 = vsel %vm6606_vm5, %v7337_v46, %v7287_v52  ;;  %v2260_v45 = vrot.slane %v2259_v42, 4  ;;  %v2264_v4 = vrot.slane %v2262_v16, 5  ;;  %v2273_v41 = vor.u32 %v2272_v36, %v2269_v33  ;;  %v6338_v46 = vld [vmem:[%s6554_s9 + $0x18] sm:$0xff]  }
  0xa6   : > { %6019 = vmatmul.mubr.msk.bf16.gmra.mxu1 %vm701_vm4, %v9228_v50  ;;  %v7385_v7 = vrot.slane %v2300_v32, 5  ;;  %v2306_v56 = vrot.slane %v2304_v44, 4  ;;  %v2315_v23 = vshrl.u32 %v5308_v40, 16  ;;  %v2241_v54 = vsel %vm6606_vm5, %v7346_v55, %v7339_v53  ;;  %v7406_v53 = vld [vmem:[%s6554_s9 + $0x8c] sm:$0x1] }
  0xa7   : > { %6058 = vmatprep.mubr.msk.bf16.mxu1 %vm701_vm4, %v6337_v9  ;;  %v2255_v52 = vsel %vm6606_vm5, %v7360_v31, %v7316_v30  ;;  %v2318_v21 = vshll.u32 %v5308_v40, 16  ;;  %v2324_v22 = vshll.u32 %v7369_v25, 16  ;;  %v2283_v12 = vor.u32 %v2282_v35, %v7362_v17  ;;  %v7403_v9 = vld [vmem:[%s6554_s9 + $0x94] sm:$0xf]  ;;  %9231 = vst [vmem:[#allocation11_spill] sm:$0xff] %v7406_v53 }
  0xa8   : > { %v7399_v42 = vrot.slane %v2286_v14, 5  ;;  %v2297_v16 = vor.u32 %v2296_v60, %v2293_v43  ;;  %v2310_v15 = vshll.u32 %v7382_v51, 16  ;;  %9230 = vst [vmem:[#allocation6_spill] sm:$0xff] %v7403_v9  ;;  %v2317_v55 = vrot.slane %v2315_v23, 4  ;;  %v7435_v23 = vld [vmem:[%s6554_s9 + $0xa0] sm:$0xf] }
  0xa9   : > { %v2320_v33 = vrot.slane %v2318_v21, 5  ;;  %v7408_v30 = vrot.slane %v2324_v22, 5  ;;  %v2328_v36 = vshrl.u32 %v7369_v25, 16  ;;  %v2265_v59 = vsel %vm6606_vm5, %v2260_v45, %v2264_v4  ;;  %v5314_v4 = vld [vmem:[%s6554_s9 + $0x9c] sm:$0xf]  ;;  %9232 = vst [vmem:[#allocation13_spill] sm:$0xff] %v7435_v23 }
  0xaa   : > { %v7416_v31 = vrot.slane %v2273_v41, 4  ;;  %v2307_v35 = vor.u32 %v2306_v56, %v7385_v7  ;;  %v2339_v32 = vshrl.u32 %v5311_v2, 16  ;;  %v2342_v43 = vshll.u32 %v5311_v2, 16  ;;  %v7444_v2 = vld [vmem:[%s6554_s9 + $0x98] sm:$0x1] }
  0xab   : > { %6093 = vmatmul.mubr.msk.bf16.vlgmr.msra.gmra.mxu0 %vm701_vm4, %v7234_v8  ;;  %v2321_v40 = vor.u32 %v2320_v33, %v2317_v55  ;;  %v2330_v14 = vrot.slane %v2328_v36, 4  ;;  %v2348_v8 = vshll.u32 %v7403_v9, 16  ;;  %v7423_v60 = vrot.slane %v2283_v12, 4  ;;  %9233 = vst [vmem:[#allocation12_spill] sm:$0xff] %v7444_v2 }
  0xac   : > { %6159 = vmatpush3.bf16.msra.mxu0 %v7146_v19  ;;  %6096 = vmatprep.mubr.msk.bf16.mxu0 %vm701_vm4, %v7322_v34  ;;  %v2334_v44 = vshll.u32 %v7406_v53, 16  ;;  %v2341_v50 = vrot.slane %v2339_v32, 4  ;;  %v2352_v45 = vshrl.u32 %v7403_v9, 16  ;;  %v7429_v19 = vrot.slane %v2297_v16, 4  ;;  %v5317_v32 = vld [vmem:[%s6554_s9 + $0xa8] sm:$0xf] }
  0xad   : > { %v7431_v41 = vrot.slane %v2310_v15, 5  ;;  %v2331_v34 = vor.u32 %v2330_v14, %v7408_v30  ;;  %v2344_v56 = vrot.slane %v2342_v43, 5  ;;  %v7439_v21 = vrot.slane %v2307_v35, 4  ;;  %v7467_v14 = vld [vmem:[%s6554_s9 + $0xac] sm:$0xf]  ;;  %v6341_v43 = vld [vmem:[%s6554_s9 + $0x3c] sm:$0xff]  }
  0xae   : > { %6059 = vmatmul.mubr.msk.bf16.vlgmr.msra.gmra.mxu1 %vm701_vm4, %v6338_v46  ;;  %v7441_v22 = vrot.slane %v2321_v40, 4  ;;  %v7446_v46 = vrot.slane %v2348_v8, 5  ;;  %v2354_v12 = vrot.slane %v2352_v45, 4  ;;  %v7448_v16 = vcombine.low %v2231_v58, %v2241_v54  ;;  %v6340_v40 = vld [vmem:[%s6554_s9 + $0x30] sm:$0xff]   ;;  %9234 = vst [vmem:[#allocation14_spill] sm:$0xff] %v7467_v14  ;;  %v6342_v9 = vld [vmem:[%s6554_s9 + $0x48] sm:$0xff]  }
  0xaf   : > { %6125 = vmatpush3.bf16.msra.mxu1 %v7127_v62  ;;  %6062 = vmatprep.mubr.msk.bf16.mxu1 %vm701_vm4, %v6339_v49  ;;  %v2345_v15 = vor.u32 %v2344_v56, %v2341_v50  ;;  %v2363_v55 = vshrl.u32 %v5314_v4, 16  ;;  %v2366_v33 = vshll.u32 %v5314_v4, 16  ;;  %v7450_v62 = vcombine.low %v2255_v52, %v2265_v59  ;;  %v7489_v45 = vld [vmem:[%s6554_s9 + $0xa4] sm:$0x1] }
  0xb0   : > { %v7456_v49 = vrot.slane %v2334_v44, 5  ;;  %v2372_v35 = vshll.u32 %v7435_v23, 16  ;;  %v7461_v58 = vrot.slane %v2331_v34, 4  ;;  %v2355_v54 = vor.u32 %v2354_v12, %v7446_v46  ;;  %9235 = vst [vmem:[#allocation15_spill] sm:$0xff] %v7489_v45  ;;  %v7496_v12 = vld [vmem:[%s6554_s9 + $0xb0] sm:$0x1] }
  0xb1   : > { %v2358_v52 = vshll.u32 %v7444_v2, 16  ;;  %v2376_v59 = vshrl.u32 %v7435_v23, 16  ;;  %v7493_v4 = vrot.slane %v2345_v15, 4  ;;  %v2365_v34 = vrot.slane %v2363_v55, 4  ;;  %9236 = vst [vmem:[#allocation7_spill] sm:$0xff] %v7496_v12 }
  0xb2   : > { %v2368_v56 = vrot.slane %v2366_v33, 5  ;;  %v2387_v44 = vshrl.u32 %v5317_v32, 16  ;;  %v7498_v36 = vrot.slane %v2372_v35, 5  ;;  %v2390_v8 = vshll.u32 %v5317_v32, 16  ;;  %v5320_v23 = vld [vmem:[%s6554_s9 + $0xb4] sm:$0xf] }
  0xb3   : > { %6097 = vmatmul.mubr.msk.bf16.gmra.mxu0 %vm701_vm4, %v7324_v0  ;;  %v2378_v50 = vrot.slane %v2376_v59, 4  ;;  %v2396_v0 = vshll.u32 %v7467_v14, 16  ;;  %v7507_v15 = vrot.slane %v2355_v54, 4  ;;  %v2360_v55 = vrot.slane %v2358_v52, 5  ;;  %v7510_v35 = vld [vmem:[%s6554_s9 + $0xb8] sm:$0xf] }
  0xb4   : > { %6100 = vmatprep.mubr.msk.bf16.mxu0 %vm701_vm4, %v7332_v48  ;;  %v2337_v48 = vsel %vm6606_vm5, %v7461_v58, %v7456_v49  ;;  %v2389_v33 = vrot.slane %v2387_v44, 4  ;;  %9237 = vst [vmem:[#allocation5_spill] sm:$0xff] %v7510_v35  ;;  %v2382_v32 = vshll.u32 %v7489_v45, 16  ;;  %v2392_v59 = vrot.slane %v2390_v8, 5  ;;  %v7522_v54 = vld [vmem:[%s6554_s9 + $0xbc] sm:$0x1] }
  0xb5   : > { %v7514_v2 = vrot.slane %v2396_v0, 5  ;;  %v2351_v49 = vsel %vm6606_vm5, %v7493_v4, %v7446_v46  ;;  %v2369_v58 = vor.u32 %v2368_v56, %v2365_v34  ;;  %v2411_v52 = vshrl.u32 %v5320_v23, 16  ;;  %v7531_v4 = vld [vmem:[%s6554_s9 + $0xc4] sm:$0xf] }
  0xb6   : > { %6063 = vmatmul.mubr.msk.bf16.gmra.mxu1 %vm701_vm4, %v6340_v40  ;;  %v2400_v40 = vshrl.u32 %v7467_v14, 16  ;;  %v2414_v44 = vshll.u32 %v5320_v23, 16  ;;  %v2406_v8 = vshll.u32 %v7496_v12, 16  ;;  %v2420_v0 = vshll.u32 %v7510_v35, 16  ;;  %v5323_v14 = vld [vmem:[%s6554_s9 + $0xc0] sm:$0xf] }
  0xb7   : > { %6066 = vmatprep.mubr.msk.bf16.mxu1 %vm701_vm4, %v6341_v43  ;;  %v2379_v43 = vor.u32 %v2378_v50, %v7498_v36  ;;  %v2393_v53 = vor.u32 %v2392_v59, %v2389_v33  ;;  %v2413_v25 = vrot.slane %v2411_v52, 4  ;;  %v2424_v46 = vshrl.u32 %v7510_v35, 16  ;;  %v6343_v23 = vld [vmem:[%s6554_s9 + $0x54] sm:$0xff]  }
  0xb8   : > { %v2402_v45 = vrot.slane %v2400_v40, 4  ;;  %v2416_v51 = vrot.slane %v2414_v44, 5  ;;  %v2361_v50 = vsel %vm6606_vm5, %v7507_v15, %v2360_v55  ;;  %v2384_v34 = vrot.slane %v2382_v32, 5  ;;  %v7549_v32 = vld [vmem:[%s6554_s9 + $0xc8] sm:$0x1] }
  0xb9   : > { %v7540_v40 = vrot.slane %v2420_v0, 5  ;;  %v2426_v59 = vrot.slane %v2424_v46, 4  ;;  %v2430_v52 = vshll.u32 %v7522_v54, 16  ;;  %v2435_v44 = vshrl.u32 %v5323_v14, 16 }
  0xba   : > { %v2403_v56 = vor.u32 %v2402_v45, %v7514_v2  ;;  %v2417_v33 = vor.u32 %v2416_v51, %v2413_v25  ;;  %v2380_v35 = vrot.slane %v2379_v43, 4  ;;  %v2438_v12 = vshll.u32 %v5323_v14, 16 }
  0xbb   : > { %6101 = vmatmul.mubr.msk.bf16.gmra.mxu0 %vm701_vm4, %v7375_v3  ;;  %v2370_v3 = vrot.slane %v2369_v58, 4  ;;  %v2444_v18 = vshll.u32 %v7531_v4, 16  ;;  %v2394_v15 = vrot.slane %v2393_v53, 4  ;;  %v2408_v55 = vrot.slane %v2406_v8, 5 }
  0xbc   : > { %6104 = vmatprep.mubr.msk.bf16.mxu0 %vm701_vm4, %v7448_v16  ;;  %v2427_v45 = vor.u32 %v2426_v59, %v7540_v40  ;;  %v2437_v16 = vrot.slane %v2435_v44, 4  ;;  %v2404_v25 = vrot.slane %v2403_v56, 4  ;;  %v2440_v51 = vrot.slane %v2438_v12, 5  ;;  %v5362_v44 = vld [vmem:[%s6554_s9 + $0x30] sm:$0xe] }
  0xbd   : > { %v7552_v0 = vrot.slane %v2444_v18, 5  ;;  %v2448_v14 = vshrl.u32 %v7531_v4, 16  ;;  %v9238_v53 = vsel %vm6606_vm5, %v7423_v60, %v7399_v42  ;;  %v9239_v58 = vsel %vm6606_vm5, %v7416_v31, %v7362_v17  ;;  %v6344_v31 = vld [vmem:[%s6554_s9 + $0x60] sm:$0xff]  }
  0xbe   : > { %6067 = vmatmul.mubr.msk.bf16.gmra.mxu1 %vm701_vm4, %v6342_v9  ;;  %v5537_v9 = vld [vmem:[%s9156_s1 + $0xe] sm:$0x3]  ;;  %v5335_v12 = vcombine.low %v9239_v58, %v9238_v53  ;;  %v2418_v18 = vrot.slane %v2417_v33, 4  ;;  %v2428_v43 = vrot.slane %v2427_v45, 4  ;;  %v2432_v8 = vrot.slane %v2430_v52, 5 }
  0xbf   : > { %6070 = vmatprep.mubr.msk.bf16.mxu1 %vm701_vm4, %v6343_v23  ;;  %v9240_v46 = vsel %vm6606_vm5, %v7439_v21, %v7431_v41  ;;  %v9241_v42 = vsel %vm6606_vm5, %v7429_v19, %v7385_v7  ;;  %v2441_v23 = vor.u32 %v2440_v51, %v2437_v16  ;;  %v2450_v56 = vrot.slane %v2448_v14, 4  ;;  %v5602_v19 = vld [vmem:[%s9156_s1 + $0x10] sm:$0x3]  ;;  %v5361_v21 = vld [vmem:[%s6554_s9 + $0x24] sm:$0xe] }
  0xc0   : > { %v5336_v60 = vcombine.low %v9241_v42, %v9240_v46  ;;  %v2454_v17 = vshll.u32 %v7549_v32, 16  ;;  %v9242_v33 = vsel %vm6606_vm5, %v7441_v22, %v7408_v30  ;;  %v7585_v52 = vcombine.low %v2351_v49, %v2361_v50  ;;  %v6345_v30 = vld [vmem:[%s6554_s9 + $0x6c] sm:$0xff]   ;;  %v5363_v14 = vld [vmem:[%s6554_s9 + $0x3c] sm:$0xe] }
  0xc1   : > { %v5337_v59 = vcombine.low %v9242_v33, %v2337_v48  ;;  %v2375_v41 = vsel %vm6606_vm5, %v2370_v3, %v7498_v36  ;;  %v7591_v7 = vand.u32 %v5537_v9, %v9219_v1  ;;  %v2385_v22 = vsel %vm6606_vm5, %v2380_v35, %v2384_v34  ;;  %v7609_v50 = vld [vmem:[%s6554_s9 + $0xc] sm:$0xe] }
  0xc2   : > { %v2399_v36 = vsel %vm6606_vm5, %v2394_v15, %v7514_v2  ;;  %v2409_v48 = vsel %vm6606_vm5, %v2404_v25, %v2408_v55  ;;  %v2451_v49 = vor.u32 %v2450_v56, %v7552_v0  ;;  %v2433_v35 = vsel %vm6606_vm5, %v2428_v43, %v2432_v8  ;;  %v5365_v56 = vld [vmem:[%s6554_s9 + $0x54] sm:$0xe] }
  0xc3   : > { %6105 = vmatmul.mubr.msk.bf16.gmra.mxu0 %vm701_vm4, %v7450_v62  ;;  %v2423_v62 = vsel %vm6606_vm5, %v2418_v18, %v7540_v40  ;;  %v7617_v34 = vrot.slane %v2441_v23, 4  ;;  %v2818_v2 = vrot.slane %v7072_v47, 5  ;;  %6192 = vmatprep.subr.bf16.mxu1 %v7591_v7  ;;  %v7624_v15 = vrot.slane %v2454_v17, 5  ;;  %v6346_v17 = vld [vmem:[%s6554_s9 + $0x78] sm:$0xff]  }
  0xc4   : > { %6108 = vmatprep.mubr.msk.bf16.mxu0 %vm701_vm4, %v5335_v12  ;;  %v7622_v3 = vrot.slane %v2451_v49, 4  ;;  %v7627_v55 = vand.u32 %v5602_v19, %v9219_v1  ;;  %v5377_v45 = vrot.slane %v5361_v21, 9  ;;  %v7630_v40 = vcombine.low %v2375_v41, %v2385_v22  ;;  %v5364_v12 = vld [vmem:[%s6554_s9 + $0x48] sm:$0xe]  ;;  %v6353_v47 = vld [vmem:[%s6554_s9 + $0x18] sm:$0xff]  }
  0xc5   : > { %v7632_v16 = vcombine.low %v2399_v36, %v2409_v48  ;;  %v5375_v25 = vrot.slane %v7609_v50, 9  ;;  %v2832_v51 = vrot.slane %v7150_v10, 5  ;;  %v7638_v9 = vcombine.low %v2423_v62, %v2433_v35  ;;  %v6347_v21 = vld [vmem:[%s6554_s9 + $0x84] sm:$0xff]   ;;  %v5366_v36 = vld [vmem:[%s6554_s9 + $0x60] sm:$0xe] }
  0xc6   : > { %6071 = vmatmul.mubr.msk.bf16.gmra.mxu1 %vm701_vm4, %v6344_v31  ;;  %v2821_v1 = vrot.slane %v7102_v57, 5  ;;  %6226 = vmatprep.subr.bf16.mxu0 %v7627_v55  ;;  %v2835_v53 = vrot.slane %v7164_v26, 5  ;;  %v5378_v58 = vrot.slane %v5362_v44, 9  ;;  %v2447_v10 = vsel %vm6606_vm5, %v7617_v34, %v7552_v0 }
  0xc7   : > { %6074 = vmatprep.mubr.msk.bf16.mxu1 %vm701_vm4, %v6345_v30  ;;  %v7650_v18 = vrot.slane %v2818_v2, 4  ;;  %v7654_v43 = vsel %vm6872_vm8, %v5377_v45, %v2832_v51  ;;  %v2834_v8 = vrot.slane %v2832_v51, 4  ;;  %v2457_v26 = vsel %vm6606_vm5, %v7622_v3, %v7624_v15  ;;  %v6352_v15 = vld [vmem:[%s6554_s9 + $0xc0] sm:$0xff]  }
  0xc8   : > { %v2839_v46 = vrot.slane %v7177_v5, 5  ;;  %v2842_v42 = vrot.slane %v7196_v6, 5  ;;  %v5379_v23 = vrot.slane %v5363_v14, 9  ;;  %v2846_v33 = vrot.slane %v7199_v39, 5  ;;  %v5368_v14 = vld [vmem:[%s6554_s9 + $0x78] sm:$0xe] }
  0xc9   : > { %v7666_v31 = vsel %vm6872_vm8, %v2834_v8, %v2835_v53  ;;  %v2849_v41 = vrot.slane %v7227_v37, 5  ;;  %v5380_v19 = vrot.slane %v5364_v12, 9  ;;  %v2853_v22 = vrot.slane %v7214_v13, 5 }
  0xca   : > { %v5394_v5 = vcombine.low %v7654_v43, %v7666_v31  ;;  %v7676_v6 = vsel %vm6872_vm8, %v5378_v58, %v2839_v46  ;;  %v2841_v30 = vrot.slane %v2839_v46, 4  ;;  %v7683_v39 = vsel %vm6872_vm8, %v5379_v23, %v2846_v33  ;;  %v5369_v23 = vld [vmem:[%s6554_s9 + $0x84] sm:$0xe] }
  0xcb   : > { %6109 = vmatmul.mubr.msk.bf16.gmra.mxu0 %vm701_vm4, %v5336_v60  ;;  %v2848_v37 = vrot.slane %v2846_v33, 4  ;;  %v2856_v60 = vrot.slane %v7242_v24, 5  ;;  %v5381_v48 = vrot.slane %v5365_v56, 9  ;;  %v7692_v62 = vsel %vm6872_vm8, %v5380_v19, %v2853_v22  ;;  %v6348_v19 = vld [vmem:[%s6554_s9 + $0x90] sm:$0xff]  }
  0xcc   : > { %6112 = vmatprep.mubr.msk.bf16.mxu0 %vm701_vm4, %v5337_v59  ;;  %v7688_v49 = vsel %vm6872_vm8, %v2841_v30, %v2842_v42  ;;  %v2855_v13 = vrot.slane %v2853_v22, 4  ;;  %v2860_v35 = vrot.slane %v7247_v29, 5  ;;  %v5367_v59 = vld [vmem:[%s6554_s9 + $0x6c] sm:$0xe]  ;;  %v2863_v45 = vrot.slane %v7274_v28, 5  ;;  %v9243_v30 = vld [vmem:[#allocation8_spill] sm:$0xff] }
  0xcd   : > { %v5395_v44 = vcombine.low %v7676_v6, %v7688_v49  ;;  %v7701_v24 = vsel %vm6872_vm8, %v2848_v37, %v2849_v41  ;;  %v5382_v51 = vrot.slane %v5366_v36, 9  ;;  %v2867_v8 = vrot.slane %v7278_v11, 5  ;;  %v5370_v36 = vld [vmem:[%s6554_s9 + $0x90] sm:$0xe]  ;;  %v9253_v28 = vld [vmem:[#allocation5_spill] sm:$0xff] }
  0xce   : > { %6075 = vmatmul.mubr.msk.bf16.gmra.mxu1 %vm701_vm4, %v6346_v17  ;;  %v5396_v29 = vcombine.low %v7683_v39, %v7701_v24  ;;  %v7710_v53 = vsel %vm6872_vm8, %v2855_v13, %v2856_v60  ;;  %v7714_v58 = vsel %vm6872_vm8, %v5381_v48, %v2860_v35  ;;  %v2862_v12 = vrot.slane %v2860_v35, 4  ;;  %v9244_v60 = vld [vmem:[#allocation9_spill] sm:$0xff] }
  0xcf   : > { %6078 = vmatprep.mubr.msk.bf16.mxu1 %vm701_vm4, %v6347_v21  ;;  %v2870_v46 = vrot.slane %v7327_v61, 5  ;;  %v5383_v42 = vrot.slane %v5367_v59, 9  ;;  %v2874_v17 = vrot.slane %v7300_v27, 5  ;;  %v2877_v33 = vrot.slane %v7351_v20, 5  ;;  %v6349_v27 = vld [vmem:[%s6554_s9 + $0x9c] sm:$0xff]   ;;  %v6350_v21 = vld [vmem:[%s6554_s9 + $0xa8] sm:$0xff]  }
  0xd0   : > { %v7723_v56 = vsel %vm6872_vm8, %v2862_v12, %v2863_v45  ;;  %v5384_v41 = vrot.slane %v5368_v14, 9  ;;  %v7732_v11 = vsel %vm6872_vm8, %v5382_v51, %v2867_v8  ;;  %v2869_v61 = vrot.slane %v2867_v8, 4  ;;  %v9245_v45 = vld [vmem:[#allocation10_spill] sm:$0xff]  ;;  %v5371_v14 = vld [vmem:[%s6554_s9 + $0x9c] sm:$0xe] }
  0xd1   : > { %v2881_v22 = vrot.slane %v9243_v30, 5  ;;  %v7741_v20 = vsel %vm6872_vm8, %v5383_v42, %v2874_v17  ;;  %v2876_v37 = vrot.slane %v2874_v17, 4  ;;  %v2884_v48 = vrot.slane %v9244_v60, 5  ;;  %v5374_v12 = vld [vmem:[%s6554_s9 + $0xc0] sm:$0xe] }
  0xd2   : > { %v5385_v13 = vrot.slane %v5369_v23, 9  ;;  %v7748_v35 = vsel %vm6872_vm8, %v2869_v61, %v2870_v46  ;;  %v2888_v51 = vrot.slane %v9245_v45, 5  ;;  %v5386_v46 = vrot.slane %v5370_v36, 9  ;;  %v5372_v23 = vld [vmem:[%s6554_s9 + $0xa8] sm:$0xe]  ;;  %v9248_v36 = vld [vmem:[#allocation12_spill] sm:$0xff] }
  0xd3   : > { %6113 = vmatmul.mubr.msk.bf16.gmra.mxu0 %vm701_vm4, %v7585_v52  ;;  %v7752_v52 = vsel %vm6872_vm8, %v5384_v41, %v2881_v22  ;;  %v2883_v59 = vrot.slane %v2881_v22, 4  ;;  %v7760_v8 = vsel %vm6872_vm8, %v2876_v37, %v2877_v33  ;;  %v2898_v37 = vrot.slane %v9248_v36, 5  ;;  %v5373_v45 = vld [vmem:[%s6554_s9 + $0xb4] sm:$0xe] }
  0xd4   : > { %6116 = vmatprep.mubr.msk.bf16.mxu0 %vm701_vm4, %v7630_v40  ;;  %v9246_v40 = vld [vmem:[#allocation11_spill] sm:$0xff]  ;;  %v7773_v61 = vsel %vm6872_vm8, %v5385_v13, %v2888_v51  ;;  %v2890_v33 = vrot.slane %v2888_v51, 4  ;;  %v5387_v60 = vrot.slane %v5371_v14, 9  ;;  %v9249_v13 = vld [vmem:[#allocation13_spill] sm:$0xff]  ;;  %v5388_v17 = vrot.slane %v5372_v23, 9  ;;  %v9251_v14 = vld [vmem:[#allocation14_spill] sm:$0xff] }
  0xd5   : > { %v2891_v42 = vrot.slane %v9246_v40, 5  ;;  %v7769_v41 = vsel %vm6872_vm8, %v2883_v59, %v2884_v48  ;;  %v2902_v59 = vrot.slane %v9249_v13, 5  ;;  %v9250_v51 = vld [vmem:[#allocation15_spill] sm:$0xff]  ;;  %v2909_v30 = vrot.slane %v9251_v14, 5 }
  0xd6   : > { %6079 = vmatmul.mubr.msk.bf16.gmra.mxu1 %vm701_vm4, %v6348_v19  ;;  %v9247_v19 = vld [vmem:[#allocation6_spill] sm:$0xff]  ;;  %v2905_v40 = vrot.slane %v9250_v51, 5  ;;  %v9252_v13 = vld [vmem:[#allocation7_spill] sm:$0xff]  ;;  %v5389_v23 = vrot.slane %v5373_v45, 9  ;;  %v2822_v0 = vsel %vm6872_vm8, %v7650_v18, %v2821_v1  ;;  %v6373_v18 = vld [vmem:[%s6554_s9 + $0x20] sm:$0x1] }
  0xd7   : > { %6082 = vmatprep.mubr.msk.bf16.mxu1 %vm701_vm4, %v6349_v27  ;;  %v2895_v22 = vrot.slane %v9247_v19, 5  ;;  %v7783_v48 = vsel %vm6872_vm8, %v2890_v33, %v2891_v42  ;;  %v7798_v42 = vsel %vm6872_vm8, %v5387_v60, %v2902_v59  ;;  %v2904_v33 = vrot.slane %v2902_v59, 4  ;;  %v6351_v27 = vld [vmem:[%s6554_s9 + $0xb4] sm:$0xff]  }
  0xd8   : > { %v2912_v51 = vrot.slane %v9252_v13, 5  ;;  %v2911_v14 = vrot.slane %v2909_v30, 4  ;;  %v2916_v60 = vrot.slane %v9253_v28, 5  ;;  %v5390_v59 = vrot.slane %v5374_v12, 9 }
  0xd9   : > { %v7791_v19 = vsel %vm6872_vm8, %v5386_v46, %v2895_v22  ;;  %v2897_v36 = vrot.slane %v2895_v22, 4  ;;  %v7810_v22 = vsel %vm6872_vm8, %v5388_v17, %v2909_v30  ;;  %v2923_v12 = vrot.slane %v7531_v4, 5 }
  0xda   : > { %v7826_v28 = vsel %vm6872_vm8, %v2911_v14, %v2912_v51  ;;  %v2918_v30 = vrot.slane %v2916_v60, 4  ;;  %v2819_v4 = vsel %vm6872_vm8, %v5375_v25, %v2818_v2  ;;  %v6355_v14 = vld [vmem:[%s6554_s9 + $0x30] sm:$0xff]  }
  0xdb   : > { %6117 = vmatmul.mubr.msk.bf16.gmra.mxu0 %vm701_vm4, %v7632_v16  ;;  %v7806_v46 = vsel %vm6872_vm8, %v2897_v36, %v2898_v37  ;;  %v7819_v16 = vsel %vm6872_vm8, %v2904_v33, %v2905_v40  ;;  %v2919_v37 = vrot.slane %v7522_v54, 5  ;;  %v2926_v40 = vrot.slane %v7549_v32, 5  ;;  %v5360_v32 = vld [vmem:[%s6554_s9 + $0x18] sm:$0xe] }
  0xdc   : > { %6120 = vmatprep.mubr.msk.bf16.mxu0 %vm701_vm4, %v7638_v9  ;;  %v7830_v9 = vsel %vm6872_vm8, %v5389_v23, %v2916_v60  ;;  %v7870_v34 = vsel %vm6872_vm8, %v5390_v59, %v2923_v12  ;;  %v2925_v2 = vrot.slane %v2923_v12, 4  ;;  %v5376_v25 = vrot.slane %v5360_v32, 9  ;;  %v6354_v23 = vld [vmem:[%s6554_s9 + $0x24] sm:$0xff]   ;;  %v5489_v60 = vld [vmem:[%s6554_s9 + $0x18] sm:$0xf] }
  0xdd   : > { %v7858_v3 = vsel %vm6872_vm8, %v2918_v30, %v2919_v37  ;;  %v5392_v1 = vcombine.low %v2819_v4, %v2822_v0  ;;  %v5490_v59 = vld [vmem:[%s6554_s9 + $0x1c] sm:$0xf]  ;;  %v5492_v30 = vld [vmem:[%s6554_s9 + $0x24] sm:$0xf]  ;;  %v3630_v12 = vshrl.u32 %v5489_v60, 16 }
  0xde   : > { %6083 = vmatmul.mubr.msk.bf16.gmra.mxu1 %vm701_vm4, %v6350_v21  ;;  %v5342_v21 = vcombine.low %v2447_v10, %v2457_v26  ;;  %v7875_v57 = vsel %vm6872_vm8, %v2925_v2, %v2926_v40  ;;  %v2828_v26 = vrot.slane %v6373_v18, 5  ;;  %v3633_v40 = vshll.u32 %v5489_v60, 16  ;;  %v6357_v2 = vld [vmem:[%s6554_s9 + $0x48] sm:$0xff]  }
  0xdf   : > { %6086 = vmatprep.mubr.msk.bf16.mxu1 %vm701_vm4, %v6351_v27  ;;  %v6372_v27 = vld [vmem:[%s6554_s9 + $0x1c] sm:$0xf]  ;;  %v3639_v4 = vshll.u32 %v5490_v59, 16  ;;  %v3643_v32 = vshrl.u32 %v5490_v59, 16 }
  0xe0   : > { %v2825_v36 = vrot.slane %v6372_v27, 5  ;;  %v3654_v27 = vshrl.u32 %v5492_v30, 16 }
  0xe1   : > { %v3645_v18 = vrot.slane %v3643_v32, 4 }
  0xe2   : > { %v2827_v10 = vrot.slane %v2825_v36, 4  ;;  %v2826_v13 = vsel %vm6872_vm8, %v5376_v25, %v2825_v36  ;;  %v3657_v36 = vshll.u32 %v5492_v30, 16  ;;  %v3632_v25 = vrot.slane %v3630_v12, 4 }
  0xe3   : > { %6121 = vmatmul.mubr.msk.bf16.gmra.mxu0 %vm701_vm4, %v5342_v21  ;;  %v7897_v21 = vld [vmem:[%s6554_s9 + $0x28] sm:$0xf]  ;;  %v3656_v43 = vrot.slane %v3654_v27, 4 }
  0xe4   : > { %6160 = vmatprep.mubr.msk.bf16.mxu0 %vm701_vm4, %v6353_v47  ;;  %v2829_v51 = vsel %vm6872_vm8, %v2827_v10, %v2828_v26  ;;  %v3663_v0 = vshll.u32 %v7897_v21, 16  ;;  %v3667_v47 = vshrl.u32 %v7897_v21, 16  ;;  %v7910_v10 = vrot.slane %v3639_v4, 5 }
  0xe5   : > { %v5393_v37 = vcombine.low %v2826_v13, %v2829_v51  ;;  %v4373_v26 = vrot.slane %v5490_v59, 5  ;;  %v7914_v13 = vld [vmem:[%s6554_s9 + $0x2c] sm:$0x1]  ;;  %v3659_v31 = vrot.slane %v3657_v36, 5  ;;  %v7924_v59 = vld [vmem:[%s6554_s9 + $0x34] sm:$0xf] }
  0xe6   : > { %6087 = vmatmul.mubr.msk.bf16.gmra.mxu1 %vm701_vm4, %v6352_v15  ;;  %v5491_v15 = vld [vmem:[%s6554_s9 + $0x20] sm:$0x1]  ;;  %v7919_v51 = vrot.slane %v3663_v0, 5  ;;  %v3646_v12 = vor.u32 %v3645_v18, %v7910_v10  ;;  %v3673_v32 = vshll.u32 %v7914_v13, 16  ;;  %v4380_v0 = vrot.slane %v7897_v21, 5 }
  0xe7   : > { %6126 = vmatprep.mubr.msk.bf16.mxu1 %vm701_vm4, %v5392_v1  ;;  %v3635_v1 = vrot.slane %v3633_v40, 5  ;;  %v4375_v40 = vrot.slane %v4373_v26, 4  ;;  %v4376_v4 = vrot.slane %v5491_v15, 5  ;;  %v3660_v36 = vor.u32 %v3659_v31, %v3656_v43  ;;  %v5498_v31 = vld [vmem:[%s6554_s9 + $0x3c] sm:$0xf] }
  0xe8   : > { %v3647_v24 = vrot.slane %v3646_v12, 4  ;;  %v4382_v33 = vrot.slane %v4380_v0, 4  ;;  %v7963_v12 = vld [vmem:[%s6554_s9 + $0x38] sm:$0x1] }
  0xe9   : > { %v3636_v60 = vor.u32 %v3635_v1, %v3632_v25  ;;  %v3691_v25 = vshrl.u32 %v7924_v59, 16  ;;  %v6359_v1 = vld [vmem:[%s6554_s9 + $0x60] sm:$0xff]  }
  0xeb   : > { %6161 = vmatmul.mubr.msk.bf16.vlgmr.msra.gmra.mxu0 %vm701_vm4, %v6354_v23  ;;  %v3669_v23 = vrot.slane %v3667_v47, 4  ;;  %v3637_v18 = vrot.slane %v3636_v60, 4  ;;  %v4383_v60 = vrot.slane %v7914_v13, 5 }
  0xec   : > { %6227 = vmatpush3.bf16.msra.mxu0 %v7627_v55  ;;  %6164 = vmatprep.mubr.msk.bf16.mxu0 %vm701_vm4, %v6355_v14  ;;  %v6356_v55 = vld [vmem:[%s6554_s9 + $0x3c] sm:$0xff]   ;;  %v5495_v14 = vld [vmem:[%s6554_s9 + $0x30] sm:$0xf] }
  0xed   : > { %v3678_v47 = vshrl.u32 %v5495_v14, 16  ;;  %v3670_v6 = vor.u32 %v3669_v23, %v7919_v51  ;;  %v3681_v49 = vshll.u32 %v5495_v14, 16  ;;  %v3661_v14 = vrot.slane %v3660_v36, 4 }
  0xee   : > { %6127 = vmatmul.mubr.msk.bf16.vlgmr.msra.gmra.mxu1 %vm701_vm4, %v5393_v37  ;;  %v3649_v37 = vshll.u32 %v5491_v15, 16  ;;  %v3702_v36 = vshrl.u32 %v5498_v31, 16  ;;  %v3642_v13 = vsel %vm6606_vm5, %v3637_v18, %v7910_v10  ;;  %v3697_v18 = vshll.u32 %v7963_v12, 16 }
  0xef   : > { %6193 = vmatpush3.bf16.msra.mxu1 %v7591_v7  ;;  %6130 = vmatprep.mubr.msk.bf16.mxu1 %vm701_vm4, %v5394_v5  ;;  %v5570_v7 = vld [vmem:[%s6554_s9 + $0x18] sm:$0xe]  ;;  %v7917_v5 = vpop.f32.mrf.mxu0  ;;  %v3666_v10 = vsel %vm6606_vm5, %v3661_v14, %v7919_v51  ;;  %v4387_v14 = vrot.slane %v7924_v59, 5 }
  0xf0   : > { %v5586_v30 = vrot.slane %v5570_v7, 9  ;;  %v3651_v21 = vrot.slane %v3649_v37, 5  ;;  %v3675_v7 = vrot.slane %v3673_v32, 5  ;;  %v3680_v37 = vrot.slane %v3678_v47, 4 }
  0xf1   : > { %v7941_v15 = vpop.f32.mrf.mxu0  ;;  %v3693_v32 = vrot.slane %v3691_v25, 4  ;;  %v8031_v17 = vrot.slane %v3697_v18, 5  ;;  %v4389_v45 = vrot.slane %v4387_v14, 4 }
  0xf2   : > { %v7949_v39 = vsel %vm6872_vm8, %v5586_v30, %v4373_v26  ;;  %v3671_v30 = vrot.slane %v3670_v6, 4  ;;  %v3652_v47 = vsel %vm6606_vm5, %v3647_v24, %v3651_v21  ;;  %v7976_v6 = vld [vmem:[%s6554_s9 + $0x40] sm:$0xf]  ;;  %v9258_v21 = vcombine.low %v7714_v58, %v7723_v56  ;;  %v6360_v24 = vld [vmem:[%s6554_s9 + $0x6c] sm:$0xff]  }
  0xf3   : > { %6165 = vmatmul.mubr.msk.bf16.gmra.mxu0 %vm701_vm4, %v6356_v55  ;;  %v5571_v55 = vld [vmem:[%s6554_s9 + $0x24] sm:$0xe]  ;;  %v7960_v26 = vpop.f32.mrf.mxu0  ;;  %v3711_v58 = vshll.u32 %v7976_v6, 16  ;;  %v3715_v56 = vshrl.u32 %v7976_v6, 16 }
  0xf4   : > { %6168 = vmatprep.mubr.msk.bf16.mxu0 %vm701_vm4, %v6357_v2  ;;  %v7932_v27 = vpop.f32.mrf.mxu1  ;;  %v6358_v2 = vld [vmem:[%s6554_s9 + $0x54] sm:$0xff]   ;;  %v5587_v43 = vrot.slane %v5571_v55, 9  ;;  %v3705_v55 = vshll.u32 %v5498_v31, 16  ;;  %v5572_v31 = vld [vmem:[%s6554_s9 + $0x30] sm:$0xe] }
  0xf5   : > { %9254 = vst [vmem:[#allocation8_spill] sm:$0xff] %v7932_v27  ;;  %v8005_v51 = vpop.f32.mrf.mxu0 }
  0xf6   : > { %6131 = vmatmul.mubr.msk.bf16.gmra.mxu1 %vm701_vm4, %v5395_v44  ;;  %v3687_v44 = vshll.u32 %v7924_v59, 16  ;;  %v7956_v23 = vpop.f32.mrf.mxu1  ;;  %v7989_v25 = vsel %vm6872_vm8, %v5587_v43, %v4380_v0  ;;  %v3676_v0 = vsel %vm6606_vm5, %v3671_v30, %v3675_v7  ;;  %v8019_v30 = vcombine.low %v3642_v13, %v3652_v47  ;;  %v8035_v47 = vld [vmem:[%s6554_s9 + $0x58] sm:$0xf] }
  0xf7   : > { %6134 = vmatprep.mubr.msk.bf16.mxu1 %vm701_vm4, %v5396_v29  ;;  %v7953_v29 = vsel %vm6872_vm8, %v4375_v40, %v4376_v4  ;;  %9255 = vst [vmem:[#allocation9_spill] sm:$0xff] %v7956_v23  ;;  %v3683_v40 = vrot.slane %v3681_v49, 5  ;;  %v9256_v49 = vcombine.low %v7692_v62, %v7710_v53  ;;  %v5501_v62 = vld [vmem:[%s6554_s9 + $0x48] sm:$0xf]  ;;  %v7998_v53 = vld [vmem:[%s6554_s9 + $0x4c] sm:$0xf]  ;;  %v8021_v59 = vcombine.low %v3666_v10, %v3676_v0 }
  0xf8   : > { %v7965_v4 = vrot.slane %v3687_v44, 5  ;;  %v7982_v44 = vpop.f32.mrf.mxu1  ;;  %v3729_v50 = vshll.u32 %v5501_v62, 16  ;;  %v3735_v54 = vshll.u32 %v7998_v53, 16  ;;  %v3739_v7 = vshrl.u32 %v7998_v53, 16  ;;  %v8041_v0 = vld [vmem:[%s6554_s9 + $0x44] sm:$0x1] }
  0xf9   : > { %9257 = vst [vmem:[#allocation10_spill] sm:$0xff] %v7982_v44  ;;  %v3684_v43 = vor.u32 %v3683_v40, %v3680_v37  ;;  %v4390_v13 = vrot.slane %v7963_v12, 5  ;;  %v5573_v40 = vld [vmem:[%s6554_s9 + $0x3c] sm:$0xe]  ;;  %v9261_v23 = vcombine.low %v7732_v11, %v7748_v35 }
  0xfa   : > { %v8017_v37 = vpop.f32.mrf.mxu1  ;;  %v8046_v44 = vrot.slane %v3735_v54, 5  ;;  %v3741_v12 = vrot.slane %v3739_v7, 4  ;;  %v9263_v54 = vcombine.low %v7741_v20, %v7760_v8  ;;  %v4394_v20 = vrot.slane %v7976_v6, 5  ;;  %v6363_v8 = vld [vmem:[%s6554_s9 + $0x90] sm:$0xff]   ;;  %v5507_v6 = vld [vmem:[%s6554_s9 + $0x60] sm:$0xf] }
  0xfb   : > { %6169 = vmatmul.mubr.msk.bf16.gmra.mxu0 %vm701_vm4, %v6358_v2  ;;  %v3707_v2 = vrot.slane %v3705_v55, 5  ;;  %9259 = vst [vmem:[#allocation11_spill] sm:$0xff] %v8017_v37  ;;  %v3731_v37 = vrot.slane %v3729_v50, 5  ;;  %v6362_v50 = vld [vmem:[%s6554_s9 + $0x84] sm:$0xff]   ;;  %v5589_v35 = vrot.slane %v5573_v40, 9 }
  0xfc   : > { %6172 = vmatprep.mubr.msk.bf16.mxu0 %vm701_vm4, %v6359_v1  ;;  %v7993_v1 = vsel %vm6872_vm8, %v4382_v33, %v4383_v60  ;;  %v3694_v33 = vor.u32 %v3693_v32, %v7965_v4  ;;  %v6361_v60 = vld [vmem:[%s6554_s9 + $0x78] sm:$0xff]   ;;  %v5588_v32 = vrot.slane %v5572_v31, 9 }
  0xfe   : > { %6135 = vmatmul.mubr.msk.bf16.gmra.mxu1 %vm701_vm4, %v9256_v49  ;;  %v3704_v49 = vrot.slane %v3702_v36, 4  ;;  %v5504_v36 = vld [vmem:[%s6554_s9 + $0x54] sm:$0xf]  ;;  %v8038_v10 = vrot.slane %v3694_v33, 4 }
  0xff   : > { %6138 = vmatprep.mubr.msk.bf16.mxu1 %vm701_vm4, %v9258_v21  ;;  %v3726_v21 = vshrl.u32 %v5501_v62, 16  ;;  %v8029_v62 = vrot.slane %v3684_v43, 4  ;;  %v3717_v43 = vrot.slane %v3715_v56, 4  ;;  %v3763_v56 = vshrl.u32 %v8035_v47, 16 }
 0x100   : > { %v8027_v55 = vpop.f32.mrf.mxu0  ;;  %v3708_v31 = vor.u32 %v3707_v2, %v3704_v49  ;;  %v3750_v2 = vshrl.u32 %v5504_v36, 16  ;;  %v3753_v49 = vshll.u32 %v5504_v36, 16 }
 0x101   : > { %9260 = vst [vmem:[#allocation6_spill] sm:$0xff] %v8027_v55  ;;  %v3728_v18 = vrot.slane %v3726_v21, 4  ;;  %v8076_v21 = vsel %vm6872_vm8, %v4389_v45, %v4390_v13  ;;  %v3742_v45 = vor.u32 %v3741_v12, %v8046_v44  ;;  %v4401_v12 = vrot.slane %v7998_v53, 5  ;;  %v8103_v55 = vld [vmem:[%s6554_s9 + $0x5c] sm:$0x1] }
 0x102   : > { %v8064_v11 = vpop.f32.mrf.mxu0  ;;  %v3752_v27 = vrot.slane %v3750_v2, 4  ;;  %v9267_v53 = vcombine.low %v7752_v52, %v7769_v41  ;;  %v9269_v52 = vcombine.low %v7773_v61, %v7783_v48  ;;  %v6364_v41 = vld [vmem:[%s6554_s9 + $0x9c] sm:$0xff]   ;;  %v4408_v61 = vrot.slane %v8035_v47, 5 }
 0x103   : > { %6173 = vmatmul.mubr.msk.bf16.gmra.mxu0 %vm701_vm4, %v6360_v24  ;;  %v8043_v24 = vrot.slane %v3711_v58, 5  ;;  %v3759_v58 = vshll.u32 %v8035_v47, 16  ;;  %9264 = vst [vmem:[#allocation13_spill] sm:$0xff] %v8064_v11  ;;  %v3755_v11 = vrot.slane %v3753_v49, 5 }
 0x104   : > { %6176 = vmatprep.mubr.msk.bf16.mxu0 %vm701_vm4, %v6361_v60  ;;  %v8052_v33 = vpop.f32.mrf.mxu1  ;;  %v8055_v60 = vld [vmem:[%s6554_s9 + $0x50] sm:$0x1]  ;;  %v8096_v40 = vpop.f32.mrf.mxu0 }
 0x105   : > { %9262 = vst [vmem:[#allocation12_spill] sm:$0xff] %v8052_v33  ;;  %v3718_v36 = vor.u32 %v3717_v43, %v8043_v24  ;;  %v8086_v33 = vrot.slane %v3708_v31, 4  ;;  %v8093_v7 = vrot.slane %v3759_v58, 5  ;;  %v3765_v43 = vrot.slane %v3763_v56, 4  ;;  %9266 = vst [vmem:[#allocation14_spill] sm:$0xff] %v8096_v40 }
 0x106   : > { %6139 = vmatmul.mubr.msk.bf16.gmra.mxu1 %vm701_vm4, %v9261_v23  ;;  %v8072_v23 = vsel %vm6872_vm8, %v5588_v32, %v4387_v14  ;;  %v3732_v14 = vor.u32 %v3731_v37, %v3728_v18  ;;  %v3745_v32 = vshll.u32 %v8055_v60, 16  ;;  %v8091_v13 = vpop.f32.mrf.mxu1  ;;  %v4396_v31 = vrot.slane %v4394_v20, 4  ;;  %v5574_v58 = vld [vmem:[%s6554_s9 + $0x48] sm:$0xe] }
 0x107   : > { %6142 = vmatprep.mubr.msk.bf16.mxu1 %vm701_vm4, %v9263_v54  ;;  %v3721_v54 = vshll.u32 %v8041_v0, 16  ;;  %9265 = vst [vmem:[#allocation15_spill] sm:$0xff] %v8091_v13  ;;  %v4397_v18 = vrot.slane %v8041_v0, 5  ;;  %v3719_v2 = vrot.slane %v3718_v36, 4  ;;  %v3774_v56 = vshrl.u32 %v5507_v6, 16 }
 0x108   : > { %v8109_v13 = vsel %vm6872_vm8, %v5589_v35, %v4394_v20  ;;  %v3733_v37 = vrot.slane %v3732_v14, 4  ;;  %v3743_v40 = vrot.slane %v3742_v45, 4  ;;  %v3747_v0 = vrot.slane %v3745_v32, 5  ;;  %v8124_v14 = vld [vmem:[%s6554_s9 + $0x64] sm:$0xf]  ;;  %v8131_v45 = vpop.f32.mrf.mxu0 }
 0x109   : > { %v3723_v49 = vrot.slane %v3721_v54, 5  ;;  %v3714_v36 = vsel %vm6606_vm5, %v8086_v33, %v8043_v24  ;;  %v3756_v54 = vor.u32 %v3755_v11, %v3752_v27  ;;  %v3766_v35 = vor.u32 %v3765_v43, %v8093_v7  ;;  %9270 = vst [vmem:[#allocation5_spill] sm:$0xff] %v8131_v45  ;;  %v5575_v11 = vld [vmem:[%s6554_s9 + $0x54] sm:$0xe]  ;;  %v6368_v45 = vld [vmem:[%s6554_s9 + $0xcc] sm:$0xff]  }
 0x10a   : > { %v3769_v20 = vshll.u32 %v8103_v55, 16  ;;  %v8135_v32 = vsel %vm6872_vm8, %v4396_v31, %v4397_v18  ;;  %v5590_v24 = vrot.slane %v5574_v58, 9  ;;  %v4403_v27 = vrot.slane %v4401_v12, 4 }
 0x10b   : > { %6177 = vmatmul.mubr.msk.bf16.gmra.mxu0 %vm701_vm4, %v6362_v50  ;;  %v3777_v50 = vshll.u32 %v5507_v6, 16  ;;  %v4404_v33 = vrot.slane %v8055_v60, 5  ;;  %v6365_v6 = vld [vmem:[%s6554_s9 + $0xa8] sm:$0xff]   ;;  %v3724_v43 = vsel %vm6606_vm5, %v3719_v2, %v3723_v49  ;;  %v3776_v48 = vrot.slane %v3774_v56, 4 }
 0x10c   : > { %6180 = vmatprep.mubr.msk.bf16.mxu0 %vm701_vm4, %v6363_v8  ;;  %v8115_v8 = vpop.f32.mrf.mxu1  ;;  %v3748_v31 = vsel %vm6606_vm5, %v3743_v40, %v3747_v0  ;;  %v3783_v18 = vshll.u32 %v8124_v14, 16  ;;  %v3787_v60 = vshrl.u32 %v8124_v14, 16  ;;  %v3767_v2 = vrot.slane %v3766_v35, 4  ;;  %v8153_v56 = vld [vmem:[%s6554_s9 + $0x68] sm:$0x1] }
 0x10d   : > { %9268 = vst [vmem:[#allocation7_spill] sm:$0xff] %v8115_v8  ;;  %v3757_v8 = vrot.slane %v3756_v54, 4  ;;  %v3771_v47 = vrot.slane %v3769_v20, 5  ;;  %v5591_v49 = vrot.slane %v5575_v11, 9  ;;  %v9273_v40 = vsel %vm6606_vm5, %v8038_v10, %v8031_v17  ;;  %v5510_v20 = vld [vmem:[%s6554_s9 + $0x6c] sm:$0xf] }
 0x10e   : > { %6143 = vmatmul.mubr.msk.bf16.gmra.mxu1 %vm701_vm4, %v9267_v53  ;;  %v3779_v53 = vrot.slane %v3777_v50, 5  ;;  %v8150_v58 = vpop.f32.mrf.mxu1  ;;  %v8174_v54 = vsel %vm6872_vm8, %v5590_v24, %v4401_v12  ;;  %v8178_v35 = vsel %vm6872_vm8, %v4403_v27, %v4404_v33  ;;  %v8181_v17 = vcombine.low %v3714_v36, %v3724_v43  ;;  %v5576_v33 = vld [vmem:[%s6554_s9 + $0x60] sm:$0xe]  ;;  %v5516_v43 = vld [vmem:[%s6554_s9 + $0x84] sm:$0xf] }
 0x10f   : > { %6146 = vmatprep.mubr.msk.bf16.mxu1 %vm701_vm4, %v9269_v52  ;;  %v3738_v52 = vsel %vm6606_vm5, %v3733_v37, %v8046_v44  ;;  %9271 = vst [vmem:[#allocation16_spill] sm:$0xff] %v8150_v58  ;;  %v9274_v37 = vsel %vm6606_vm5, %v8029_v62, %v7965_v4  ;;  %v4410_v4 = vrot.slane %v4408_v61, 4  ;;  %v4411_v62 = vrot.slane %v8103_v55, 5 }
 0x110   : > { %v8168_v50 = vcombine.low %v9274_v37, %v9273_v40  ;;  %9275 = vst [vmem:[#allocation18_spill] sm:$0xff] %v8181_v17  ;;  %v3780_v10 = vor.u32 %v3779_v53, %v3776_v48  ;;  %v8188_v11 = vcombine.low %v3738_v52, %v3748_v31  ;;  %v8190_v12 = vrot.slane %v3783_v18, 5 }
 0x111   : > { %v8156_v44 = vpop.f32.mrf.mxu0  ;;  %v8192_v24 = vrot.slane %v3787_v60, 4  ;;  %v3793_v27 = vshll.u32 %v8153_v56, 16  ;;  %v9277_v36 = vcombine.low %v7791_v19, %v7806_v46  ;;  %v3762_v48 = vsel %vm6606_vm5, %v3757_v8, %v8093_v7  ;;  %v5513_v19 = vld [vmem:[%s6554_s9 + $0x78] sm:$0xf] }
 0x112   : > { %9272 = vst [vmem:[#allocation17_spill] sm:$0xff] %v8156_v44  ;;  %9276 = vst [vmem:[#allocation19_spill] sm:$0xff] %v8188_v11  ;;  %v3772_v53 = vsel %vm6606_vm5, %v3767_v2, %v3771_v47  ;;  %v8212_v52 = vsel %vm6872_vm8, %v5591_v49, %v4408_v61  ;;  %v9279_v46 = vcombine.low %v7798_v42, %v7819_v16  ;;  %v3798_v18 = vshrl.u32 %v5510_v20, 16  ;;  %v8224_v2 = vld [vmem:[%s6554_s9 + $0x7c] sm:$0xf]  ;;  %v6367_v61 = vld [vmem:[%s6554_s9 + $0xc0] sm:$0xff]  }
 0x113   : > { %6181 = vmatmul.mubr.msk.bf16.gmra.mxu0 %vm701_vm4, %v6364_v41  ;;  %v8186_v41 = vld [vmem:[%s6554_s9 + $0x70] sm:$0xf]  ;;  %v8219_v31 = vpop.f32.mrf.mxu0  ;;  %v3801_v60 = vshll.u32 %v5510_v20, 16  ;;  %v8229_v47 = vsel %vm6872_vm8, %v4410_v4, %v4411_v62  ;;  %v8231_v42 = vrot.slane %v3780_v10, 4  ;;  %v5592_v16 = vrot.slane %v5576_v33, 9 }
 0x114   : > { %6184 = vmatprep.mubr.msk.bf16.mxu0 %vm701_vm4, %v6365_v6  ;;  %v6366_v6 = vld [vmem:[%s6554_s9 + $0xb4] sm:$0xff]   ;;  %9280 = vst [vmem:[#allocation21_spill] sm:$0xff] %v8219_v31  ;;  %v3807_v7 = vshll.u32 %v8186_v41, 16  ;;  %v3811_v8 = vshrl.u32 %v8186_v41, 16  ;;  %v4415_v49 = vrot.slane %v8124_v14, 5  ;;  %v8234_v40 = vcombine.low %v3762_v48, %v3772_v53 }
 0x115   : > { %v3790_v37 = vor.u32 %v8192_v24, %v8190_v12  ;;  %v8238_v20 = vrot.slane %v3793_v27, 5  ;;  %v3822_v4 = vshrl.u32 %v5513_v19, 16  ;;  %v3825_v62 = vshll.u32 %v5513_v19, 16  ;;  %v8250_v33 = vld [vmem:[%s6554_s9 + $0x88] sm:$0xf]  ;;  %v8253_v24 = vpop.f32.mrf.mxu0 }
 0x116   : > { %6147 = vmatmul.mubr.msk.bf16.gmra.mxu1 %vm701_vm4, %v9277_v36  ;;  %v8200_v55 = vpop.f32.mrf.mxu1  ;;  %9281 = vst [vmem:[#allocation22_spill] sm:$0xff] %v8234_v40  ;;  %v4418_v36 = vrot.slane %v8153_v56, 5  ;;  %v3831_v14 = vshll.u32 %v8224_v2, 16  ;;  %v3835_v10 = vshrl.u32 %v8224_v2, 16  ;;  %9283 = vst [vmem:[#allocation24_spill] sm:$0xff] %v8253_v24  ;;  %v3800_v56 = vrot.slane %v3798_v18, 4 }
 0x117   : > { %9278 = vst [vmem:[#allocation20_spill] sm:$0xff] %v8200_v55  ;;  %6150 = vmatprep.mubr.msk.bf16.mxu1 %vm701_vm4, %v9279_v46  ;;  %v8242_v46 = vld [vmem:[%s6554_s9 + $0x74] sm:$0x1]  ;;  %v3803_v27 = vrot.slane %v3801_v60, 5  ;;  %v8255_v48 = vrot.slane %v3807_v7, 5  ;;  %v3813_v53 = vrot.slane %v3811_v8, 4  ;;  %v9284_v19 = vcombine.low %v7810_v22, %v7826_v28  ;;  %v8283_v40 = vpop.f32.mrf.mxu0 }
 0x118   : > { %v8245_v0 = vpop.f32.mrf.mxu1  ;;  %v4417_v55 = vrot.slane %v4415_v49, 4  ;;  %v8268_v18 = vld [vmem:[%s6554_s9 + $0x80] sm:$0x1]  ;;  %v8271_v60 = vld [vmem:[%s6554_s9 + $0x6c] sm:$0xe]  ;;  %v3846_v7 = vshrl.u32 %v5516_v43, 16 }
 0x119   : > { %9282 = vst [vmem:[#allocation23_spill] sm:$0xff] %v8245_v0  ;;  %v8264_v0 = vsel %vm6872_vm8, %v5592_v16, %v4415_v49  ;;  %v3849_v8 = vshll.u32 %v5516_v43, 16  ;;  %v3859_v58 = vshrl.u32 %v8250_v33, 16  ;;  %v3824_v49 = vrot.slane %v3822_v4, 4  ;;  %9286 = vst [vmem:[#allocation26_spill] sm:$0xff] %v8283_v40 }
 0x11a   : > { %v8279_v16 = vpop.f32.mrf.mxu1  ;;  %v3827_v24 = vrot.slane %v3825_v62, 5  ;;  %v8281_v31 = vrot.slane %v3831_v14, 5  ;;  %v3837_v44 = vrot.slane %v3835_v10, 4  ;;  %v9287_v43 = vcombine.low %v7830_v9, %v7858_v3  ;;  %v8302_v3 = vld [vmem:[%s6554_s9 + $0x8c] sm:$0x1] }
 0x11b   : > { %6185 = vmatmul.mubr.msk.bf16.gmra.mxu0 %vm701_vm4, %v6366_v6  ;;  %v3817_v6 = vshll.u32 %v8242_v46, 16  ;;  %9285 = vst [vmem:[#allocation25_spill] sm:$0xff] %v8279_v16  ;;  %v3804_v22 = vor.u32 %v3803_v27, %v3800_v56  ;;  %v3814_v28 = vor.u32 %v3813_v53, %v8255_v48  ;;  %v3841_v4 = vshll.u32 %v8268_v18, 16  ;;  %v5578_v56 = vld [vmem:[%s6554_s9 + $0x78] sm:$0xe] }
 0x11c   : > { %6188 = vmatprep.mubr.msk.bf16.mxu0 %vm701_vm4, %v6367_v61  ;;  %v3855_v61 = vshll.u32 %v8250_v33, 16  ;;  %v8293_v62 = vrot.slane %v3790_v37, 4  ;;  %v8297_v14 = vsel %vm6872_vm8, %v4417_v55, %v4418_v36  ;;  %v5593_v10 = vrot.slane %v8271_v60, 9  ;;  %v8307_v16 = vpop.f32.mrf.mxu1  ;;  %v5519_v60 = vld [vmem:[%s6554_s9 + $0x90] sm:$0xf] }
 0x11d   : > { %v4429_v9 = vrot.slane %v8224_v2, 5  ;;  %v3848_v27 = vrot.slane %v3846_v7, 4  ;;  %v3851_v53 = vrot.slane %v3849_v8, 5  ;;  %9288 = vst [vmem:[#allocation27_spill] sm:$0xff] %v8307_v16  ;;  %v3819_v37 = vrot.slane %v3817_v6, 5 }
 0x11e   : > { %6151 = vmatmul.mubr.msk.bf16.gmra.mxu1 %vm701_vm4, %v9284_v19  ;;  %v4422_v19 = vrot.slane %v8186_v41, 5  ;;  %v8305_v41 = vrot.slane %v3855_v61, 5  ;;  %v4425_v40 = vrot.slane %v8242_v46, 5  ;;  %v3828_v55 = vor.u32 %v3827_v24, %v3824_v49  ;;  %v8316_v61 = vld [vmem:[%s6554_s9 + $0x94] sm:$0xf] }
 0x11f   : > { %6154 = vmatprep.mubr.msk.bf16.mxu1 %vm701_vm4, %v9287_v43  ;;  %v3861_v43 = vrot.slane %v3859_v58, 4  ;;  %v3838_v36 = vor.u32 %v3837_v44, %v8281_v31  ;;  %v3805_v2 = vrot.slane %v3804_v22, 4  ;;  %v3815_v7 = vrot.slane %v3814_v28, 4 }
 0x120   : > { %v4424_v17 = vrot.slane %v4422_v19, 4  ;;  %v3843_v8 = vrot.slane %v3841_v4, 5  ;;  %v9289_v58 = vcombine.low %v7949_v39, %v7953_v29  ;;  %v5594_v46 = vrot.slane %v5578_v56, 9 }
 0x121   : > { %v4431_v24 = vrot.slane %v4429_v9, 4  ;;  %v4432_v44 = vrot.slane %v8268_v18, 5  ;;  %v3865_v6 = vshll.u32 %v8302_v3, 16  ;;  %v3862_v22 = vor.u32 %v3861_v43, %v8305_v41 }
 0x122   : > { %v3870_v28 = vshrl.u32 %v5519_v60, 16  ;;  %v3873_v4 = vshll.u32 %v5519_v60, 16  ;;  %v9291_v39 = vcombine.low %v7870_v34, %v7875_v57  ;;  %v3829_v29 = vrot.slane %v3828_v55, 4 }
 0x123   : > { %v8312_v11 = vpop.f32.mrf.mxu0  ;;  %6189 = vmatmul.mubr.msk.bf16.gmra.mxu0 %vm701_vm4, %v6368_v45  ;;  %v3852_v45 = vor.u32 %v3851_v53, %v3848_v27  ;;  %v3839_v56 = vrot.slane %v3838_v36, 4  ;;  %v3879_v18 = vshll.u32 %v8316_v61, 16  ;;  %v3796_v27 = vsel %vm6606_vm5, %v8293_v62, %v8238_v20 }
 0x124   : > { %6228 = vmatprep.mubr.msk.bf16.mxu0 %vm701_vm4, %v9289_v58  ;;  %v3883_v58 = vshrl.u32 %v8316_v61, 16  ;;  %v3810_v34 = vsel %vm6606_vm5, %v3805_v2, %v8255_v48  ;;  %v8348_v57 = vsel %vm6872_vm8, %v5593_v10, %v4422_v19  ;;  %v8352_v53 = vsel %vm6872_vm8, %v4424_v17, %v4425_v40  ;;  %v5579_v19 = vld [vmem:[%s6554_s9 + $0x84] sm:$0xe]  ;;  %v9330_v38 = vld [vmem:[#allocation27_spill] sm:$0xff] }
 0x125   : > { %v8324_v49 = vpop.f32.mrf.mxu0  ;;  %v8360_v20 = vsel %vm6872_vm8, %v5594_v46, %v4429_v9  ;;  %v8364_v48 = vsel %vm6872_vm8, %v4431_v24, %v4432_v44  ;;  %v3867_v62 = vrot.slane %v3865_v6, 5  ;;  %v3853_v17 = vrot.slane %v3852_v45, 4  ;;  %v8388_v45 = vld [vmem:[%s6554_s9 + $0x98] sm:$0x1] }
 0x126   : > { %9290 = vst [vmem:[#allocation28_spill] sm:$0xff] %v8324_v49  ;;  %v8327_v16 = vpop.f32.mrf.mxu1  ;;  %6155 = vmatmul.mubr.msk.bf16.gmra.mxu1 %vm701_vm4, %v9291_v39  ;;  %v3863_v40 = vrot.slane %v3862_v22, 4  ;;  %v3872_v55 = vrot.slane %v3870_v28, 4  ;;  %v3875_v36 = vrot.slane %v3873_v4, 5  ;;  %v3834_v9 = vsel %vm6606_vm5, %v3829_v29, %v8281_v31  ;;  %v5522_v22 = vld [vmem:[%s6554_s9 + $0x9c] sm:$0xf] }
 0x127   : > { %v8335_v49 = vpop.f32.mrf.mxu0  ;;  %6194 = vmatprep.mubr.msk.bf16.mxu1 %vm701_vm4, %v8019_v30  ;;  %v3820_v30 = vsel %vm6606_vm5, %v3815_v7, %v3819_v37  ;;  %v3844_v37 = vsel %vm6606_vm5, %v3839_v56, %v3843_v8  ;;  %v8376_v2 = vrot.slane %v3879_v18, 5  ;;  %v3885_v7 = vrot.slane %v3883_v58, 4  ;;  %v8419_v58 = vld [vmem:[%s6554_s9 + $0xa0] sm:$0xf] }
 0x128   : > { %v8354_v43 = vpop.f32.mrf.mxu1  ;;  %v9292_v24 = vcombine.low %v7989_v25, %v7993_v1  ;;  %v5608_v44 = vcombine.low %v8212_v52, %v8229_v47  ;;  %v5609_v6 = vcombine.low %v8264_v0, %v8297_v14  ;;  %v5595_v31 = vrot.slane %v5579_v19, 9 }
 0x129   : > { %v8367_v10 = vpop.f32.mrf.mxu0  ;;  %v4436_v8 = vrot.slane %v8250_v33, 5  ;;  %v9293_v25 = vcombine.low %v8072_v23, %v8076_v21  ;;  %v9294_v1 = vsel %vm6606_vm5, %v8231_v42, %v8190_v12  ;;  %v8404_v39 = vcombine.low %v3810_v34, %v3820_v30  ;;  %v5580_v42 = vld [vmem:[%s6554_s9 + $0x90] sm:$0xe]  ;;  %v9301_v33 = vld [vmem:[#allocation14_spill] sm:$0xff] }
 0x12a   : > { %v8369_v60 = vpop.f32.mrf.mxu1  ;;  %v8402_v4 = vcombine.low %v9294_v1, %v3796_v27  ;;  %v8410_v18 = vcombine.low %v3834_v9, %v3844_v37  ;;  %v3858_v23 = vsel %vm6606_vm5, %v3853_v17, %v8305_v41  ;;  %v3868_v21 = vsel %vm6606_vm5, %v3863_v40, %v3867_v62 }
 0x12b   : > { %v6026_v46 = vpop.f32.mrf.mxu0  ;;  %6229 = vmatmul.mubr.msk.bf16.vlgmr.msra.gmra.mxu0 %vm701_vm4, %v9292_v24  ;;  %v3876_v12 = vor.u32 %v3875_v36, %v3872_v55  ;;  %v3886_v34 = vor.u32 %v3885_v7, %v8376_v2  ;;  %v3889_v30 = vshll.u32 %v8388_v45, 16  ;;  %v3894_v19 = vshrl.u32 %v5522_v22, 16 }
 0x12c   : > { %v8391_v28 = vpop.f32.mrf.mxu1  ;;  %6232 = vmatprep.mubr.msk.bf16.mxu0 %vm701_vm4, %v9293_v25  ;;  %v3897_v9 = vshll.u32 %v5522_v22, 16  ;;  %v8430_v62 = vsel %vm6872_vm8, %v5595_v31, %v4436_v8  ;;  %v4438_v17 = vrot.slane %v4436_v8, 4  ;;  %v4439_v40 = vrot.slane %v8302_v3, 5 }
 0x12d   : > { %v1508_v56 = vpop.f32.mrf.mxu0  ;;  %v5596_v55 = vrot.slane %v5580_v42, 9  ;;  %v4443_v36 = vrot.slane %v8316_v61, 5  ;;  %v3903_v7 = vshll.u32 %v8419_v58, 16  ;;  %v3907_v24 = vshrl.u32 %v8419_v58, 16 }
 0x12e   : > { %v5992_v27 = vpop.f32.mrf.mxu1  ;;  %6195 = vmatmul.mubr.msk.bf16.vlgmr.msra.gmra.mxu1 %vm701_vm4, %v8021_v59  ;;  %v8439_v25 = vcombine.low %v3858_v23, %v3868_v21  ;;  %v8441_v31 = vrot.slane %v3876_v12, 4  ;;  %v3887_v3 = vrot.slane %v3886_v34, 4  ;;  %v3891_v1 = vrot.slane %v3889_v30, 5  ;;  %v5525_v21 = vld [vmem:[%s6554_s9 + $0xa8] sm:$0xf] }
 0x12f   : > { %v1092_v37 = vadd.f32 %v5992_v27, %v7917_v5  ;;  %v6027_v41 = vpop.f32.mrf.mxu0  ;;  %6198 = vmatprep.mubr.msk.bf16.mxu1 %vm701_vm4, %v8168_v50  ;;  %v3896_v42 = vrot.slane %v3894_v19, 4  ;;  %v3899_v61 = vrot.slane %v3897_v9, 5  ;;  %v4446_v23 = vrot.slane %v8388_v45, 5  ;;  %v8467_v30 = vld [vmem:[%s6554_s9 + $0xac] sm:$0xf] }
 0x130   : > { %v1083_v59 = vpop.f32.mrf.mxu1  ;;  %v3909_v34 = vrot.slane %v3907_v24, 4  ;;  %v9298_v24 = vld [vmem:[#allocation6_spill] sm:$0xff] }
 0x131   : > { %v8436_v5 = vadd.f32 %v6026_v46, %v1092_v37  ;;  %v1084_v50 = vadd.f32 %v1083_v59, %v7941_v15  ;;  %v1511_v22 = vpop.f32.mrf.mxu0  ;;  %v9295_v37 = vcombine.low %v8109_v13, %v8135_v32  ;;  %v8452_v15 = vsel %vm6872_vm8, %v4438_v17, %v4439_v40  ;;  %v5581_v17 = vld [vmem:[%s6554_s9 + $0x9c] sm:$0xe] }
 0x132   : > { %v5993_v8 = vpop.f32.mrf.mxu1  ;;  %v4445_v13 = vrot.slane %v4443_v36, 4  ;;  %v8464_v32 = vrot.slane %v3903_v7, 5  ;;  %v4450_v40 = vrot.slane %v8419_v58, 5  ;;  %v3927_v58 = vshll.u32 %v8467_v30, 16 }
 0x133   : > { %v8443_v27 = vadd.f32 %v1508_v56, %v1084_v50  ;;  %v1095_v29 = vadd.f32 %v5993_v8, %v7960_v26  ;;  %v6030_v46 = vpop.f32.mrf.mxu0  ;;  %6233 = vmatmul.mubr.msk.bf16.gmra.mxu0 %vm701_vm4, %v9295_v37  ;;  %v9296_v56 = vcombine.low %v8174_v54, %v8178_v35  ;;  %v8462_v26 = vsel %vm6872_vm8, %v5596_v55, %v4443_v36  ;;  %v5524_v35 = vld [vmem:[%s6554_s9 + $0xa4] sm:$0x1]  ;;  %v9297_v55 = vld [vmem:[#allocation18_spill] sm:$0xff] }
 0x134   : > { %v1086_v12 = vpop.f32.mrf.mxu1  ;;  %v3882_v54 = vsel %vm6606_vm5, %v8441_v31, %v8376_v2  ;;  %v3918_v36 = vshrl.u32 %v5525_v21, 16  ;;  %v9299_v2 = vld [vmem:[#allocation19_spill] sm:$0xff]  ;;  %v3931_v31 = vshrl.u32 %v8467_v30, 16 }
 0x135   : > { %6236 = vmatprep.mubr.msk.bf16.mxu0 %vm701_vm4, %v9296_v56  ;;  %v8469_v19 = vadd.f32 %v6027_v41, %v1095_v29  ;;  %v1087_v45 = vadd.f32 %v1086_v12, %v8005_v51  ;;  %v1524_v9 = vpop.f32.mrf.mxu0  ;;  %v3892_v29 = vsel %vm6606_vm5, %v3887_v3, %v3891_v1  ;;  %v3900_v41 = vor.u32 %v3899_v61, %v3896_v42  ;;  %v9300_v61 = vld [vmem:[#allocation13_spill] sm:$0xff] }
 0x136   : > { %v5996_v59 = vpop.f32.mrf.mxu1  ;;  %6199 = vmatmul.mubr.msk.bf16.gmra.mxu1 %vm701_vm4, %v9297_v55  ;;  %v3921_v51 = vshll.u32 %v5525_v21, 16  ;;  %v8492_v12 = vsel %vm6872_vm8, %v4445_v13, %v4446_v23  ;;  %v3910_v3 = vor.u32 %v3909_v34, %v8464_v32  ;;  %v3913_v1 = vshll.u32 %v5524_v35, 16 }
 0x137   : > { %v8483_v7 = vadd.f32 %v1511_v22, %v1087_v45  ;;  %v1108_v50 = vadd.f32 %v5996_v59, %v9298_v24  ;;  %v6031_v8 = vpop.f32.mrf.mxu0  ;;  %6202 = vmatprep.mubr.msk.bf16.mxu1 %vm701_vm4, %v9299_v2  ;;  %v5597_v22 = vrot.slane %v5581_v17, 9  ;;  %v4452_v45 = vrot.slane %v4450_v40, 4 }
 0x138   : > { %v1099_v37 = vpop.f32.mrf.mxu1  ;;  %v4453_v59 = vrot.slane %v5524_v35, 5  ;;  %v8500_v2 = vrot.slane %v3900_v41, 4  ;;  %v3920_v23 = vrot.slane %v3918_v36, 4  ;;  %v3923_v13 = vrot.slane %v3921_v51, 5  ;;  %v8510_v35 = vld [vmem:[%s6554_s9 + $0xb0] sm:$0x1] }
 0x139   : > { %v8495_v42 = vadd.f32 %v6030_v46, %v1108_v50  ;;  %v1100_v21 = vadd.f32 %v1099_v37, %v9300_v61  ;;  %v1527_v56 = vpop.f32.mrf.mxu0  ;;  %v8512_v50 = vrot.slane %v3927_v58, 5  ;;  %v3933_v41 = vrot.slane %v3931_v31, 4  ;;  %v9302_v51 = vld [vmem:[#allocation5_spill] sm:$0xff] }
 0x13a   : > { %v5997_v55 = vpop.f32.mrf.mxu1  ;;  %v8522_v52 = vrot.slane %v3910_v3, 4  ;;  %v8524_v47 = vrot.slane %v3913_v1, 5  ;;  %v8532_v0 = vsel %vm6872_vm8, %v5597_v22, %v4450_v40  ;;  %v8536_v14 = vsel %vm6872_vm8, %v4452_v45, %v4453_v59  ;;  %v8548_v22 = vld [vmem:[%s6554_s9 + $0xb8] sm:$0xf] }
 0x13b   : > { %v8502_v34 = vadd.f32 %v1524_v9, %v1100_v21  ;;  %v1111_v17 = vadd.f32 %v5997_v55, %v9301_v33  ;;  %v6034_v46 = vpop.f32.mrf.mxu0  ;;  %6237 = vmatmul.mubr.msk.bf16.gmra.mxu0 %vm701_vm4, %v5608_v44  ;;  %v8518_v9 = vcombine.low %v3882_v54, %v3892_v29  ;;  %v5582_v44 = vld [vmem:[%s6554_s9 + $0xa8] sm:$0xe]  ;;  %v3924_v3 = vor.u32 %v3923_v13, %v3920_v23  ;;  %v9304_v21 = vld [vmem:[#allocation17_spill] sm:$0xff] }
 0x13c   : > { %v1102_v37 = vpop.f32.mrf.mxu1  ;;  %6240 = vmatprep.mubr.msk.bf16.mxu0 %vm701_vm4, %v5609_v6  ;;  %v5528_v6 = vld [vmem:[%s6554_s9 + $0xb4] sm:$0xf]  ;;  %v9303_v29 = vld [vmem:[#allocation22_spill] sm:$0xff]  ;;  %v3937_v1 = vshll.u32 %v8510_v35, 16  ;;  %v4457_v40 = vrot.slane %v8467_v30, 5  ;;  %v3934_v55 = vor.u32 %v3933_v41, %v8512_v50  ;;  %v3916_v30 = vsel %vm6606_vm5, %v8522_v52, %v8524_v47 }
 0x13d   : > { %v8527_v36 = vadd.f32 %v6031_v8, %v1111_v17  ;;  %v1103_v58 = vadd.f32 %v1102_v37, %v9302_v51  ;;  %v1540_v31 = vpop.f32.mrf.mxu0  ;;  %v5598_v17 = vrot.slane %v5582_v44, 9  ;;  %v3942_v23 = vshrl.u32 %v5528_v6, 16 }
 0x13e   : > { %v6000_v54 = vpop.f32.mrf.mxu1  ;;  %6203 = vmatmul.mubr.msk.bf16.gmra.mxu1 %vm701_vm4, %v9303_v29  ;;  %v3945_v13 = vshll.u32 %v5528_v6, 16  ;;  %v3951_v41 = vshll.u32 %v8548_v22, 16  ;;  %v3955_v44 = vshrl.u32 %v8548_v22, 16  ;;  %v5531_v29 = vld [vmem:[%s6554_s9 + $0xc0] sm:$0xf]  ;;  %v3925_v33 = vrot.slane %v3924_v3, 4 }
 0x13f   : > { %v8550_v61 = vadd.f32 %v1527_v56, %v1103_v58  ;;  %v1124_v45 = vadd.f32 %v6000_v54, %v9304_v21  ;;  %v6035_v59 = vpop.f32.mrf.mxu0  ;;  %6206 = vmatprep.mubr.msk.bf16.mxu1 %vm701_vm4, %v8402_v4  ;;  %v9306_v58 = vld [vmem:[#allocation21_spill] sm:$0xff]  ;;  %v3939_v52 = vrot.slane %v3937_v1, 5  ;;  %v4459_v47 = vrot.slane %v4457_v40, 4 }
 0x140   : > { %v1115_v37 = vpop.f32.mrf.mxu1  ;;  %v4460_v56 = vrot.slane %v8510_v35, 5  ;;  %v8578_v8 = vsel %vm6872_vm8, %v5598_v17, %v4457_v40  ;;  %v8581_v3 = vld [vmem:[%s6554_s9 + $0xc4] sm:$0xf]  ;;  %v9310_v35 = vcombine.low %v8360_v20, %v8364_v48  ;;  %v8593_v17 = vrot.slane %v3951_v41, 5 }
 0x141   : > { %v8562_v51 = vadd.f32 %v6034_v46, %v1124_v45  ;;  %v1116_v54 = vadd.f32 %v1115_v37, %v9306_v58  ;;  %v1543_v4 = vpop.f32.mrf.mxu0  ;;  %v9308_v46 = vld [vmem:[#allocation24_spill] sm:$0xff]  ;;  %v9309_v37 = vcombine.low %v8348_v57, %v8352_v53  ;;  %v3935_v58 = vrot.slane %v3934_v55, 4  ;;  %v9311_v55 = vld [vmem:[#allocation26_spill] sm:$0xff] }
 0x142   : > { %v6001_v21 = vpop.f32.mrf.mxu1  ;;  %v3966_v57 = vshrl.u32 %v5531_v29, 16  ;;  %v3969_v53 = vshll.u32 %v5531_v29, 16  ;;  %v3930_v20 = vsel %vm6606_vm5, %v3925_v33, %v8512_v50  ;;  %v8602_v48 = vsel %vm6872_vm8, %v4459_v47, %v4460_v56  ;;  %v5583_v29 = vld [vmem:[%s6554_s9 + $0xb4] sm:$0xe] }
 0x143   : > { %9305 = vst [vmem:[#allocation18_spill] sm:$0xff] %v8562_v51  ;;  %v8569_v24 = vadd.f32 %v1540_v31, %v1116_v54  ;;  %v1127_v6 = vadd.f32 %v6001_v21, %v9308_v46  ;;  %v6038_v45 = vpop.f32.mrf.mxu0  ;;  %6241 = vmatmul.mubr.msk.bf16.gmra.mxu0 %vm701_vm4, %v9309_v37  ;;  %v8588_v31 = vld [vmem:[%s6554_s9 + $0xbc] sm:$0x1]  ;;  %v3944_v54 = vrot.slane %v3942_v23, 4  ;;  %v3947_v21 = vrot.slane %v3945_v13, 5 }
 0x144   : > { %v1118_v1 = vpop.f32.mrf.mxu1  ;;  %6244 = vmatprep.mubr.msk.bf16.mxu0 %vm701_vm4, %v9310_v35  ;;  %v3979_v23 = vshrl.u32 %v8581_v3, 16  ;;  %v3961_v50 = vshll.u32 %v8588_v31, 16  ;;  %v4464_v47 = vrot.slane %v8548_v22, 5  ;;  %v9312_v35 = vld [vmem:[#allocation28_spill] sm:$0xff] }
 0x145   : > { %9307 = vst [vmem:[#allocation6_spill] sm:$0xff] %v8569_v24  ;;  %v8590_v46 = vadd.f32 %v6035_v59, %v1127_v6  ;;  %v1119_v37 = vadd.f32 %v1118_v1, %v9311_v55  ;;  %v1556_v40 = vpop.f32.mrf.mxu0  ;;  %v3957_v24 = vrot.slane %v3955_v44, 4  ;;  %v3975_v59 = vshll.u32 %v8581_v3, 16 }
 0x146   : > { %v6004_v51 = vpop.f32.mrf.mxu1  ;;  %6207 = vmatmul.mubr.msk.bf16.gmra.mxu1 %vm701_vm4, %v8404_v39  ;;  %v3940_v39 = vsel %vm6606_vm5, %v3935_v58, %v3939_v52  ;;  %v3948_v56 = vor.u32 %v3947_v21, %v3944_v54  ;;  %v3968_v6 = vrot.slane %v3966_v57, 4  ;;  %v3971_v1 = vrot.slane %v3969_v53, 5 }
 0x147   : > { %v8606_v13 = vadd.f32 %v1543_v4, %v1119_v37  ;;  %v1140_v41 = vadd.f32 %v6004_v51, %v8312_v11  ;;  %v6039_v44 = vpop.f32.mrf.mxu0  ;;  %6210 = vmatprep.mubr.msk.bf16.mxu1 %vm701_vm4, %v8410_v18  ;;  %v9313_v18 = vsel %vm6606_vm5, %v8500_v2, %v8464_v32  ;;  %v3958_v58 = vor.u32 %v3957_v24, %v8593_v17 }
 0x148   : > { %v1131_v33 = vpop.f32.mrf.mxu1  ;;  %v8624_v52 = vcombine.low %v9313_v18, %v3916_v30  ;;  %v8627_v22 = vcombine.low %v3930_v20, %v3940_v39  ;;  %v8631_v21 = vrot.slane %v3975_v59, 5  ;;  %v3981_v57 = vrot.slane %v3979_v23, 4  ;;  %v5533_v30 = vld [vmem:[%s6554_s9 + $0xc8] sm:$0x1] }
 0x149   : > { %v8616_v4 = vadd.f32 %v6038_v45, %v1140_v41  ;;  %v1132_v11 = vadd.f32 %v1131_v33, %v9312_v35  ;;  %v1559_v51 = vpop.f32.mrf.mxu0  ;;  %v5615_v45 = vcombine.low %v8578_v8, %v8602_v48  ;;  %v9314_v32 = vcombine.low %v8430_v62, %v8452_v15  ;;  %v5534_v8 = vld [vmem:[%s6554_s9 + $0xcc] sm:$0xf]  ;;  %v8652_v15 = vld [vmem:[%s6554_s9 + $0xd0] sm:$0xf]  ;;  %v5584_v33 = vld [vmem:[%s6554_s9 + $0xc0] sm:$0xe] }
 0x14a   : > { %v6005_v54 = vpop.f32.mrf.mxu1  ;;  %v8640_v24 = vrot.slane %v3961_v50, 5  ;;  %v5599_v2 = vrot.slane %v5583_v29, 9  ;;  %v9315_v48 = vcombine.low %v8462_v26, %v8492_v12  ;;  %v4467_v59 = vrot.slane %v8588_v31, 5 }
 0x14b   : > { %v8633_v53 = vadd.f32 %v1556_v40, %v1132_v11  ;;  %v1143_v55 = vadd.f32 %v6005_v54, %v8335_v49  ;;  %v6042_v37 = vpop.f32.mrf.mxu0  ;;  %6245 = vmatmul.mubr.msk.bf16.gmra.mxu0 %vm701_vm4, %v9314_v32  ;;  %v8648_v40 = vrot.slane %v3948_v56, 4  ;;  %v4466_v49 = vrot.slane %v4464_v47, 4 }
 0x14c   : > { %v1134_v20 = vpop.f32.mrf.mxu1  ;;  %6248 = vmatprep.mubr.msk.bf16.mxu0 %vm701_vm4, %v9315_v48  ;;  %v3972_v62 = vor.u32 %v3971_v1, %v3968_v6  ;;  %v8657_v50 = vrot.slane %v3958_v58, 4  ;;  %v4471_v26 = vrot.slane %v8581_v3, 5  ;;  %v3982_v56 = vor.u32 %v3981_v57, %v8631_v21 }
 0x14d   : > { %v8654_v23 = vadd.f32 %v6039_v44, %v1143_v55  ;;  %v1135_v41 = vadd.f32 %v1134_v20, %v8367_v10  ;;  %v1572_v39 = vpop.f32.mrf.mxu0  ;;  %v3985_v31 = vshll.u32 %v5533_v30, 16  ;;  %v3990_v29 = vshrl.u32 %v5534_v8, 16  ;;  %v9318_v44 = vld [vmem:[#allocation8_spill] sm:$0xff]  ;;  %v9319_v55 = vld [vmem:[#allocation9_spill] sm:$0xff] }
 0x14e   : > { %v6008_v12 = vpop.f32.mrf.mxu1  ;;  %6211 = vmatmul.mubr.msk.bf16.gmra.mxu1 %vm701_vm4, %v8439_v25  ;;  %v3993_v6 = vshll.u32 %v5534_v8, 16  ;;  %v3999_v11 = vshll.u32 %v8652_v15, 16  ;;  %v4003_v3 = vshrl.u32 %v8652_v15, 16  ;;  %v4465_v25 = vsel %vm6872_vm8, %v5599_v2, %v4464_v47  ;;  %v9320_v47 = vld [vmem:[#allocation10_spill] sm:$0xff] }
 0x14f   : > { %9316 = vst [vmem:[#allocation19_spill] sm:$0xff] %v8654_v23  ;;  %v8664_v1 = vadd.f32 %v1559_v51, %v1135_v41  ;;  %v1156_v35 = vadd.f32 %v6008_v12, %v9318_v44  ;;  %v6043_v10 = vpop.f32.mrf.mxu0  ;;  %6214 = vmatprep.mubr.msk.bf16.mxu1 %vm701_vm4, %v8518_v9  ;;  %v4468_v58 = vsel %vm6872_vm8, %v4466_v49, %v4467_v59  ;;  %v3973_v54 = vrot.slane %v3972_v62, 4 }
 0x150   : > { %v1147_v18 = vpop.f32.mrf.mxu1  ;;  %v5600_v51 = vrot.slane %v5584_v33, 9  ;;  %v4473_v20 = vrot.slane %v4471_v26, 4  ;;  %v4474_v9 = vrot.slane %v5533_v30, 5  ;;  %v3983_v41 = vrot.slane %v3982_v56, 4  ;;  %v5536_v56 = vld [vmem:[%s6554_s9 + $0xd4] sm:$0x1] }
 0x151   : > { %9317 = vst [vmem:[#allocation13_spill] sm:$0xff] %v8664_v1  ;;  %v8675_v57 = vadd.f32 %v6042_v37, %v1156_v35  ;;  %v1148_v32 = vadd.f32 %v1147_v18, %v9319_v55  ;;  %v1575_v8 = vpop.f32.mrf.mxu0  ;;  %v3987_v12 = vrot.slane %v3985_v31, 5  ;;  %v3992_v44 = vrot.slane %v3990_v29, 4  ;;  %v9322_v31 = vld [vmem:[#allocation11_spill] sm:$0xff] }
 0x152   : > { %v6009_v48 = vpop.f32.mrf.mxu1  ;;  %v3995_v1 = vrot.slane %v3993_v6, 5  ;;  %v9321_v37 = vcombine.low %v8532_v0, %v8536_v14  ;;  %v8685_v59 = vrot.slane %v3999_v11, 5  ;;  %v4005_v30 = vrot.slane %v4003_v3, 4 }
 0x153   : > { %v8678_v23 = vadd.f32 %v1572_v39, %v1148_v32  ;;  %v1159_v2 = vadd.f32 %v6009_v48, %v9320_v47  ;;  %v6046_v49 = vpop.f32.mrf.mxu0  ;;  %v3954_v39 = vsel %vm6606_vm5, %v8648_v40, %v8593_v17  ;;  %v3964_v33 = vsel %vm6606_vm5, %v8657_v50, %v8640_v24  ;;  %v5585_v17 = vld [vmem:[%s6554_s9 + $0xcc] sm:$0xe]  ;;  %s9005_s9 = scalar_lea.vmem [#allocation2], %s5097_s8 }
 0x154   : > { %6249 = vmatmul.mubr.msk.bf16.gmra.mxu0 %vm701_vm4, %v9321_v37  ;;  %v1150_v62 = vpop.f32.mrf.mxu1  ;;  %v4478_v0 = vrot.slane %v8652_v15, 5  ;;  %v4475_v35 = vsel %vm6872_vm8, %v4473_v20, %v4474_v9  ;;  %v5616_v24 = vcombine.low %v4465_v25, %v4468_v58  ;;  %v3978_v15 = vsel %vm6606_vm5, %v3973_v54, %v8631_v21  ;;  %v9324_v20 = vld [vmem:[#allocation15_spill] sm:$0xff]  ;;  %s4991_s11 = sshll.u32 %s9005_s9, 4  ;;  %s9104_s11 = int_to_ptr.vmem [resolvable:$true] %s4991_s11 }
 0x155   : > { %6252 = vmatprep.mubr.msk.bf16.mxu0 %vm701_vm4, %v5615_v45  ;;  %v8698_v14 = vadd.f32 %v6043_v10, %v1159_v2  ;;  %v1151_v29 = vadd.f32 %v1150_v62, %v9322_v31  ;;  %v1588_v6 = vpop.f32.mrf.mxu0  ;;  %v4472_v45 = vsel %vm6872_vm8, %v5600_v51, %v4471_v26  ;;  %v3988_v50 = vsel %vm6606_vm5, %v3983_v41, %v3987_v12  ;;  %v9323_v26 = vld [vmem:[#allocation12_spill] sm:$0xff]  ;;  %s6374_s23 = scalar_lea.vmem %s9104_s11, 2048  ;;  %p6381_p1 = scmp.lt.s32.totalorder %s9104_s11, %s6379_s27 }
 0x156   : > { %v6012_v40 = vpop.f32.mrf.mxu1  ;;  %6215 = vmatmul.mubr.msk.bf16.gmra.mxu1 %vm701_vm4, %v8624_v52  ;;  %v3996_v10 = vor.u32 %v3995_v1, %v3992_v44  ;;  %v4006_v51 = vor.u32 %v4005_v30, %v8685_v59  ;;  %v4009_v52 = vshll.u32 %v5536_v56, 16  ;;  %v5617_v58 = vcombine.low %v4472_v45, %v4475_v35  ;;  %p6375_p12 = scmp.ne.s32.totalorder %s9104_s11, %s6374_s23  ;;  %p6382_p2 = scmp.lt.s32.totalorder %s6380_s28, %s6374_s23 }
 0x157   : > { %v8713_v11 = vadd.f32 %v1575_v8, %v1151_v29  ;;  %v1172_v3 = vadd.f32 %v6012_v40, %v9323_v26  ;;  %v6047_v18 = vpop.f32.mrf.mxu0  ;;  %6218 = vmatprep.mubr.msk.bf16.mxu1 %vm701_vm4, %v8627_v22  ;;  %v5601_v55 = vrot.slane %v5585_v17, 9  ;;  %v4480_v32 = vrot.slane %v4478_v0, 4  ;;  %v9325_v22 = vld [vmem:[#allocation7_spill] sm:$0xff]  ;;  %v9327_v17 = vld [vmem:[#allocation20_spill] sm:$0xff] }
 0x158   : > { %v1163_v25 = vpop.f32.mrf.mxu1  ;;  %v4481_v21 = vrot.slane %v5536_v56, 5  ;;  %v5551_v48 = vcombine.low %v3954_v39, %v3964_v33  ;;  %v5552_v41 = vcombine.low %v3978_v15, %v3988_v50  ;;  %v3997_v12 = vrot.slane %v3996_v10, 4  ;;  %v9326_v56 = vld [vmem:[#allocation16_spill] sm:$0xff]  ;;  %v9328_v10 = vld [vmem:[#allocation23_spill] sm:$0xff]  ;;  %p6376_p13 = pnand %p6375_p12, %p6516_p4  ;;  %p6383_p3 = por %p6382_p2, %p6381_p1 }
 0x159   : > { %v8719_v54 = vadd.f32 %v6046_v49, %v1172_v3  ;;  %v1164_v1 = vadd.f32 %v1163_v25, %v9324_v20  ;;  %v1591_v8 = vpop.f32.mrf.mxu0  ;;  %v4007_v37 = vrot.slane %v4006_v51, 4  ;;  %v4011_v30 = vrot.slane %v4009_v52, 5  ;;  %v9329_v52 = vld [vmem:[#allocation25_spill] sm:$0xff] }
 0x15a   : > { %v6013_v9 = vpop.f32.mrf.mxu1  ;;  %v4479_v49 = vsel %vm6872_vm8, %v5601_v55, %v4478_v0  ;;  %v4482_v39 = vsel %vm6872_vm8, %v4480_v32, %v4481_v21  ;;  %v4002_v45 = vsel %vm6606_vm5, %v3997_v12, %v8685_v59  ;;  %p6377_p0 = pneg %p6376_p13 }
 0x15b   : > { %v8722_v44 = vadd.f32 %v1588_v6, %v1164_v1  ;;  %v1175_v47 = vadd.f32 %v6013_v9, %v9325_v22  ;;  %v6050_v2 = vpop.f32.mrf.mxu0  ;;  %v4012_v63 = vsel %vm6606_vm5, %v4007_v37, %v4011_v30 }
 0x15c   : > { %6253 = vmatmul.mubr.msk.bf16.gmra.mxu0 %vm701_vm4, %v5616_v24  ;;  %v1166_v62 = vpop.f32.mrf.mxu1  ;;  %v5618_v24 = vcombine.low %v4479_v49, %v4482_v39  ;;  %v5553_v51 = vcombine.low %v4002_v45, %v4012_v63  ;;  %p6384_p5 = pnand %p6383_p3, %p6377_p0 }
 0x15d   : > { %6256 = vmatprep.mubr.msk.bf16.mxu0 %vm701_vm4, %v5617_v58  ;;  %v8731_v33 = vadd.f32 %v6047_v18, %v1175_v47  ;;  %v1167_v31 = vadd.f32 %v1166_v62, %v9326_v56  ;;  %v1604_v29 = vpop.f32.mrf.mxu0 }
 0x15e   : > { %v6016_v6 = vpop.f32.mrf.mxu1  ;;  %6219 = vmatmul.mubr.msk.bf16.gmra.mxu1 %vm701_vm4, %v5551_v48 }
 0x15f   : > { %v8738_v35 = vadd.f32 %v1591_v8, %v1167_v31  ;;  %v1188_v40 = vadd.f32 %v6016_v6, %v9327_v17  ;;  %v6051_v0 = vpop.f32.mrf.mxu0  ;;  %6222 = vmatprep.mubr.msk.bf16.mxu1 %vm701_vm4, %v5552_v41 }
 0x160   : > { %v1179_v15 = vpop.f32.mrf.mxu1 }
 0x161   : > { %v8744_v50 = vadd.f32 %v6050_v2, %v1188_v40  ;;  %v1180_v26 = vadd.f32 %v1179_v15, %v9328_v10  ;;  %v1607_v3 = vpop.f32.mrf.mxu0 }
 0x162   : > { %v6017_v18 = vpop.f32.mrf.mxu1 }
 0x163   : > { %v8747_v59 = vadd.f32 %v1604_v29, %v1180_v26  ;;  %v1191_v25 = vadd.f32 %v6017_v18, %v9329_v52  ;;  %v6054_v58 = vpop.f32.mrf.mxu0 }
 0x164   : > { %6257 = vmatmul.mubr.msk.bf16.gmra.mxu0 %vm701_vm4, %v5618_v24  ;;  %v1182_v55 = vpop.f32.mrf.mxu1 }
 0x165   : > { %v8751_v32 = vadd.f32 %v6051_v0, %v1191_v25  ;;  %v1183_v21 = vadd.f32 %v1182_v55, %v9330_v38  ;;  %v1620_v20 = vpop.f32.mrf.mxu0 }
 0x166   : > { %v6020_v1 = vpop.f32.mrf.mxu1  ;;  %6223 = vmatmul.mubr.msk.bf16.gmra.mxu1 %vm701_vm4, %v5553_v51 }
 0x167   : > { %v8755_v8 = vadd.f32 %v1607_v3, %v1183_v21  ;;  %v1204_v9 = vadd.f32 %v6020_v1, %v8327_v16  ;;  %v6055_v48 = vpop.f32.mrf.mxu0 }
 0x168   : > { %v1195_v41 = vpop.f32.mrf.mxu1 }
 0x169   : > { %v8758_v12 = vadd.f32 %v6054_v58, %v1204_v9  ;;  %v1196_v22 = vadd.f32 %v1195_v41, %v8354_v43  ;;  %v1623_v47 = vpop.f32.mrf.mxu0 }
 0x16a   : > { %v6021_v2 = vpop.f32.mrf.mxu1 }
 0x16b   : > { %v8761_v37 = vadd.f32 %v1620_v20, %v1196_v22  ;;  %v1207_v30 = vadd.f32 %v6021_v2, %v8369_v60  ;;  %v6094_v62 = vpop.f32.mrf.mxu0  ;;  %v9331_v22 = vld [vmem:[#allocation18_spill] sm:$0xff] }
 0x16c   : > { %v1198_v49 = vpop.f32.mrf.mxu1 }
 0x16d   : > { %v8764_v39 = vadd.f32 %v6055_v48, %v1207_v30  ;;  %v1199_v56 = vadd.f32 %v1198_v49, %v8391_v28  ;;  %v2593_v31 = vpop.f32.mrf.mxu0 }
 0x16e   : > { %v6060_v16 = vpop.f32.mrf.mxu1 }
 0x16f   : > { %v8767_v29 = vadd.f32 %v1623_v47, %v1199_v56  ;;  %v1996_v6 = vadd.f32 %v6060_v16, %v8436_v5  ;;  %v6095_v45 = vpop.f32.mrf.mxu0 }
 0x170   : > { %v1867_v43 = vpop.f32.mrf.mxu1 }
 0x171   : > { %v8770_v17 = vadd.f32 %v6094_v62, %v1996_v6  ;;  %v1994_v40 = vadd.f32 %v1867_v43, %v8443_v27  ;;  %v2596_v0 = vpop.f32.mrf.mxu0  ;;  %v9332_v62 = vld [vmem:[#allocation6_spill] sm:$0xff] }
 0x172   : > { %v6061_v60 = vpop.f32.mrf.mxu1 }
 0x173   : > { %v8773_v63 = vadd.f32 %v2593_v31, %v1994_v40  ;;  %v1997_v24 = vadd.f32 %v6061_v60, %v8469_v19  ;;  %v6098_v15 = vpop.f32.mrf.mxu0 }
 0x174   : > { %v1870_v28 = vpop.f32.mrf.mxu1 }
 0x175   : > { %v8776_v10 = vadd.f32 %v6095_v45, %v1997_v24  ;;  %v1995_v26 = vadd.f32 %v1870_v28, %v8483_v7  ;;  %v2609_v3 = vpop.f32.mrf.mxu0 }
 0x176   : > { %v6064_v5 = vpop.f32.mrf.mxu1 }
 0x177   : > { %v8779_v18 = vadd.f32 %v2596_v0, %v1995_v26  ;;  %v2000_v51 = vadd.f32 %v6064_v5, %v8495_v42  ;;  %v6099_v52 = vpop.f32.mrf.mxu0 }
 0x178   : > { %v1883_v27 = vpop.f32.mrf.mxu1 }
 0x179   : > { %v8782_v25 = vadd.f32 %v6098_v15, %v2000_v51  ;;  %v1998_v58 = vadd.f32 %v1883_v27, %v8502_v34  ;;  %v2612_v55 = vpop.f32.mrf.mxu0 }
 0x17a   : > { %v6065_v19 = vpop.f32.mrf.mxu1 }
 0x17b   : > { %v8785_v38 = vadd.f32 %v2609_v3, %v1998_v58  ;;  %v2001_v21 = vadd.f32 %v6065_v19, %v8527_v36  ;;  %v6102_v20 = vpop.f32.mrf.mxu0  ;;  %v9334_v19 = vld [vmem:[#allocation13_spill] sm:$0xff] }
 0x17c   : > { %v1886_v7 = vpop.f32.mrf.mxu1 }
 0x17d   : > { %v8788_v1 = vadd.f32 %v6099_v52, %v2001_v21  ;;  %v1999_v9 = vadd.f32 %v1886_v7, %v8550_v61  ;;  %v2625_v48 = vpop.f32.mrf.mxu0  ;;  %v9333_v52 = vld [vmem:[#allocation19_spill] sm:$0xff] }
 0x17e   : > { %v6068_v42 = vpop.f32.mrf.mxu1 }
 0x17f   : > { %v8791_v41 = vadd.f32 %v2612_v55, %v1999_v9  ;;  %v2004_v47 = vadd.f32 %v6068_v42, %v9331_v22  ;;  %v6103_v2 = vpop.f32.mrf.mxu0 }
 0x180   : > { %v1899_v34 = vpop.f32.mrf.mxu1 }
 0x181   : > { %v8794_v30 = vadd.f32 %v6102_v20, %v2004_v47  ;;  %v2002_v49 = vadd.f32 %v1899_v34, %v9332_v62  ;;  %v2628_v56 = vpop.f32.mrf.mxu0 }
 0x182   : > { %v6069_v36 = vpop.f32.mrf.mxu1 }
 0x183   : > { %v8797_v31 = vadd.f32 %v2625_v48, %v2002_v49  ;;  %v2005_v16 = vadd.f32 %v6069_v36, %v8590_v46  ;;  %v6106_v6 = vpop.f32.mrf.mxu0 }
 0x184   : > { %v1902_v61 = vpop.f32.mrf.mxu1 }
 0x185   : > { %v8800_v45 = vadd.f32 %v6103_v2, %v2005_v16  ;;  %v2003_v43 = vadd.f32 %v1902_v61, %v8606_v13  ;;  %v2641_v40 = vpop.f32.mrf.mxu0 }
 0x186   : > { %v6072_v0 = vpop.f32.mrf.mxu1 }
 0x187   : > { %v8803_v60 = vadd.f32 %v2628_v56, %v2003_v43  ;;  %v2008_v24 = vadd.f32 %v6072_v0, %v8616_v4  ;;  %v6107_v15 = vpop.f32.mrf.mxu0 }
 0x188   : > { %v1915_v28 = vpop.f32.mrf.mxu1 }
 0x189   : > { %v8806_v26 = vadd.f32 %v6106_v6, %v2008_v24  ;;  %v2006_v3 = vadd.f32 %v1915_v28, %v8633_v53  ;;  %v2644_v5 = vpop.f32.mrf.mxu0 }
 0x18a   : > { %v6073_v46 = vpop.f32.mrf.mxu1 }
 0x18b   : > { %v8809_v51 = vadd.f32 %v2641_v40, %v2006_v3  ;;  %v2009_v27 = vadd.f32 %v6073_v46, %v9333_v52  ;;  %v6110_v58 = vpop.f32.mrf.mxu0 }
 0x18c   : > { %v1918_v13 = vpop.f32.mrf.mxu1 }
 0x18d   : > { %v8812_v55 = vadd.f32 %v6107_v15, %v2009_v27  ;;  %v2007_v21 = vadd.f32 %v1918_v13, %v9334_v19  ;;  %v2657_v20 = vpop.f32.mrf.mxu0 }
 0x18e   : > { %v6076_v4 = vpop.f32.mrf.mxu1 }
 0x18f   : > { %v8815_v7 = vadd.f32 %v2644_v5, %v2007_v21  ;;  %v2012_v9 = vadd.f32 %v6076_v4, %v8675_v57  ;;  %v6111_v48 = vpop.f32.mrf.mxu0 }
 0x190   : > { %v1931_v53 = vpop.f32.mrf.mxu1 }
 0x191   : > { %v8818_v42 = vadd.f32 %v6110_v58, %v2012_v9  ;;  %v2010_v22 = vadd.f32 %v1931_v53, %v8678_v23  ;;  %v2660_v47 = vpop.f32.mrf.mxu0 }
 0x192   : > { %v6077_v2 = vpop.f32.mrf.mxu1 }
 0x193   : > { %v8821_v34 = vadd.f32 %v2657_v20, %v2010_v22  ;;  %v2013_v62 = vadd.f32 %v6077_v2, %v8698_v14  ;;  %v6114_v49 = vpop.f32.mrf.mxu0 }
 0x194   : > { %v1934_v56 = vpop.f32.mrf.mxu1 }
 0x195   : > { %v8824_v36 = vadd.f32 %v6111_v48, %v2013_v62  ;;  %v2011_v16 = vadd.f32 %v1934_v56, %v8713_v11  ;;  %v2673_v6 = vpop.f32.mrf.mxu0 }
 0x196   : > { %v6080_v57 = vpop.f32.mrf.mxu1 }
 0x197   : > { %v8827_v61 = vadd.f32 %v2660_v47, %v2011_v16  ;;  %v2016_v43 = vadd.f32 %v6080_v57, %v8719_v54  ;;  %v6115_v40 = vpop.f32.mrf.mxu0 }
 0x198   : > { %v1947_v23 = vpop.f32.mrf.mxu1 }
 0x199   : > { %v8830_v0 = vadd.f32 %v6114_v49, %v2016_v43  ;;  %v2014_v24 = vadd.f32 %v1947_v23, %v8722_v44  ;;  %v2676_v15 = vpop.f32.mrf.mxu0 }
 0x19a   : > { %v6081_v14 = vpop.f32.mrf.mxu1 }
 0x19b   : > { %v8833_v28 = vadd.f32 %v2673_v6, %v2014_v24  ;;  %v2017_v3 = vadd.f32 %v6081_v14, %v8731_v33  ;;  %v6118_v5 = vpop.f32.mrf.mxu0 }
 0x19c   : > { %v1950_v11 = vpop.f32.mrf.mxu1 }
 0x19d   : > { %v8836_v46 = vadd.f32 %v6115_v40, %v2017_v3  ;;  %v2015_v52 = vadd.f32 %v1950_v11, %v8738_v35  ;;  %v2689_v27 = vpop.f32.mrf.mxu0 }
 0x19e   : > { %v6084_v54 = vpop.f32.mrf.mxu1 }
 0x19f   : > { %v8839_v58 = vadd.f32 %v2676_v15, %v2015_v52  ;;  %v2020_v13 = vadd.f32 %v6084_v54, %v8744_v50  ;;  %v6119_v19 = vpop.f32.mrf.mxu0 }
 0x1a0   : > { %v1963_v44 = vpop.f32.mrf.mxu1 }
 0x1a1   : > { %v8842_v21 = vadd.f32 %v6118_v5, %v2020_v13  ;;  %v2018_v20 = vadd.f32 %v1963_v44, %v8747_v59  ;;  %v2692_v4 = vpop.f32.mrf.mxu0 }
 0x1a2   : > { %v6085_v33 = vpop.f32.mrf.mxu1 }
 0x1a3   : > { %v8845_v9 = vadd.f32 %v2689_v27, %v2018_v20  ;;  %v2021_v48 = vadd.f32 %v6085_v33, %v8751_v32  ;;  %v6122_v53 = vpop.f32.mrf.mxu0 }
 0x1a4   : > { %v1966_v35 = vpop.f32.mrf.mxu1 }
 0x1a5   : > { %v8848_v22 = vadd.f32 %v6119_v19, %v2021_v48  ;;  %v2019_v47 = vadd.f32 %v1966_v35, %v8755_v8  ;;  %v2705_v2 = vpop.f32.mrf.mxu0 }
 0x1a6   : > { %v6088_v50 = vpop.f32.mrf.mxu1 }
 0x1a7   : > { %9335 = vst [vmem:[#allocation14_spill] sm:$0xff] %v8848_v22  ;;  %v8851_v62 = vadd.f32 %v2692_v4, %v2019_v47  ;;  %v2024_v49 = vadd.f32 %v6088_v50, %v8758_v12  ;;  %v6123_v56 = vpop.f32.mrf.mxu0 }
 0x1a8   : > { %v1979_v59 = vpop.f32.mrf.mxu1 }
 0x1a9   : > { %9336 = vst [vmem:[#allocation5_spill] sm:$0xff] %v8851_v62  ;;  %v8854_v16 = vadd.f32 %v6122_v53, %v2024_v49  ;;  %v2022_v6 = vadd.f32 %v1979_v59, %v8761_v37  ;;  %v2708_v57 = vpop.f32.mrf.mxu0 }
 0x1aa   : > { %v6089_v32 = vpop.f32.mrf.mxu1 }
 0x1ab   : > { %v8857_v43 = vadd.f32 %v2705_v2, %v2022_v6  ;;  %v2025_v40 = vadd.f32 %v6089_v32, %v8764_v39  ;;  %v6162_v23 = vpop.f32.mrf.mxu0 }
 0x1ac   : > { %v1982_v8 = vpop.f32.mrf.mxu1 }
 0x1ad   : > { %v8860_v24 = vadd.f32 %v6123_v56, %v2025_v40  ;;  %v2023_v15 = vadd.f32 %v1982_v8, %v8767_v29  ;;  %v3422_v14 = vpop.f32.mrf.mxu0 }
 0x1ae   : > { %v6128_v12 = vpop.f32.mrf.mxu1 }
 0x1af   : > { %9337 = vst [vmem:[#allocation22_spill] sm:$0xff] %v8860_v24  ;;  %v8863_v3 = vadd.f32 %v2708_v57, %v2023_v15  ;;  %v3192_v5 = vadd.f32 %v6128_v12, %v8770_v17  ;;  %v8866_v11 = vpop.f32.mrf.mxu0 }
 0x1b0   : > { %v3063_v37 = vpop.f32.mrf.mxu1 }
 0x1b1   : > { %9338 = vst [vmem:[#allocation17_spill] sm:$0xff] %v8863_v3  ;;  %v8868_v52 = vadd.f32 %v6162_v23, %v3192_v5  ;;  %v3190_v27 = vadd.f32 %v3063_v37, %v8773_v63  ;;  %v8871_v39 = vpop.f32.mrf.mxu0 }
 0x1b2   : > { %v8873_v54 = vpop.f32.mrf.mxu1 }
 0x1b3   : > { %v8875_v13 = vadd.f32 %v3422_v14, %v3190_v27  ;;  %v6166_v29 = vpop.f32.mrf.mxu0 }
 0x1b4   : > { %v8877_v19 = vpop.f32.mrf.mxu1 }
 0x1b5   : > { %v3438_v44 = vpop.f32.mrf.mxu0 }
 0x1b6   : > { %v6132_v20 = vpop.f32.mrf.mxu1 }
 0x1b7   : > { %v3196_v17 = vadd.f32 %v6132_v20, %v8782_v25  ;;  %v8880_v4 = vpop.f32.mrf.mxu0 }
 0x1b8   : > { %v3079_v33 = vpop.f32.mrf.mxu1 }
 0x1b9   : > { %v8882_v48 = vadd.f32 %v6166_v29, %v3196_v17  ;;  %v3194_v63 = vadd.f32 %v3079_v33, %v8785_v38  ;;  %v8885_v53 = vpop.f32.mrf.mxu0 }
 0x1ba   : > { %v8887_v35 = vpop.f32.mrf.mxu1 }
 0x1bb   : > { %v8889_v47 = vadd.f32 %v3438_v44, %v3194_v63  ;;  %v6170_v2 = vpop.f32.mrf.mxu0 }
 0x1bc   : > { %v8891_v50 = vpop.f32.mrf.mxu1 }
 0x1bd   : > { %v3454_v49 = vpop.f32.mrf.mxu0 }
 0x1be   : > { %v6136_v56 = vpop.f32.mrf.mxu1 }
 0x1bf   : > { %v3200_v25 = vadd.f32 %v6136_v56, %v8794_v30  ;;  %v8894_v59 = vpop.f32.mrf.mxu0 }
 0x1c0   : > { %v3095_v6 = vpop.f32.mrf.mxu1 }
 0x1c1   : > { %v8896_v57 = vadd.f32 %v6170_v2, %v3200_v25  ;;  %v3198_v38 = vadd.f32 %v3095_v6, %v8797_v31  ;;  %v8899_v32 = vpop.f32.mrf.mxu0 }
 0x1c2   : > { %v8901_v40 = vpop.f32.mrf.mxu1 }
 0x1c3   : > { %v8903_v23 = vadd.f32 %v3454_v49, %v3198_v38  ;;  %v6174_v8 = vpop.f32.mrf.mxu0 }
 0x1c4   : > { %v8905_v15 = vpop.f32.mrf.mxu1 }
 0x1c5   : > { %v3470_v14 = vpop.f32.mrf.mxu0 }
 0x1c6   : > { %v6140_v12 = vpop.f32.mrf.mxu1 }
 0x1c7   : > { %v3204_v30 = vadd.f32 %v6140_v12, %v8806_v26  ;;  %v8908_v5 = vpop.f32.mrf.mxu0 }
 0x1c8   : > { %v3111_v37 = vpop.f32.mrf.mxu1 }
 0x1c9   : > { %v8910_v27 = vadd.f32 %v6174_v8, %v3204_v30  ;;  %v3202_v31 = vadd.f32 %v3111_v37, %v8809_v51  ;;  %v8913_v29 = vpop.f32.mrf.mxu0 }
 0x1ca   : > { %v8915_v44 = vpop.f32.mrf.mxu1 }
 0x1cb   : > { %v8917_v20 = vadd.f32 %v3470_v14, %v3202_v31  ;;  %v6178_v17 = vpop.f32.mrf.mxu0 }
 0x1cc   : > { %v8919_v33 = vpop.f32.mrf.mxu1 }
 0x1cd   : > { %v3486_v63 = vpop.f32.mrf.mxu0 }
 0x1ce   : > { %v6144_v2 = vpop.f32.mrf.mxu1 }
 0x1cf   : > { %v3208_v26 = vadd.f32 %v6144_v2, %v8818_v42  ;;  %v8922_v49 = vpop.f32.mrf.mxu0 }
 0x1d0   : > { %v3127_v56 = vpop.f32.mrf.mxu1 }
 0x1d1   : > { %v8924_v25 = vadd.f32 %v6178_v17, %v3208_v26  ;;  %v3206_v51 = vadd.f32 %v3127_v56, %v8821_v34  ;;  %v8927_v6 = vpop.f32.mrf.mxu0 }
 0x1d2   : > { %v8929_v38 = vpop.f32.mrf.mxu1 }
 0x1d3   : > { %v8931_v8 = vadd.f32 %v3486_v63, %v3206_v51  ;;  %v6182_v14 = vpop.f32.mrf.mxu0 }
 0x1d4   : > { %v8933_v12 = vpop.f32.mrf.mxu1 }
 0x1d5   : > { %v3502_v30 = vpop.f32.mrf.mxu0 }
 0x1d6   : > { %v6148_v37 = vpop.f32.mrf.mxu1 }
 0x1d7   : > { %v3212_v42 = vadd.f32 %v6148_v37, %v8830_v0  ;;  %v8936_v31 = vpop.f32.mrf.mxu0 }
 0x1d8   : > { %9339 = vst [vmem:[#allocation21_spill] sm:$0xff] %v8936_v31  ;;  %v3143_v2 = vpop.f32.mrf.mxu1 }
 0x1d9   : > { %v8938_v17 = vadd.f32 %v6182_v14, %v3212_v42  ;;  %v3210_v34 = vadd.f32 %v3143_v2, %v8833_v28  ;;  %v8941_v26 = vpop.f32.mrf.mxu0 }
 0x1da   : > { %9340 = vst [vmem:[#allocation24_spill] sm:$0xff] %v8941_v26  ;;  %v8943_v56 = vpop.f32.mrf.mxu1 }
 0x1db   : > { %v8945_v63 = vadd.f32 %v3502_v30, %v3210_v34  ;;  %v6186_v51 = vpop.f32.mrf.mxu0 }
 0x1dc   : > { %v8947_v3 = vpop.f32.mrf.mxu1 }
 0x1dd   : > { %9341 = vst [vmem:[#allocation26_spill] sm:$0xff] %v8945_v63  ;;  %v3518_v24 = vpop.f32.mrf.mxu0 }
 0x1de   : > { %v6152_v62 = vpop.f32.mrf.mxu1 }
 0x1df   : > { %v3216_v0 = vadd.f32 %v6152_v62, %v8842_v21  ;;  %v8950_v37 = vpop.f32.mrf.mxu0 }
 0x1e0   : > { %9342 = vst [vmem:[#allocation28_spill] sm:$0xff] %v8950_v37  ;;  %v3159_v22 = vpop.f32.mrf.mxu1 }
 0x1e1   : > { %v8952_v14 = vadd.f32 %v6186_v51, %v3216_v0  ;;  %v3214_v28 = vadd.f32 %v3159_v22, %v8845_v9  ;;  %v8955_v42 = vpop.f32.mrf.mxu0 }
 0x1e2   : > { %9343 = vst [vmem:[#allocation8_spill] sm:$0xff] %v8955_v42  ;;  %v8957_v2 = vpop.f32.mrf.mxu1 }
 0x1e3   : > { %v8959_v30 = vadd.f32 %v3518_v24, %v3214_v28  ;;  %v6190_v34 = vpop.f32.mrf.mxu0 }
 0x1e4   : > { %v8961_v26 = vpop.f32.mrf.mxu1 }
 0x1e5   : > { %v3534_v63 = vpop.f32.mrf.mxu0 }
 0x1e6   : > { %v6156_v31 = vpop.f32.mrf.mxu1 }
 0x1e7   : > { %v3220_v21 = vadd.f32 %v6156_v31, %v8854_v16  ;;  %v8964_v62 = vpop.f32.mrf.mxu0  ;;  %v3193_v16 = vadd.f32 %v8873_v54, %v8776_v10 }
 0x1e8   : > { %9344 = vst [vmem:[#allocation9_spill] sm:$0xff] %v8964_v62  ;;  %v3175_v37 = vpop.f32.mrf.mxu1 }
 0x1e9   : > { %v8966_v51 = vadd.f32 %v6190_v34, %v3220_v21  ;;  %v3218_v9 = vadd.f32 %v3175_v37, %v8857_v43  ;;  %v8969_v22 = vpop.f32.mrf.mxu0  ;;  %v3191_v34 = vadd.f32 %v8877_v19, %v8779_v18  ;;  %v3197_v18 = vadd.f32 %v8887_v35, %v8788_v1 }
 0x1ea   : > { %9346 = vst [vmem:[#allocation11_spill] sm:$0xff] %v8969_v22  ;;  %v8971_v0 = vpop.f32.mrf.mxu1  ;;  %v3552_v22 = vadd.f32 %v8866_v11, %v3193_v16 }
 0x1eb   : > { %9345 = vst [vmem:[#allocation10_spill] sm:$0xff] %v8966_v51  ;;  %v8973_v24 = vadd.f32 %v3534_v63, %v3218_v9  ;;  %v6230_v28 = vpop.f32.mrf.mxu0  ;;  %v3550_v51 = vadd.f32 %v8871_v39, %v3191_v34  ;;  %v3195_v39 = vadd.f32 %v8891_v50, %v8791_v41 }
 0x1ec   : > { %v8975_v42 = vpop.f32.mrf.mxu1 }
 0x1ed   : > { %9347 = vst [vmem:[#allocation12_spill] sm:$0xff] %v8973_v24  ;;  %9348 = vst [vmem:[#allocation15_spill] sm:$0xff] %v8975_v42  ;;  %v4618_v31 = vpop.f32.mrf.mxu0 }
 0x1ee   : > { %v6196_v62 = vpop.f32.mrf.mxu1 }
 0x1ef   : > { %v4277_v43 = vadd.f32 %v6196_v62, %v8868_v52  ;;  %v6231_v37 = vpop.f32.mrf.mxu0  ;;  %v8991_v52 = vld [vmem:[%s9157_s2] ss:$0 sm:$0xff] }
 0x1f0   : > { %v4148_v21 = vpop.f32.mrf.mxu1 }
 0x1f1   : > { %v4275_v63 = vadd.f32 %v4148_v21, %v8875_v13  ;;  %v4621_v9 = vpop.f32.mrf.mxu0  ;;  %v4747_v10 = vadd.f32 %v6230_v28, %v4277_v43  ;;  %v3556_v43 = vadd.f32 %v8880_v4, %v3197_v18  ;;  %v3201_v18 = vadd.f32 %v8901_v40, %v8800_v45 }
 0x1f2   : > { %v6197_v24 = vpop.f32.mrf.mxu1 }
 0x1f3   : > { %v4278_v54 = vadd.f32 %v6197_v24, %v3552_v22  ;;  %v6234_v42 = vpop.f32.mrf.mxu0  ;;  %v4745_v11 = vadd.f32 %v4618_v31, %v4275_v63  ;;  %v4786_v24 = vadd.f32 %v8991_v52, %v4747_v10  ;;  %v3554_v10 = vadd.f32 %v8885_v53, %v3195_v39 }
 0x1f4   : > { %v4151_v19 = vpop.f32.mrf.mxu1  ;;  %v3199_v53 = vadd.f32 %v8905_v15, %v8803_v60  ;;  %v3560_v45 = vadd.f32 %v8894_v59, %v3201_v18  ;;  %v3205_v59 = vadd.f32 %v8915_v44, %v8812_v55 }
 0x1f5   : > { %v4748_v13 = vadd.f32 %v6231_v37, %v4278_v54  ;;  %v4276_v62 = vadd.f32 %v4151_v19, %v3550_v51  ;;  %v4634_v16 = vpop.f32.mrf.mxu0  ;;  %v4784_v21 = vadd.f32 %v8991_v52, %v4745_v11 }
 0x1f6   : > { %v6200_v22 = vpop.f32.mrf.mxu1  ;;  %v3564_v55 = vadd.f32 %v8908_v5, %v3205_v59  ;;  %v3209_v5 = vadd.f32 %v8929_v38, %v8824_v36 }
 0x1f7   : > { %v4787_v1 = vadd.f32 %v8991_v52, %v4748_v13  ;;  %v4746_v35 = vadd.f32 %v4621_v9, %v4276_v62  ;;  %v4281_v28 = vadd.f32 %v6200_v22, %v8882_v48  ;;  %v6235_v34 = vpop.f32.mrf.mxu0 }
 0x1f8   : > { %v4164_v31 = vpop.f32.mrf.mxu1  ;;  %v3568_v36 = vadd.f32 %v8922_v49, %v3209_v5  ;;  %v3213_v49 = vadd.f32 %v8943_v56, %v8836_v46  ;;  %v9349_v46 = vld [vmem:[#allocation21_spill] sm:$0xff] }
 0x1f9   : > { %v5714_v37 = vpack.c.bf16 %v4787_v1, %v4786_v24  ;;  %v4785_v51 = vadd.f32 %v8991_v52, %v4746_v35  ;;  %v4279_v63 = vadd.f32 %v4164_v31, %v8889_v47  ;;  %v4637_v41 = vpop.f32.mrf.mxu0  ;;  %v4751_v9 = vadd.f32 %v6234_v42, %v4281_v28 }
 0x1fa   : > { %v6201_v50 = vpop.f32.mrf.mxu1  ;;  %v3558_v31 = vadd.f32 %v8899_v32, %v3199_v53  ;;  %v3572_v56 = vadd.f32 %v9349_v46, %v3213_v49 }
 0x1fb   : > { %5786 = vst [vmem:[%s9005_s9 + $0x8] sm:$0xff] %v5714_v37   ;;  %v5709_v48 = vpack.c.bf16 %v4785_v51, %v4784_v21  ;;  %v4282_v4 = vadd.f32 %v6201_v50, %v3556_v43  ;;  %v6238_v54 = vpop.f32.mrf.mxu0  ;;  %v4749_v11 = vadd.f32 %v4634_v16, %v4279_v63  ;;  %v4790_v22 = vadd.f32 %v8991_v52, %v4751_v9 }
 0x1fc   : > { %v4167_v19 = vpop.f32.mrf.mxu1 }
 0x1fd   : > { %5710 = vst [vmem:[%s9005_s9] sm:$0xff] %v5709_v48   ;;  %v4752_v47 = vadd.f32 %v6235_v34, %v4282_v4  ;;  %v4280_v13 = vadd.f32 %v4167_v19, %v3554_v10  ;;  %v4650_v62 = vpop.f32.mrf.mxu0  ;;  %v4788_v16 = vadd.f32 %v8991_v52, %v4749_v11 }
 0x1fe   : > { %v6204_v39 = vpop.f32.mrf.mxu1 }
 0x1ff   : > { %v4791_v42 = vadd.f32 %v8991_v52, %v4752_v47  ;;  %v4750_v24 = vadd.f32 %v4637_v41, %v4280_v13  ;;  %v4285_v1 = vadd.f32 %v6204_v39, %v8896_v57  ;;  %v6239_v35 = vpop.f32.mrf.mxu0 }
 0x200   : > { %v4180_v40 = vpop.f32.mrf.mxu1 }
 0x201   : > { %v5724_v28 = vpack.c.bf16 %v4791_v42, %v4790_v22  ;;  %v4789_v34 = vadd.f32 %v8991_v52, %v4750_v24  ;;  %v4283_v60 = vadd.f32 %v4180_v40, %v8903_v23  ;;  %v4653_v15 = vpop.f32.mrf.mxu0  ;;  %v4755_v37 = vadd.f32 %v6238_v54, %v4285_v1 }
 0x202   : > { %v6205_v43 = vpop.f32.mrf.mxu1  ;;  %v3203_v23 = vadd.f32 %v8919_v33, %v8815_v7 }
 0x203   : > { %5788 = vst [vmem:[%s9005_s9 + $0x18] sm:$0xff] %v5724_v28   ;;  %v5719_v21 = vpack.c.bf16 %v4789_v34, %v4788_v16  ;;  %v4286_v57 = vadd.f32 %v6205_v43, %v3560_v45  ;;  %v6242_v51 = vpop.f32.mrf.mxu0  ;;  %v4753_v41 = vadd.f32 %v4650_v62, %v4283_v60  ;;  %v4794_v32 = vadd.f32 %v8991_v52, %v4755_v37 }
 0x204   : > { %v4183_v63 = vpop.f32.mrf.mxu1  ;;  %v3562_v53 = vadd.f32 %v8913_v29, %v3203_v23 }
 0x205   : > { %5787 = vst [vmem:[%s9005_s9 + $0x10] sm:$0xff] %v5719_v21   ;;  %v4756_v50 = vadd.f32 %v6239_v35, %v4286_v57  ;;  %v4284_v10 = vadd.f32 %v4183_v63, %v3558_v31  ;;  %v4666_v48 = vpop.f32.mrf.mxu0  ;;  %v4792_v11 = vadd.f32 %v8991_v52, %v4753_v41 }
 0x206   : > { %v6208_v9 = vpop.f32.mrf.mxu1 }
 0x207   : > { %v4795_v4 = vadd.f32 %v8991_v52, %v4756_v50  ;;  %v4754_v54 = vadd.f32 %v4653_v15, %v4284_v10  ;;  %v4289_v18 = vadd.f32 %v6208_v9, %v8910_v27  ;;  %v6243_v19 = vpop.f32.mrf.mxu0 }
 0x208   : > { %v4196_v44 = vpop.f32.mrf.mxu1 }
 0x209   : > { %v5734_v47 = vpack.c.bf16 %v4795_v4, %v4794_v32  ;;  %v4793_v13 = vadd.f32 %v8991_v52, %v4754_v54  ;;  %v4287_v7 = vadd.f32 %v4196_v44, %v8917_v20  ;;  %v4669_v33 = vpop.f32.mrf.mxu0  ;;  %v4759_v22 = vadd.f32 %v6242_v51, %v4289_v18 }
 0x20a   : > { %v6209_v62 = vpop.f32.mrf.mxu1  ;;  %v3207_v20 = vadd.f32 %v8933_v12, %v8827_v61 }
 0x20b   : > { %5790 = vst [vmem:[%s9005_s9 + $0x28] sm:$0xff] %v5734_v47   ;;  %v5729_v39 = vpack.c.bf16 %v4793_v13, %v4792_v11  ;;  %v4290_v27 = vadd.f32 %v6209_v62, %v3564_v55  ;;  %v6246_v42 = vpop.f32.mrf.mxu0  ;;  %v4757_v1 = vadd.f32 %v4666_v48, %v4287_v7  ;;  %v4798_v29 = vadd.f32 %v8991_v52, %v4759_v22  ;;  %v9351_v7 = vld [vmem:[#allocation24_spill] sm:$0xff]  ;;  %v9352_v22 = vld [vmem:[#allocation14_spill] sm:$0xff] }
 0x20c   : > { %v4199_v24 = vpop.f32.mrf.mxu1  ;;  %v3566_v57 = vadd.f32 %v8927_v6, %v3207_v20 }
 0x20d   : > { %5789 = vst [vmem:[%s9005_s9 + $0x20] sm:$0xff] %v5729_v39   ;;  %v4760_v35 = vadd.f32 %v6243_v19, %v4290_v27  ;;  %v4288_v45 = vadd.f32 %v4199_v24, %v3562_v53  ;;  %v4682_v40 = vpop.f32.mrf.mxu0  ;;  %v4796_v43 = vadd.f32 %v8991_v52, %v4757_v1  ;;  %v3217_v27 = vadd.f32 %v8957_v2, %v9352_v22  ;;  %v9354_v2 = vld [vmem:[#allocation28_spill] sm:$0xff] }
 0x20e   : > { %v6212_v16 = vpop.f32.mrf.mxu1 }
 0x20f   : > { %v4799_v28 = vadd.f32 %v8991_v52, %v4760_v35  ;;  %v4758_v34 = vadd.f32 %v4669_v33, %v4288_v45  ;;  %v4293_v60 = vadd.f32 %v6212_v16, %v8924_v25  ;;  %v6247_v15 = vpop.f32.mrf.mxu0  ;;  %v9353_v45 = vld [vmem:[#allocation5_spill] sm:$0xff] }
 0x210   : > { %v4212_v38 = vpop.f32.mrf.mxu1 }
 0x211   : > { %v5744_v31 = vpack.c.bf16 %v4799_v28, %v4798_v29  ;;  %v4797_v21 = vadd.f32 %v8991_v52, %v4758_v34  ;;  %v4291_v61 = vadd.f32 %v4212_v38, %v8931_v8  ;;  %v4685_v12 = vpop.f32.mrf.mxu0  ;;  %v4763_v59 = vadd.f32 %v6246_v42, %v4293_v60 }
 0x212   : > { %v6213_v37 = vpop.f32.mrf.mxu1  ;;  %v3211_v8 = vadd.f32 %v8947_v3, %v8839_v58  ;;  %v9350_v58 = vld [vmem:[#allocation26_spill] sm:$0xff] }
 0x213   : > { %5792 = vst [vmem:[%s9005_s9 + $0x38] sm:$0xff] %v5744_v31   ;;  %v5739_v51 = vpack.c.bf16 %v4797_v21, %v4796_v43  ;;  %v4294_v25 = vadd.f32 %v6213_v37, %v3568_v36  ;;  %v4761_v50 = vadd.f32 %v4682_v40, %v4291_v61  ;;  %v4802_v6 = vadd.f32 %v8991_v52, %v4763_v59 }
 0x214   : > { %v6250_v63 = vpop.f32.mrf.mxu0  ;;  %v4215_v41 = vpop.f32.mrf.mxu1  ;;  %v3570_v33 = vadd.f32 %v9351_v7, %v3211_v8  ;;  %v3215_v40 = vadd.f32 %v8961_v26, %v9353_v45 }
 0x215   : > { %5791 = vst [vmem:[%s9005_s9 + $0x30] sm:$0xff] %v5739_v51   ;;  %v4764_v10 = vadd.f32 %v6247_v15, %v4294_v25  ;;  %v4292_v48 = vadd.f32 %v4215_v41, %v3566_v57  ;;  %v4800_v55 = vadd.f32 %v8991_v52, %v4761_v50  ;;  %v3576_v15 = vadd.f32 %v9354_v2, %v3217_v27  ;;  %v9356_v25 = vld [vmem:[#allocation22_spill] sm:$0xff] }
 0x216   : > { %v4698_v23 = vpop.f32.mrf.mxu0  ;;  %v6216_v9 = vpop.f32.mrf.mxu1 }
 0x217   : > { %v4803_v32 = vadd.f32 %v8991_v52, %v4764_v10  ;;  %v4762_v4 = vadd.f32 %v4685_v12, %v4292_v48  ;;  %v4297_v54 = vadd.f32 %v6216_v9, %v8938_v17  ;;  %v9355_v12 = vld [vmem:[#allocation8_spill] sm:$0xff]  ;;  %v9357_v48 = vld [vmem:[#allocation17_spill] sm:$0xff] }
 0x218   : > { %v6251_v18 = vpop.f32.mrf.mxu0  ;;  %v4228_v19 = vpop.f32.mrf.mxu1  ;;  %v3574_v37 = vadd.f32 %v9355_v12, %v3215_v40 }
 0x219   : > { %v5754_v44 = vpack.c.bf16 %v4803_v32, %v4802_v6  ;;  %v4801_v11 = vadd.f32 %v8991_v52, %v4762_v4  ;;  %v4295_v3 = vadd.f32 %v4228_v19, %v9350_v58  ;;  %v4767_v53 = vadd.f32 %v6250_v63, %v4297_v54  ;;  %v9359_v54 = vld [vmem:[#allocation10_spill] sm:$0xff] }
 0x21a   : > { %v4701_v47 = vpop.f32.mrf.mxu0  ;;  %v6217_v13 = vpop.f32.mrf.mxu1  ;;  %v3221_v63 = vadd.f32 %v8971_v0, %v9356_v25  ;;  %v9360_v0 = vld [vmem:[#allocation9_spill] sm:$0xff] }
 0x21b   : > { %5794 = vst [vmem:[%s9005_s9 + $0x48] sm:$0xff] %v5754_v44   ;;  %v5749_v62 = vpack.c.bf16 %v4801_v11, %v4800_v55  ;;  %v4298_v17 = vadd.f32 %v6217_v13, %v3572_v56  ;;  %v4765_v5 = vadd.f32 %v4698_v23, %v4295_v3  ;;  %v4806_v16 = vadd.f32 %v8991_v52, %v4767_v53  ;;  %v9358_v23 = vld [vmem:[#allocation15_spill] sm:$0xff]  ;;  %v9361_v11 = vld [vmem:[#allocation12_spill] sm:$0xff] }
 0x21c   : > { %v6254_v39 = vpop.f32.mrf.mxu0  ;;  %v4231_v42 = vpop.f32.mrf.mxu1  ;;  %v3580_v46 = vadd.f32 %v9360_v0, %v3221_v63  ;;  %v9362_v13 = vld [vmem:[#allocation11_spill] sm:$0xff] }
 0x21d   : > { %5793 = vst [vmem:[%s9005_s9 + $0x40] sm:$0xff] %v5749_v62   ;;  %v4768_v24 = vadd.f32 %v6251_v18, %v4298_v17  ;;  %v4296_v1 = vadd.f32 %v4231_v42, %v3570_v33  ;;  %v4804_v38 = vadd.f32 %v8991_v52, %v4765_v5 }
 0x21e   : > { %v4714_v35 = vpop.f32.mrf.mxu0  ;;  %v6220_v20 = vpop.f32.mrf.mxu1 }
 0x21f   : > { %v4807_v29 = vadd.f32 %v8991_v52, %v4768_v24  ;;  %v4766_v28 = vadd.f32 %v4701_v47, %v4296_v1  ;;  %v4301_v34 = vadd.f32 %v6220_v20, %v8952_v14 }
 0x220   : > { %v6255_v60 = vpop.f32.mrf.mxu0  ;;  %v4244_v36 = vpop.f32.mrf.mxu1 }
 0x221   : > { %v5764_v43 = vpack.c.bf16 %v4807_v29, %v4806_v16  ;;  %v4805_v31 = vadd.f32 %v8991_v52, %v4766_v28  ;;  %v4299_v26 = vadd.f32 %v4244_v36, %v8959_v30  ;;  %v4771_v51 = vadd.f32 %v6254_v39, %v4301_v34 }
 0x222   : > { %v4717_v21 = vpop.f32.mrf.mxu0  ;;  %v6221_v61 = vpop.f32.mrf.mxu1  ;;  %v3219_v30 = vadd.f32 %v9358_v23, %v9357_v48 }
 0x223   : > { %5796 = vst [vmem:[%s9005_s9 + $0x58] sm:$0xff] %v5764_v43   ;;  %v5759_v57 = vpack.c.bf16 %v4805_v31, %v4804_v38  ;;  %v4302_v14 = vadd.f32 %v6221_v61, %v3576_v15  ;;  %v4769_v41 = vadd.f32 %v4714_v35, %v4299_v26  ;;  %v4810_v6 = vadd.f32 %v8991_v52, %v4771_v51 }
 0x224   : > { %v6258_v59 = vpop.f32.mrf.mxu0  ;;  %v4247_v49 = vpop.f32.mrf.mxu1  ;;  %v3578_v7 = vadd.f32 %v9362_v13, %v3219_v30 }
 0x225   : > { %5795 = vst [vmem:[%s9005_s9 + $0x50] sm:$0xff] %v5759_v57   ;;  %v4772_v50 = vadd.f32 %v6255_v60, %v4302_v14  ;;  %v4300_v10 = vadd.f32 %v4247_v49, %v3574_v37  ;;  %v4808_v19 = vadd.f32 %v8991_v52, %v4769_v41 }
 0x226   : > { %v6224_v8 = vpop.f32.mrf.mxu1  ;;  %v4730_v9 = vpop.f32.mrf.mxu0 }
 0x227   : > { %v4811_v32 = vadd.f32 %v8991_v52, %v4772_v50  ;;  %v4770_v4 = vadd.f32 %v4717_v21, %v4300_v10  ;;  %v4305_v18 = vadd.f32 %v6224_v8, %v9359_v54 }
 0x228   : > { %v4260_v56 = vpop.f32.mrf.mxu1  ;;  %v6259_v47 = vpop.f32.mrf.mxu0 }
 0x229   : > { %v5774_v55 = vpack.c.bf16 %v4811_v32, %v4810_v6  ;;  %v4809_v44 = vadd.f32 %v8991_v52, %v4770_v4  ;;  %v4303_v58 = vadd.f32 %v4260_v56, %v9361_v11  ;;  %v4775_v62 = vadd.f32 %v6258_v59, %v4305_v18 }
 0x22a   : > { %v6225_v3 = vpop.f32.mrf.mxu1  ;;  %v4733_v42 = vpop.f32.mrf.mxu0 }
 0x22b   : > { %5798 = vst [vmem:[%s9005_s9 + $0x68] sm:$0xff] %v5774_v55   ;;  %v5769_v33 = vpack.c.bf16 %v4809_v44, %v4808_v19  ;;  %v4306_v53 = vadd.f32 %v6225_v3, %v3580_v46  ;;  %v4773_v39 = vadd.f32 %v4730_v9, %v4303_v58  ;;  %v4814_v5 = vadd.f32 %v8991_v52, %v4775_v62 }
 0x22c   : > { %v4263_v17 = vpop.f32.mrf.mxu1 }
 0x22d   : > { %5797 = vst [vmem:[%s9005_s9 + $0x60] sm:$0xff] %v5769_v33   ;;  %v4776_v22 = vadd.f32 %v6259_v47, %v4306_v53  ;;  %v4304_v27 = vadd.f32 %v4263_v17, %v3578_v7  ;;  %v4812_v35 = vadd.f32 %v8991_v52, %v4773_v39 }
 0x22f   : > { %v4815_v24 = vadd.f32 %v8991_v52, %v4776_v22  ;;  %v4774_v1 = vadd.f32 %v4733_v42, %v4304_v27 }
 0x231   : > { %v5784_v45 = vpack.c.bf16 %v4815_v24, %v4814_v5  ;;  %v4813_v40 = vadd.f32 %v8991_v52, %v4774_v1 }
 0x233   : > { %5800 = vst [vmem:[%s9005_s9 + $0x78] sm:$0xff] %v5784_v45   ;;  %v5779_v20 = vpack.c.bf16 %v4813_v40, %v4812_v35 }
 0x235   : > { %5799 = vst [vmem:[%s9005_s9 + $0x70] sm:$0xff] %v5779_v20  }
 0x236   : > { %6387 = shalt.err (!%p6384_p5)
}
 0x237   : > { %s6388_s29 = scalar_lea.hbm %s9102_s21, 2048  ;;  %s6392_s5 = scalar_lea.hbm %s9158_s3, 4096 }
 0x238   : > { %p6389_p6 = scmp.ne.s32.totalorder %s9102_s21, %s6388_s29  ;;  %p6393_p10 = scmp.lt.s32.totalorder %s9102_s21, %s9158_s3 }
 0x239   : > { %p6394_p11 = scmp.lt.s32.totalorder %s6392_s5, %s6388_s29 }
 0x23a   : > { %p6390_p7 = pnand %p6389_p6, %p6516_p4 }
 0x23b   : > { %p6395_p12 = por %p6394_p11, %p6393_p10 }
 0x23c   : > { %p6391_p9 = pneg %p6390_p7 }
 0x23e   : > { %p6396_p13 = pnand %p6395_p12, %p6391_p9 }
 0x240   : > { %6399 = shalt.err (!%p6396_p13)
}
 0x241   : > { %s6454_s8 = smov 64   ;;  %s6455_s9 = smov 4  }
 0x242   : > { %6263 = dma.vmem_to_hbm [thread:$0]  (%p6516_p4), %s9104_s11, 2048, %s9102_s21, %s9110_s15, %s6454_s8, %s6454_s8, %s6455_s9  }
 0x243 PF: > { %p6269_p0 = scmp.ge.s32.totalorder %s6450_s17, 2  ;;  %s5006_s10 = sand.u32 1, %s6430_s12  }
 0x244   : > { %s5007_s18 = scalar_lea.sflag [#allocation3], %s5006_s10 }
 0x245   : > { %p6266_p1 = pnand %p6269_p0, %p6523_p8 }
 0x247   : > { %p6267_p2 = pneg %p6266_p1 }
 0x249   : > { %6425 = dma.done.wait (%p6267_p2), %s5007_s18, 2048  }
 0x24a   : > { %6427 = vsyncadd (%p6267_p2), %s5007_s18, 4294965248  ;;  %s16_s17 = sadd.s32 1, %s6450_s17   ;;  %s9363_s12 = smov %s6434_s13 }
 0x24b   : > { %p13_p3 = scmp.ge.s32.totalorder %s16_s17, 4   ;;  %s9364_s13 = smov %s6438_s14 }
 0x24c   : > { %s9365_s14 = smov %s6529_s25  ;;  %s9366_s15 = smov %s6446_s16 }
 0x24d   : > { %s9367_s16 = smov %s9369_s20  ;;  %15 = sbr.rel (!%p13_p3) target bundleno = 4 (0x4), region = 83 }
 0x252   :  { %5012 = vsyncpa [#allocation3], 1 }
 0x253   :  { %5014 = vsyncpa [#allocation3 + $0x1], 1 }

</bundles_post_ra>
